<compile_context>
chip_gen: v7x
topology: tpu7x:2x2x1
jax: 0.10.0
libtpu: 0.0.40
codegen_flags: <defaults>
</compile_context>

<pallas_src>
import functools

import jax
import jax.numpy as jnp
from jax import lax
from jax.experimental import pallas as pl
from jax.experimental.pallas import tpu as pltpu

K = 7                      # kernel_size
PAD = (K - 1) // 2         # same padding


def spatial_filter_kernel(x_ref, w_ref, shift_ref, out_ref, pmaps_ref, attf_ref,
                          *, C, H, W):
    # x_ref    : (1, C, H*W) VMEM  -- one batch element, lane-dense
    # w_ref    : (2*K*K,)    SMEM  -- conv weight * BN scale, flat [c, kh, kw]
    # shift_ref: (1,)        SMEM  -- folded BN shift
    # out_ref  : (1, C, H*W) VMEM
    # pmaps_ref: (2, Hp, Wp) VMEM f32 scratch -- zero-padded max/mean maps
    # attf_ref : (1, H*W)    VMEM f32 scratch -- flattened attention map
    HW = H * W
    x = x_ref[0]                                    # (C, HW), input dtype

    # Channel max in the native dtype (exact for bf16/f32); cast tiny result.
    max_flat = jnp.max(x, axis=0, keepdims=True).astype(jnp.float32)   # (1,HW)

    # Channel mean: f32 accumulation over 8-row sublane groups, so only one
    # (<=8, HW) f32 group is live at a time (no full-tile f32 copy).
    GROUP = 8
    sum_flat = jnp.zeros((1, HW), jnp.float32)
    for c0 in range(0, C, GROUP):
        c1 = min(C, c0 + GROUP)
        sum_flat = sum_flat + jnp.sum(
            x[c0:c1].astype(jnp.float32), axis=0, keepdims=True)
    mean_flat = sum_flat * (1.0 / C)                                    # (1,HW)

    # Zero the padded-map scratch (border zeros == conv same-padding).
    pmaps_ref[...] = jnp.zeros_like(pmaps_ref)

    lane_aligned = (W % 128 == 0)
    if lane_aligned:
        # Free lane-aligned reshapes + one dense store per map.
        pmaps_ref[0, PAD:PAD + H, PAD:PAD + W] = max_flat.reshape(H, W)
        pmaps_ref[1, PAD:PAD + H, PAD:PAD + W] = mean_flat.reshape(H, W)
    else:
        # Row-scatter flat->2D (doubles as the reshape; avoids relayouts).
        for i in range(H):
            r0, r1 = PAD + i, PAD + i + 1
            pmaps_ref[0, r0:r1, PAD:PAD + W] = max_flat[:, i * W:(i + 1) * W]
            pmaps_ref[1, r0:r1, PAD:PAD + W] = mean_flat[:, i * W:(i + 1) * W]

    # 7x7 conv, 2 input channels -> 1 output channel (BN scale pre-folded
    # into w). Hoisted lane shifts: one lane-sliced plane per (c, kw), then kh
    # as sublane slices; accumulate into 4 partial accumulators.
    accs = [jnp.zeros((H, W), jnp.float32) for _ in range(4)]
    n = 0
    for c in range(2):
        pm = pmaps_ref[c]                           # (Hp, Wp) f32
        for kw in range(K):
            plane = pm[:, kw:kw + W]                # (Hp, W): one lane shift
            for kh in range(K):
                wv = w_ref[c * K * K + kh * K + kw]
                accs[n & 3] = accs[n & 3] + wv * plane[kh:kh + H, :]
                n += 1
    conv = (accs[0] + accs[1]) + (accs[2] + accs[3])            # (H, W)

    # Folded BatchNorm shift (scale already in weights) + ReLU + sigmoid.
    y = jnp.maximum(conv + shift_ref[0], 0.0)
    att2d = pl.reciprocal(1.0 + jnp.exp(-y), approx=False)      # sigmoid(y)

    # Flatten the attention map back to lane-dense (1, HW).
    if lane_aligned:
        att = att2d.reshape(1, HW)                              # free reshape
    else:
        for i in range(H):
            attf_ref[:, i * W:(i + 1) * W] = att2d[i:i + 1, :]
        att = attf_ref[...]                                     # (1, HW) f32

    # Broadcast over channels, multiply with original x, unmasked dense store.
    # Note: for bf16 inputs the attention map is downcast before the multiply
    # (~1 ulp of bf16 vs multiplying in f32 then casting).
    out_ref[0] = (x * att.astype(x.dtype)).astype(out_ref.dtype)


def spatial_filter(x, conv_w, bn_gamma, bn_beta, bn_mean, bn_var, eps=1e-5,
                   donate_x=False):
    """x: (B, C, H, W); conv_w: (1, 2, K, K); BN params: (1,) each."""
    B, C, H, W = x.shape
    HW = H * W
    Hp, Wp = H + 2 * PAD, W + 2 * PAD

    # Lane-dense view; free (metadata-only) reshape of the contiguous array.
    x_flat = x.reshape(B, C, HW)

    # Fold eval-mode BN: scale into the conv weights, pass only the shift.
    scale = (bn_gamma / jnp.sqrt(bn_var + eps)).astype(jnp.float32)   # (1,)
    shift = (bn_beta - bn_mean * scale).astype(jnp.float32)           # (1,)
    w_flat = (conv_w.astype(jnp.float32)
              * scale.reshape(1, 1, 1, 1)).reshape(-1)                # (2*K*K,)

    kernel = functools.partial(spatial_filter_kernel, C=C, H=H, W=W)

    # VMEM budget: double-buffered in + out blocks, f32 scratch, compiler slack.
    itemsize = x.dtype.itemsize
    block_bytes = C * HW * itemsize
    scratch_bytes = (2 * Hp * Wp + HW) * 4
    vmem_bytes = 4 * block_bytes + 2 * scratch_bytes + (8 << 20)
    vmem_bytes = int(min(max(vmem_bytes, 32 << 20), 96 << 20))

    cost = pl.CostEstimate(
        flops=2 * B * (2 * C * HW + 2 * K * K * HW + 4 * HW),
        transcendentals=B * HW,
        bytes_accessed=2 * B * C * HW * itemsize + 2 * K * K * 4,
    )

    out_flat = pl.pallas_call(
        kernel,
        out_shape=jax.ShapeDtypeStruct((B, C, HW), x.dtype),
        grid_spec=pltpu.PrefetchScalarGridSpec(
            num_scalar_prefetch=0,
            grid=(B,),
            in_specs=[
                pl.BlockSpec((1, C, HW), lambda b: (b, 0, 0)),
                pl.BlockSpec(memory_space=pltpu.MemorySpace.SMEM),
                pl.BlockSpec(memory_space=pltpu.MemorySpace.SMEM),
            ],
            out_specs=pl.BlockSpec((1, C, HW), lambda b: (b, 0, 0)),
            scratch_shapes=[
                pltpu.VMEM((2, Hp, Wp), jnp.float32),
                pltpu.VMEM((1, HW), jnp.float32),
            ],
        ),
        compiler_params=pltpu.CompilerParams(
            dimension_semantics=("parallel",),
            vmem_limit_bytes=vmem_bytes),
        cost_estimate=cost,
        input_output_aliases=({0: 0} if donate_x else {}),
    )(x_flat, w_flat, shift)
    return out_flat.reshape(B, C, H, W)


if __name__ == "__main__":
    key = jax.random.PRNGKey(0)
    k_x, k_w = jax.random.split(key)

    B, C, H, W = 2, 4, 16, 16
    x = jax.random.normal(k_x, (B, C, H, W), jnp.float32)

    # Deterministic parameter init (shapes from the module's __init__).
    # Conv2d(2, 1, 7, bias=False): kaiming-uniform-style bound.
    fan_in = 2 * K * K
    bound = 1.0 / (fan_in ** 0.5)
    conv_w = jax.random.uniform(k_w, (1, 2, K, K), jnp.float32, -bound, bound)
    # BatchNorm2d(1) defaults: gamma=1, beta=0, running_mean=0, running_var=1.
    bn_gamma = jnp.ones((1,), jnp.float32)
    bn_beta = jnp.zeros((1,), jnp.float32)
    bn_mean = jnp.zeros((1,), jnp.float32)
    bn_var = jnp.ones((1,), jnp.float32)

    out = spatial_filter(x, conv_w, bn_gamma, bn_beta, bn_mean, bn_var)
    out = jax.block_until_ready(out)

    # Pure-JAX reference check of the forward semantics.
    feat = jnp.concatenate(
        [jnp.max(x, axis=1, keepdims=True), jnp.mean(x, axis=1, keepdims=True)],
        axis=1)
    conv = lax.conv_general_dilated(
        feat, conv_w, window_strides=(1, 1),
        padding=[(PAD, PAD), (PAD, PAD)],
        dimension_numbers=("NCHW", "OIHW", "NCHW"))
    scale = bn_gamma / jnp.sqrt(bn_var + 1e-5)
    shift = bn_beta - bn_mean * scale
    bn_out = conv * scale[None, :, None, None] + shift[None, :, None, None]
    ref = jax.nn.sigmoid(jnp.maximum(bn_out, 0.0)) * x

    assert jnp.allclose(out, ref, atol=1e-5, rtol=1e-5), "mismatch vs reference"
    print("KERNEL_OK")
</pallas_src>

<mosaic_0001>
module attributes {stable_mosaic.version = 11 : i64} {
  func.func @spatial_filter_kernel(%arg0: i32, %arg1: memref<1x4x256xf32, #tpu.memory_space<vmem>>, %arg2: memref<98xf32, #tpu.memory_space<smem>>, %arg3: memref<1xf32, #tpu.memory_space<smem>>, %arg4: memref<1x4x256xf32, #tpu.memory_space<vmem>>, %arg5: memref<2x22x22xf32, #tpu.memory_space<vmem>>, %arg6: memref<1x256xf32, #tpu.memory_space<vmem>>) attributes {dimension_semantics = [#tpu.dimension_semantics<parallel>], iteration_bounds = array<i64: 2>, scalar_prefetch = 0 : i64, scratch_operands = 2 : i64, tpu.core_type = #tpu.core_type<tc>, window_params = [{transform_indices = @transform_0, window_bounds = array<i64: 1, 4, 256>}, {transform_indices = @transform_1, window_bounds = array<i64: 98>}, {transform_indices = @transform_2, window_bounds = array<i64: 1>}, {transform_indices = @transform_3, window_bounds = array<i64: 1, 4, 256>}]} {
    %c0 = arith.constant 0 : index
    %c0_0 = arith.constant 0 : index
    %c0_1 = arith.constant 0 : index
    %0 = vector.load %arg1[%c0, %c0_0, %c0_1] : memref<1x4x256xf32, #tpu.memory_space<vmem>>, vector<1x4x256xf32>
    %1 = vector.shape_cast %0 : vector<1x4x256xf32> to vector<4x256xf32>
    %cst = arith.constant dense<0xFF800000> : vector<256xf32>
    %2 = vector.multi_reduction <maximumf>, %1, %cst [0] : vector<4x256xf32> to vector<256xf32>
    %3 = vector.shape_cast %2 : vector<256xf32> to vector<1x256xf32>
    %cst_2 = arith.constant 0.000000e+00 : f32
    %4 = vector.broadcast %cst_2 : f32 to vector<1x256xf32>
    %cst_3 = arith.constant dense<0.000000e+00> : vector<256xf32>
    %5 = vector.multi_reduction <add>, %1, %cst_3 [0] : vector<4x256xf32> to vector<256xf32>
    %6 = vector.shape_cast %5 : vector<256xf32> to vector<1x256xf32>
    %7 = arith.addf %4, %6 : vector<1x256xf32>
    %cst_4 = arith.constant 2.500000e-01 : f32
    %8 = vector.broadcast %cst_4 : f32 to vector<1x256xf32>
    %9 = arith.mulf %7, %8 : vector<1x256xf32>
    %cst_5 = arith.constant 0.000000e+00 : f32
    %10 = vector.broadcast %cst_5 : f32 to vector<2x22x22xf32>
    %c0_6 = arith.constant 0 : index
    %c0_7 = arith.constant 0 : index
    %c0_8 = arith.constant 0 : index
    %11 = vector.load %arg5[%c0_6, %c0_7, %c0_8] : memref<2x22x22xf32, #tpu.memory_space<vmem>>, vector<2x22x22xf32>
    tpu.vector_store %arg5[%c0_6, %c0_7, %c0_8], %10 {strides = array<i32>} : memref<2x22x22xf32, #tpu.memory_space<vmem>>, vector<2x22x22xf32>,
    %12 = vector.extract_strided_slice %3 {offsets = [0, 0], sizes = [1, 16], strides = [1, 1]} : vector<1x256xf32> to vector<1x16xf32>
    %c0_9 = arith.constant 0 : index
    %c3 = arith.constant 3 : index
    %c3_10 = arith.constant 3 : index
    %13 = vector.load %arg5[%c0_9, %c3, %c3_10] : memref<2x22x22xf32, #tpu.memory_space<vmem>>, vector<1x1x16xf32>
    %14 = vector.shape_cast %13 : vector<1x1x16xf32> to vector<1x16xf32>
    %15 = vector.shape_cast %12 : vector<1x16xf32> to vector<1x1x16xf32>
    tpu.vector_store %arg5[%c0_9, %c3, %c3_10], %15 {strides = array<i32>} : memref<2x22x22xf32, #tpu.memory_space<vmem>>, vector<1x1x16xf32>,
    %16 = vector.extract_strided_slice %9 {offsets = [0, 0], sizes = [1, 16], strides = [1, 1]} : vector<1x256xf32> to vector<1x16xf32>
    %c1 = arith.constant 1 : index
    %c3_11 = arith.constant 3 : index
    %c3_12 = arith.constant 3 : index
    %17 = vector.load %arg5[%c1, %c3_11, %c3_12] : memref<2x22x22xf32, #tpu.memory_space<vmem>>, vector<1x1x16xf32>
    %18 = vector.shape_cast %17 : vector<1x1x16xf32> to vector<1x16xf32>
    %19 = vector.shape_cast %16 : vector<1x16xf32> to vector<1x1x16xf32>
    tpu.vector_store %arg5[%c1, %c3_11, %c3_12], %19 {strides = array<i32>} : memref<2x22x22xf32, #tpu.memory_space<vmem>>, vector<1x1x16xf32>,
    %20 = vector.extract_strided_slice %3 {offsets = [0, 16], sizes = [1, 16], strides = [1, 1]} : vector<1x256xf32> to vector<1x16xf32>
    %c0_13 = arith.constant 0 : index
    %c4 = arith.constant 4 : index
    %c3_14 = arith.constant 3 : index
    %21 = vector.load %arg5[%c0_13, %c4, %c3_14] : memref<2x22x22xf32, #tpu.memory_space<vmem>>, vector<1x1x16xf32>
    %22 = vector.shape_cast %21 : vector<1x1x16xf32> to vector<1x16xf32>
    %23 = vector.shape_cast %20 : vector<1x16xf32> to vector<1x1x16xf32>
    tpu.vector_store %arg5[%c0_13, %c4, %c3_14], %23 {strides = array<i32>} : memref<2x22x22xf32, #tpu.memory_space<vmem>>, vector<1x1x16xf32>,
    %24 = vector.extract_strided_slice %9 {offsets = [0, 16], sizes = [1, 16], strides = [1, 1]} : vector<1x256xf32> to vector<1x16xf32>
    %c1_15 = arith.constant 1 : index
    %c4_16 = arith.constant 4 : index
    %c3_17 = arith.constant 3 : index
    %25 = vector.load %arg5[%c1_15, %c4_16, %c3_17] : memref<2x22x22xf32, #tpu.memory_space<vmem>>, vector<1x1x16xf32>
    %26 = vector.shape_cast %25 : vector<1x1x16xf32> to vector<1x16xf32>
    %27 = vector.shape_cast %24 : vector<1x16xf32> to vector<1x1x16xf32>
    tpu.vector_store %arg5[%c1_15, %c4_16, %c3_17], %27 {strides = array<i32>} : memref<2x22x22xf32, #tpu.memory_space<vmem>>, vector<1x1x16xf32>,
    %28 = vector.extract_strided_slice %3 {offsets = [0, 32], sizes = [1, 16], strides = [1, 1]} : vector<1x256xf32> to vector<1x16xf32>
    %c0_18 = arith.constant 0 : index
    %c5 = arith.constant 5 : index
    %c3_19 = arith.constant 3 : index
    %29 = vector.load %arg5[%c0_18, %c5, %c3_19] : memref<2x22x22xf32, #tpu.memory_space<vmem>>, vector<1x1x16xf32>
    %30 = vector.shape_cast %29 : vector<1x1x16xf32> to vector<1x16xf32>
    %31 = vector.shape_cast %28 : vector<1x16xf32> to vector<1x1x16xf32>
    tpu.vector_store %arg5[%c0_18, %c5, %c3_19], %31 {strides = array<i32>} : memref<2x22x22xf32, #tpu.memory_space<vmem>>, vector<1x1x16xf32>,
    %32 = vector.extract_strided_slice %9 {offsets = [0, 32], sizes = [1, 16], strides = [1, 1]} : vector<1x256xf32> to vector<1x16xf32>
    %c1_20 = arith.constant 1 : index
    %c5_21 = arith.constant 5 : index
    %c3_22 = arith.constant 3 : index
    %33 = vector.load %arg5[%c1_20, %c5_21, %c3_22] : memref<2x22x22xf32, #tpu.memory_space<vmem>>, vector<1x1x16xf32>
    %34 = vector.shape_cast %33 : vector<1x1x16xf32> to vector<1x16xf32>
    %35 = vector.shape_cast %32 : vector<1x16xf32> to vector<1x1x16xf32>
    tpu.vector_store %arg5[%c1_20, %c5_21, %c3_22], %35 {strides = array<i32>} : memref<2x22x22xf32, #tpu.memory_space<vmem>>, vector<1x1x16xf32>,
    %36 = vector.extract_strided_slice %3 {offsets = [0, 48], sizes = [1, 16], strides = [1, 1]} : vector<1x256xf32> to vector<1x16xf32>
    %c0_23 = arith.constant 0 : index
    %c6 = arith.constant 6 : index
    %c3_24 = arith.constant 3 : index
    %37 = vector.load %arg5[%c0_23, %c6, %c3_24] : memref<2x22x22xf32, #tpu.memory_space<vmem>>, vector<1x1x16xf32>
    %38 = vector.shape_cast %37 : vector<1x1x16xf32> to vector<1x16xf32>
    %39 = vector.shape_cast %36 : vector<1x16xf32> to vector<1x1x16xf32>
    tpu.vector_store %arg5[%c0_23, %c6, %c3_24], %39 {strides = array<i32>} : memref<2x22x22xf32, #tpu.memory_space<vmem>>, vector<1x1x16xf32>,
    %40 = vector.extract_strided_slice %9 {offsets = [0, 48], sizes = [1, 16], strides = [1, 1]} : vector<1x256xf32> to vector<1x16xf32>
    %c1_25 = arith.constant 1 : index
    %c6_26 = arith.constant 6 : index
    %c3_27 = arith.constant 3 : index
    %41 = vector.load %arg5[%c1_25, %c6_26, %c3_27] : memref<2x22x22xf32, #tpu.memory_space<vmem>>, vector<1x1x16xf32>
    %42 = vector.shape_cast %41 : vector<1x1x16xf32> to vector<1x16xf32>
    %43 = vector.shape_cast %40 : vector<1x16xf32> to vector<1x1x16xf32>
    tpu.vector_store %arg5[%c1_25, %c6_26, %c3_27], %43 {strides = array<i32>} : memref<2x22x22xf32, #tpu.memory_space<vmem>>, vector<1x1x16xf32>,
    %44 = vector.extract_strided_slice %3 {offsets = [0, 64], sizes = [1, 16], strides = [1, 1]} : vector<1x256xf32> to vector<1x16xf32>
    %c0_28 = arith.constant 0 : index
    %c7 = arith.constant 7 : index
    %c3_29 = arith.constant 3 : index
    %45 = vector.load %arg5[%c0_28, %c7, %c3_29] : memref<2x22x22xf32, #tpu.memory_space<vmem>>, vector<1x1x16xf32>
    %46 = vector.shape_cast %45 : vector<1x1x16xf32> to vector<1x16xf32>
    %47 = vector.shape_cast %44 : vector<1x16xf32> to vector<1x1x16xf32>
    tpu.vector_store %arg5[%c0_28, %c7, %c3_29], %47 {strides = array<i32>} : memref<2x22x22xf32, #tpu.memory_space<vmem>>, vector<1x1x16xf32>,
    %48 = vector.extract_strided_slice %9 {offsets = [0, 64], sizes = [1, 16], strides = [1, 1]} : vector<1x256xf32> to vector<1x16xf32>
    %c1_30 = arith.constant 1 : index
    %c7_31 = arith.constant 7 : index
    %c3_32 = arith.constant 3 : index
    %49 = vector.load %arg5[%c1_30, %c7_31, %c3_32] : memref<2x22x22xf32, #tpu.memory_space<vmem>>, vector<1x1x16xf32>
    %50 = vector.shape_cast %49 : vector<1x1x16xf32> to vector<1x16xf32>
    %51 = vector.shape_cast %48 : vector<1x16xf32> to vector<1x1x16xf32>
    tpu.vector_store %arg5[%c1_30, %c7_31, %c3_32], %51 {strides = array<i32>} : memref<2x22x22xf32, #tpu.memory_space<vmem>>, vector<1x1x16xf32>,
    %52 = vector.extract_strided_slice %3 {offsets = [0, 80], sizes = [1, 16], strides = [1, 1]} : vector<1x256xf32> to vector<1x16xf32>
    %c0_33 = arith.constant 0 : index
    %c8 = arith.constant 8 : index
    %c3_34 = arith.constant 3 : index
    %53 = vector.load %arg5[%c0_33, %c8, %c3_34] : memref<2x22x22xf32, #tpu.memory_space<vmem>>, vector<1x1x16xf32>
    %54 = vector.shape_cast %53 : vector<1x1x16xf32> to vector<1x16xf32>
    %55 = vector.shape_cast %52 : vector<1x16xf32> to vector<1x1x16xf32>
    tpu.vector_store %arg5[%c0_33, %c8, %c3_34], %55 {strides = array<i32>} : memref<2x22x22xf32, #tpu.memory_space<vmem>>, vector<1x1x16xf32>,
    %56 = vector.extract_strided_slice %9 {offsets = [0, 80], sizes = [1, 16], strides = [1, 1]} : vector<1x256xf32> to vector<1x16xf32>
    %c1_35 = arith.constant 1 : index
    %c8_36 = arith.constant 8 : index
    %c3_37 = arith.constant 3 : index
    %57 = vector.load %arg5[%c1_35, %c8_36, %c3_37] : memref<2x22x22xf32, #tpu.memory_space<vmem>>, vector<1x1x16xf32>
    %58 = vector.shape_cast %57 : vector<1x1x16xf32> to vector<1x16xf32>
    %59 = vector.shape_cast %56 : vector<1x16xf32> to vector<1x1x16xf32>
    tpu.vector_store %arg5[%c1_35, %c8_36, %c3_37], %59 {strides = array<i32>} : memref<2x22x22xf32, #tpu.memory_space<vmem>>, vector<1x1x16xf32>,
    %60 = vector.extract_strided_slice %3 {offsets = [0, 96], sizes = [1, 16], strides = [1, 1]} : vector<1x256xf32> to vector<1x16xf32>
    %c0_38 = arith.constant 0 : index
    %c9 = arith.constant 9 : index
    %c3_39 = arith.constant 3 : index
    %61 = vector.load %arg5[%c0_38, %c9, %c3_39] : memref<2x22x22xf32, #tpu.memory_space<vmem>>, vector<1x1x16xf32>
    %62 = vector.shape_cast %61 : vector<1x1x16xf32> to vector<1x16xf32>
    %63 = vector.shape_cast %60 : vector<1x16xf32> to vector<1x1x16xf32>
    tpu.vector_store %arg5[%c0_38, %c9, %c3_39], %63 {strides = array<i32>} : memref<2x22x22xf32, #tpu.memory_space<vmem>>, vector<1x1x16xf32>,
    %64 = vector.extract_strided_slice %9 {offsets = [0, 96], sizes = [1, 16], strides = [1, 1]} : vector<1x256xf32> to vector<1x16xf32>
    %c1_40 = arith.constant 1 : index
    %c9_41 = arith.constant 9 : index
    %c3_42 = arith.constant 3 : index
    %65 = vector.load %arg5[%c1_40, %c9_41, %c3_42] : memref<2x22x22xf32, #tpu.memory_space<vmem>>, vector<1x1x16xf32>
    %66 = vector.shape_cast %65 : vector<1x1x16xf32> to vector<1x16xf32>
    %67 = vector.shape_cast %64 : vector<1x16xf32> to vector<1x1x16xf32>
    tpu.vector_store %arg5[%c1_40, %c9_41, %c3_42], %67 {strides = array<i32>} : memref<2x22x22xf32, #tpu.memory_space<vmem>>, vector<1x1x16xf32>,
    %68 = vector.extract_strided_slice %3 {offsets = [0, 112], sizes = [1, 16], strides = [1, 1]} : vector<1x256xf32> to vector<1x16xf32>
    %c0_43 = arith.constant 0 : index
    %c10 = arith.constant 10 : index
    %c3_44 = arith.constant 3 : index
    %69 = vector.load %arg5[%c0_43, %c10, %c3_44] : memref<2x22x22xf32, #tpu.memory_space<vmem>>, vector<1x1x16xf32>
    %70 = vector.shape_cast %69 : vector<1x1x16xf32> to vector<1x16xf32>
    %71 = vector.shape_cast %68 : vector<1x16xf32> to vector<1x1x16xf32>
    tpu.vector_store %arg5[%c0_43, %c10, %c3_44], %71 {strides = array<i32>} : memref<2x22x22xf32, #tpu.memory_space<vmem>>, vector<1x1x16xf32>,
    %72 = vector.extract_strided_slice %9 {offsets = [0, 112], sizes = [1, 16], strides = [1, 1]} : vector<1x256xf32> to vector<1x16xf32>
    %c1_45 = arith.constant 1 : index
    %c10_46 = arith.constant 10 : index
    %c3_47 = arith.constant 3 : index
    %73 = vector.load %arg5[%c1_45, %c10_46, %c3_47] : memref<2x22x22xf32, #tpu.memory_space<vmem>>, vector<1x1x16xf32>
    %74 = vector.shape_cast %73 : vector<1x1x16xf32> to vector<1x16xf32>
    %75 = vector.shape_cast %72 : vector<1x16xf32> to vector<1x1x16xf32>
    tpu.vector_store %arg5[%c1_45, %c10_46, %c3_47], %75 {strides = array<i32>} : memref<2x22x22xf32, #tpu.memory_space<vmem>>, vector<1x1x16xf32>,
    %76 = vector.extract_strided_slice %3 {offsets = [0, 128], sizes = [1, 16], strides = [1, 1]} : vector<1x256xf32> to vector<1x16xf32>
    %c0_48 = arith.constant 0 : index
    %c11 = arith.constant 11 : index
    %c3_49 = arith.constant 3 : index
    %77 = vector.load %arg5[%c0_48, %c11, %c3_49] : memref<2x22x22xf32, #tpu.memory_space<vmem>>, vector<1x1x16xf32>
    %78 = vector.shape_cast %77 : vector<1x1x16xf32> to vector<1x16xf32>
    %79 = vector.shape_cast %76 : vector<1x16xf32> to vector<1x1x16xf32>
    tpu.vector_store %arg5[%c0_48, %c11, %c3_49], %79 {strides = array<i32>} : memref<2x22x22xf32, #tpu.memory_space<vmem>>, vector<1x1x16xf32>,
    %80 = vector.extract_strided_slice %9 {offsets = [0, 128], sizes = [1, 16], strides = [1, 1]} : vector<1x256xf32> to vector<1x16xf32>
    %c1_50 = arith.constant 1 : index
    %c11_51 = arith.constant 11 : index
    %c3_52 = arith.constant 3 : index
    %81 = vector.load %arg5[%c1_50, %c11_51, %c3_52] : memref<2x22x22xf32, #tpu.memory_space<vmem>>, vector<1x1x16xf32>
    %82 = vector.shape_cast %81 : vector<1x1x16xf32> to vector<1x16xf32>
    %83 = vector.shape_cast %80 : vector<1x16xf32> to vector<1x1x16xf32>
    tpu.vector_store %arg5[%c1_50, %c11_51, %c3_52], %83 {strides = array<i32>} : memref<2x22x22xf32, #tpu.memory_space<vmem>>, vector<1x1x16xf32>,
    %84 = vector.extract_strided_slice %3 {offsets = [0, 144], sizes = [1, 16], strides = [1, 1]} : vector<1x256xf32> to vector<1x16xf32>
    %c0_53 = arith.constant 0 : index
    %c12 = arith.constant 12 : index
    %c3_54 = arith.constant 3 : index
    %85 = vector.load %arg5[%c0_53, %c12, %c3_54] : memref<2x22x22xf32, #tpu.memory_space<vmem>>, vector<1x1x16xf32>
    %86 = vector.shape_cast %85 : vector<1x1x16xf32> to vector<1x16xf32>
    %87 = vector.shape_cast %84 : vector<1x16xf32> to vector<1x1x16xf32>
    tpu.vector_store %arg5[%c0_53, %c12, %c3_54], %87 {strides = array<i32>} : memref<2x22x22xf32, #tpu.memory_space<vmem>>, vector<1x1x16xf32>,
    %88 = vector.extract_strided_slice %9 {offsets = [0, 144], sizes = [1, 16], strides = [1, 1]} : vector<1x256xf32> to vector<1x16xf32>
    %c1_55 = arith.constant 1 : index
    %c12_56 = arith.constant 12 : index
    %c3_57 = arith.constant 3 : index
    %89 = vector.load %arg5[%c1_55, %c12_56, %c3_57] : memref<2x22x22xf32, #tpu.memory_space<vmem>>, vector<1x1x16xf32>
    %90 = vector.shape_cast %89 : vector<1x1x16xf32> to vector<1x16xf32>
    %91 = vector.shape_cast %88 : vector<1x16xf32> to vector<1x1x16xf32>
    tpu.vector_store %arg5[%c1_55, %c12_56, %c3_57], %91 {strides = array<i32>} : memref<2x22x22xf32, #tpu.memory_space<vmem>>, vector<1x1x16xf32>,
    %92 = vector.extract_strided_slice %3 {offsets = [0, 160], sizes = [1, 16], strides = [1, 1]} : vector<1x256xf32> to vector<1x16xf32>
    %c0_58 = arith.constant 0 : index
    %c13 = arith.constant 13 : index
    %c3_59 = arith.constant 3 : index
    %93 = vector.load %arg5[%c0_58, %c13, %c3_59] : memref<2x22x22xf32, #tpu.memory_space<vmem>>, vector<1x1x16xf32>
    %94 = vector.shape_cast %93 : vector<1x1x16xf32> to vector<1x16xf32>
    %95 = vector.shape_cast %92 : vector<1x16xf32> to vector<1x1x16xf32>
    tpu.vector_store %arg5[%c0_58, %c13, %c3_59], %95 {strides = array<i32>} : memref<2x22x22xf32, #tpu.memory_space<vmem>>, vector<1x1x16xf32>,
    %96 = vector.extract_strided_slice %9 {offsets = [0, 160], sizes = [1, 16], strides = [1, 1]} : vector<1x256xf32> to vector<1x16xf32>
    %c1_60 = arith.constant 1 : index
    %c13_61 = arith.constant 13 : index
    %c3_62 = arith.constant 3 : index
    %97 = vector.load %arg5[%c1_60, %c13_61, %c3_62] : memref<2x22x22xf32, #tpu.memory_space<vmem>>, vector<1x1x16xf32>
    %98 = vector.shape_cast %97 : vector<1x1x16xf32> to vector<1x16xf32>
    %99 = vector.shape_cast %96 : vector<1x16xf32> to vector<1x1x16xf32>
    tpu.vector_store %arg5[%c1_60, %c13_61, %c3_62], %99 {strides = array<i32>} : memref<2x22x22xf32, #tpu.memory_space<vmem>>, vector<1x1x16xf32>,
    %100 = vector.extract_strided_slice %3 {offsets = [0, 176], sizes = [1, 16], strides = [1, 1]} : vector<1x256xf32> to vector<1x16xf32>
    %c0_63 = arith.constant 0 : index
    %c14 = arith.constant 14 : index
    %c3_64 = arith.constant 3 : index
    %101 = vector.load %arg5[%c0_63, %c14, %c3_64] : memref<2x22x22xf32, #tpu.memory_space<vmem>>, vector<1x1x16xf32>
    %102 = vector.shape_cast %101 : vector<1x1x16xf32> to vector<1x16xf32>
    %103 = vector.shape_cast %100 : vector<1x16xf32> to vector<1x1x16xf32>
    tpu.vector_store %arg5[%c0_63, %c14, %c3_64], %103 {strides = array<i32>} : memref<2x22x22xf32, #tpu.memory_space<vmem>>, vector<1x1x16xf32>,
    %104 = vector.extract_strided_slice %9 {offsets = [0, 176], sizes = [1, 16], strides = [1, 1]} : vector<1x256xf32> to vector<1x16xf32>
    %c1_65 = arith.constant 1 : index
    %c14_66 = arith.constant 14 : index
    %c3_67 = arith.constant 3 : index
    %105 = vector.load %arg5[%c1_65, %c14_66, %c3_67] : memref<2x22x22xf32, #tpu.memory_space<vmem>>, vector<1x1x16xf32>
    %106 = vector.shape_cast %105 : vector<1x1x16xf32> to vector<1x16xf32>
    %107 = vector.shape_cast %104 : vector<1x16xf32> to vector<1x1x16xf32>
    tpu.vector_store %arg5[%c1_65, %c14_66, %c3_67], %107 {strides = array<i32>} : memref<2x22x22xf32, #tpu.memory_space<vmem>>, vector<1x1x16xf32>,
    %108 = vector.extract_strided_slice %3 {offsets = [0, 192], sizes = [1, 16], strides = [1, 1]} : vector<1x256xf32> to vector<1x16xf32>
    %c0_68 = arith.constant 0 : index
    %c15 = arith.constant 15 : index
    %c3_69 = arith.constant 3 : index
    %109 = vector.load %arg5[%c0_68, %c15, %c3_69] : memref<2x22x22xf32, #tpu.memory_space<vmem>>, vector<1x1x16xf32>
    %110 = vector.shape_cast %109 : vector<1x1x16xf32> to vector<1x16xf32>
    %111 = vector.shape_cast %108 : vector<1x16xf32> to vector<1x1x16xf32>
    tpu.vector_store %arg5[%c0_68, %c15, %c3_69], %111 {strides = array<i32>} : memref<2x22x22xf32, #tpu.memory_space<vmem>>, vector<1x1x16xf32>,
    %112 = vector.extract_strided_slice %9 {offsets = [0, 192], sizes = [1, 16], strides = [1, 1]} : vector<1x256xf32> to vector<1x16xf32>
    %c1_70 = arith.constant 1 : index
    %c15_71 = arith.constant 15 : index
    %c3_72 = arith.constant 3 : index
    %113 = vector.load %arg5[%c1_70, %c15_71, %c3_72] : memref<2x22x22xf32, #tpu.memory_space<vmem>>, vector<1x1x16xf32>
    %114 = vector.shape_cast %113 : vector<1x1x16xf32> to vector<1x16xf32>
    %115 = vector.shape_cast %112 : vector<1x16xf32> to vector<1x1x16xf32>
    tpu.vector_store %arg5[%c1_70, %c15_71, %c3_72], %115 {strides = array<i32>} : memref<2x22x22xf32, #tpu.memory_space<vmem>>, vector<1x1x16xf32>,
    %116 = vector.extract_strided_slice %3 {offsets = [0, 208], sizes = [1, 16], strides = [1, 1]} : vector<1x256xf32> to vector<1x16xf32>
    %c0_73 = arith.constant 0 : index
    %c16 = arith.constant 16 : index
    %c3_74 = arith.constant 3 : index
    %117 = vector.load %arg5[%c0_73, %c16, %c3_74] : memref<2x22x22xf32, #tpu.memory_space<vmem>>, vector<1x1x16xf32>
    %118 = vector.shape_cast %117 : vector<1x1x16xf32> to vector<1x16xf32>
    %119 = vector.shape_cast %116 : vector<1x16xf32> to vector<1x1x16xf32>
    tpu.vector_store %arg5[%c0_73, %c16, %c3_74], %119 {strides = array<i32>} : memref<2x22x22xf32, #tpu.memory_space<vmem>>, vector<1x1x16xf32>,
    %120 = vector.extract_strided_slice %9 {offsets = [0, 208], sizes = [1, 16], strides = [1, 1]} : vector<1x256xf32> to vector<1x16xf32>
    %c1_75 = arith.constant 1 : index
    %c16_76 = arith.constant 16 : index
    %c3_77 = arith.constant 3 : index
    %121 = vector.load %arg5[%c1_75, %c16_76, %c3_77] : memref<2x22x22xf32, #tpu.memory_space<vmem>>, vector<1x1x16xf32>
    %122 = vector.shape_cast %121 : vector<1x1x16xf32> to vector<1x16xf32>
    %123 = vector.shape_cast %120 : vector<1x16xf32> to vector<1x1x16xf32>
    tpu.vector_store %arg5[%c1_75, %c16_76, %c3_77], %123 {strides = array<i32>} : memref<2x22x22xf32, #tpu.memory_space<vmem>>, vector<1x1x16xf32>,
    %124 = vector.extract_strided_slice %3 {offsets = [0, 224], sizes = [1, 16], strides = [1, 1]} : vector<1x256xf32> to vector<1x16xf32>
    %c0_78 = arith.constant 0 : index
    %c17 = arith.constant 17 : index
    %c3_79 = arith.constant 3 : index
    %125 = vector.load %arg5[%c0_78, %c17, %c3_79] : memref<2x22x22xf32, #tpu.memory_space<vmem>>, vector<1x1x16xf32>
    %126 = vector.shape_cast %125 : vector<1x1x16xf32> to vector<1x16xf32>
    %127 = vector.shape_cast %124 : vector<1x16xf32> to vector<1x1x16xf32>
    tpu.vector_store %arg5[%c0_78, %c17, %c3_79], %127 {strides = array<i32>} : memref<2x22x22xf32, #tpu.memory_space<vmem>>, vector<1x1x16xf32>,
    %128 = vector.extract_strided_slice %9 {offsets = [0, 224], sizes = [1, 16], strides = [1, 1]} : vector<1x256xf32> to vector<1x16xf32>
    %c1_80 = arith.constant 1 : index
    %c17_81 = arith.constant 17 : index
    %c3_82 = arith.constant 3 : index
    %129 = vector.load %arg5[%c1_80, %c17_81, %c3_82] : memref<2x22x22xf32, #tpu.memory_space<vmem>>, vector<1x1x16xf32>
    %130 = vector.shape_cast %129 : vector<1x1x16xf32> to vector<1x16xf32>
    %131 = vector.shape_cast %128 : vector<1x16xf32> to vector<1x1x16xf32>
    tpu.vector_store %arg5[%c1_80, %c17_81, %c3_82], %131 {strides = array<i32>} : memref<2x22x22xf32, #tpu.memory_space<vmem>>, vector<1x1x16xf32>,
    %132 = vector.extract_strided_slice %3 {offsets = [0, 240], sizes = [1, 16], strides = [1, 1]} : vector<1x256xf32> to vector<1x16xf32>
    %c0_83 = arith.constant 0 : index
    %c18 = arith.constant 18 : index
    %c3_84 = arith.constant 3 : index
    %133 = vector.load %arg5[%c0_83, %c18, %c3_84] : memref<2x22x22xf32, #tpu.memory_space<vmem>>, vector<1x1x16xf32>
    %134 = vector.shape_cast %133 : vector<1x1x16xf32> to vector<1x16xf32>
    %135 = vector.shape_cast %132 : vector<1x16xf32> to vector<1x1x16xf32>
    tpu.vector_store %arg5[%c0_83, %c18, %c3_84], %135 {strides = array<i32>} : memref<2x22x22xf32, #tpu.memory_space<vmem>>, vector<1x1x16xf32>,
    %136 = vector.extract_strided_slice %9 {offsets = [0, 240], sizes = [1, 16], strides = [1, 1]} : vector<1x256xf32> to vector<1x16xf32>
    %c1_85 = arith.constant 1 : index
    %c18_86 = arith.constant 18 : index
    %c3_87 = arith.constant 3 : index
    %137 = vector.load %arg5[%c1_85, %c18_86, %c3_87] : memref<2x22x22xf32, #tpu.memory_space<vmem>>, vector<1x1x16xf32>
    %138 = vector.shape_cast %137 : vector<1x1x16xf32> to vector<1x16xf32>
    %139 = vector.shape_cast %136 : vector<1x16xf32> to vector<1x1x16xf32>
    tpu.vector_store %arg5[%c1_85, %c18_86, %c3_87], %139 {strides = array<i32>} : memref<2x22x22xf32, #tpu.memory_space<vmem>>, vector<1x1x16xf32>,
    %cst_88 = arith.constant 0.000000e+00 : f32
    %140 = vector.broadcast %cst_88 : f32 to vector<16x16xf32>
    %cst_89 = arith.constant 0.000000e+00 : f32
    %141 = vector.broadcast %cst_89 : f32 to vector<16x16xf32>
    %cst_90 = arith.constant 0.000000e+00 : f32
    %142 = vector.broadcast %cst_90 : f32 to vector<16x16xf32>
    %cst_91 = arith.constant 0.000000e+00 : f32
    %143 = vector.broadcast %cst_91 : f32 to vector<16x16xf32>
    %c0_92 = arith.constant 0 : index
    %c0_93 = arith.constant 0 : index
    %c0_94 = arith.constant 0 : index
    %144 = vector.load %arg5[%c0_92, %c0_93, %c0_94] : memref<2x22x22xf32, #tpu.memory_space<vmem>>, vector<1x22x22xf32>
    %145 = vector.shape_cast %144 : vector<1x22x22xf32> to vector<22x22xf32>
    %146 = vector.extract_strided_slice %145 {offsets = [0, 0], sizes = [22, 16], strides = [1, 1]} : vector<22x22xf32> to vector<22x16xf32>
    %c0_95 = arith.constant 0 : index
    %147 = memref.load %arg2[%c0_95] : memref<98xf32, #tpu.memory_space<smem>>
    %148 = vector.extract_strided_slice %146 {offsets = [0, 0], sizes = [16, 16], strides = [1, 1]} : vector<22x16xf32> to vector<16x16xf32>
    %149 = vector.broadcast %147 : f32 to vector<16x16xf32>
    %150 = arith.mulf %149, %148 : vector<16x16xf32>
    %151 = arith.addf %140, %150 : vector<16x16xf32>
    %c7_96 = arith.constant 7 : index
    %152 = memref.load %arg2[%c7_96] : memref<98xf32, #tpu.memory_space<smem>>
    %153 = vector.extract_strided_slice %146 {offsets = [1, 0], sizes = [16, 16], strides = [1, 1]} : vector<22x16xf32> to vector<16x16xf32>
    %154 = vector.broadcast %152 : f32 to vector<16x16xf32>
    %155 = arith.mulf %154, %153 : vector<16x16xf32>
    %156 = arith.addf %141, %155 : vector<16x16xf32>
    %c14_97 = arith.constant 14 : index
    %157 = memref.load %arg2[%c14_97] : memref<98xf32, #tpu.memory_space<smem>>
    %158 = vector.extract_strided_slice %146 {offsets = [2, 0], sizes = [16, 16], strides = [1, 1]} : vector<22x16xf32> to vector<16x16xf32>
    %159 = vector.broadcast %157 : f32 to vector<16x16xf32>
    %160 = arith.mulf %159, %158 : vector<16x16xf32>
    %161 = arith.addf %142, %160 : vector<16x16xf32>
    %c21 = arith.constant 21 : index
    %162 = memref.load %arg2[%c21] : memref<98xf32, #tpu.memory_space<smem>>
    %163 = vector.extract_strided_slice %146 {offsets = [3, 0], sizes = [16, 16], strides = [1, 1]} : vector<22x16xf32> to vector<16x16xf32>
    %164 = vector.broadcast %162 : f32 to vector<16x16xf32>
    %165 = arith.mulf %164, %163 : vector<16x16xf32>
    %166 = arith.addf %143, %165 : vector<16x16xf32>
    %c28 = arith.constant 28 : index
    %167 = memref.load %arg2[%c28] : memref<98xf32, #tpu.memory_space<smem>>
    %168 = vector.extract_strided_slice %146 {offsets = [4, 0], sizes = [16, 16], strides = [1, 1]} : vector<22x16xf32> to vector<16x16xf32>
    %169 = vector.broadcast %167 : f32 to vector<16x16xf32>
    %170 = arith.mulf %169, %168 : vector<16x16xf32>
    %171 = arith.addf %151, %170 : vector<16x16xf32>
    %c35 = arith.constant 35 : index
    %172 = memref.load %arg2[%c35] : memref<98xf32, #tpu.memory_space<smem>>
    %173 = vector.extract_strided_slice %146 {offsets = [5, 0], sizes = [16, 16], strides = [1, 1]} : vector<22x16xf32> to vector<16x16xf32>
    %174 = vector.broadcast %172 : f32 to vector<16x16xf32>
    %175 = arith.mulf %174, %173 : vector<16x16xf32>
    %176 = arith.addf %156, %175 : vector<16x16xf32>
    %c42 = arith.constant 42 : index
    %177 = memref.load %arg2[%c42] : memref<98xf32, #tpu.memory_space<smem>>
    %178 = vector.extract_strided_slice %146 {offsets = [6, 0], sizes = [16, 16], strides = [1, 1]} : vector<22x16xf32> to vector<16x16xf32>
    %179 = vector.broadcast %177 : f32 to vector<16x16xf32>
    %180 = arith.mulf %179, %178 : vector<16x16xf32>
    %181 = arith.addf %161, %180 : vector<16x16xf32>
    %182 = vector.extract_strided_slice %145 {offsets = [0, 1], sizes = [22, 16], strides = [1, 1]} : vector<22x22xf32> to vector<22x16xf32>
    %c1_98 = arith.constant 1 : index
    %183 = memref.load %arg2[%c1_98] : memref<98xf32, #tpu.memory_space<smem>>
    %184 = vector.extract_strided_slice %182 {offsets = [0, 0], sizes = [16, 16], strides = [1, 1]} : vector<22x16xf32> to vector<16x16xf32>
    %185 = vector.broadcast %183 : f32 to vector<16x16xf32>
    %186 = arith.mulf %185, %184 : vector<16x16xf32>
    %187 = arith.addf %166, %186 : vector<16x16xf32>
    %c8_99 = arith.constant 8 : index
    %188 = memref.load %arg2[%c8_99] : memref<98xf32, #tpu.memory_space<smem>>
    %189 = vector.extract_strided_slice %182 {offsets = [1, 0], sizes = [16, 16], strides = [1, 1]} : vector<22x16xf32> to vector<16x16xf32>
    %190 = vector.broadcast %188 : f32 to vector<16x16xf32>
    %191 = arith.mulf %190, %189 : vector<16x16xf32>
    %192 = arith.addf %171, %191 : vector<16x16xf32>
    %c15_100 = arith.constant 15 : index
    %193 = memref.load %arg2[%c15_100] : memref<98xf32, #tpu.memory_space<smem>>
    %194 = vector.extract_strided_slice %182 {offsets = [2, 0], sizes = [16, 16], strides = [1, 1]} : vector<22x16xf32> to vector<16x16xf32>
    %195 = vector.broadcast %193 : f32 to vector<16x16xf32>
    %196 = arith.mulf %195, %194 : vector<16x16xf32>
    %197 = arith.addf %176, %196 : vector<16x16xf32>
    %c22 = arith.constant 22 : index
    %198 = memref.load %arg2[%c22] : memref<98xf32, #tpu.memory_space<smem>>
    %199 = vector.extract_strided_slice %182 {offsets = [3, 0], sizes = [16, 16], strides = [1, 1]} : vector<22x16xf32> to vector<16x16xf32>
    %200 = vector.broadcast %198 : f32 to vector<16x16xf32>
    %201 = arith.mulf %200, %199 : vector<16x16xf32>
    %202 = arith.addf %181, %201 : vector<16x16xf32>
    %c29 = arith.constant 29 : index
    %203 = memref.load %arg2[%c29] : memref<98xf32, #tpu.memory_space<smem>>
    %204 = vector.extract_strided_slice %182 {offsets = [4, 0], sizes = [16, 16], strides = [1, 1]} : vector<22x16xf32> to vector<16x16xf32>
    %205 = vector.broadcast %203 : f32 to vector<16x16xf32>
    %206 = arith.mulf %205, %204 : vector<16x16xf32>
    %207 = arith.addf %187, %206 : vector<16x16xf32>
    %c36 = arith.constant 36 : index
    %208 = memref.load %arg2[%c36] : memref<98xf32, #tpu.memory_space<smem>>
    %209 = vector.extract_strided_slice %182 {offsets = [5, 0], sizes = [16, 16], strides = [1, 1]} : vector<22x16xf32> to vector<16x16xf32>
    %210 = vector.broadcast %208 : f32 to vector<16x16xf32>
    %211 = arith.mulf %210, %209 : vector<16x16xf32>
    %212 = arith.addf %192, %211 : vector<16x16xf32>
    %c43 = arith.constant 43 : index
    %213 = memref.load %arg2[%c43] : memref<98xf32, #tpu.memory_space<smem>>
    %214 = vector.extract_strided_slice %182 {offsets = [6, 0], sizes = [16, 16], strides = [1, 1]} : vector<22x16xf32> to vector<16x16xf32>
    %215 = vector.broadcast %213 : f32 to vector<16x16xf32>
    %216 = arith.mulf %215, %214 : vector<16x16xf32>
    %217 = arith.addf %197, %216 : vector<16x16xf32>
    %218 = vector.extract_strided_slice %145 {offsets = [0, 2], sizes = [22, 16], strides = [1, 1]} : vector<22x22xf32> to vector<22x16xf32>
    %c2 = arith.constant 2 : index
    %219 = memref.load %arg2[%c2] : memref<98xf32, #tpu.memory_space<smem>>
    %220 = vector.extract_strided_slice %218 {offsets = [0, 0], sizes = [16, 16], strides = [1, 1]} : vector<22x16xf32> to vector<16x16xf32>
    %221 = vector.broadcast %219 : f32 to vector<16x16xf32>
    %222 = arith.mulf %221, %220 : vector<16x16xf32>
    %223 = arith.addf %202, %222 : vector<16x16xf32>
    %c9_101 = arith.constant 9 : index
    %224 = memref.load %arg2[%c9_101] : memref<98xf32, #tpu.memory_space<smem>>
    %225 = vector.extract_strided_slice %218 {offsets = [1, 0], sizes = [16, 16], strides = [1, 1]} : vector<22x16xf32> to vector<16x16xf32>
    %226 = vector.broadcast %224 : f32 to vector<16x16xf32>
    %227 = arith.mulf %226, %225 : vector<16x16xf32>
    %228 = arith.addf %207, %227 : vector<16x16xf32>
    %c16_102 = arith.constant 16 : index
    %229 = memref.load %arg2[%c16_102] : memref<98xf32, #tpu.memory_space<smem>>
    %230 = vector.extract_strided_slice %218 {offsets = [2, 0], sizes = [16, 16], strides = [1, 1]} : vector<22x16xf32> to vector<16x16xf32>
    %231 = vector.broadcast %229 : f32 to vector<16x16xf32>
    %232 = arith.mulf %231, %230 : vector<16x16xf32>
    %233 = arith.addf %212, %232 : vector<16x16xf32>
    %c23 = arith.constant 23 : index
    %234 = memref.load %arg2[%c23] : memref<98xf32, #tpu.memory_space<smem>>
    %235 = vector.extract_strided_slice %218 {offsets = [3, 0], sizes = [16, 16], strides = [1, 1]} : vector<22x16xf32> to vector<16x16xf32>
    %236 = vector.broadcast %234 : f32 to vector<16x16xf32>
    %237 = arith.mulf %236, %235 : vector<16x16xf32>
    %238 = arith.addf %217, %237 : vector<16x16xf32>
    %c30 = arith.constant 30 : index
    %239 = memref.load %arg2[%c30] : memref<98xf32, #tpu.memory_space<smem>>
    %240 = vector.extract_strided_slice %218 {offsets = [4, 0], sizes = [16, 16], strides = [1, 1]} : vector<22x16xf32> to vector<16x16xf32>
    %241 = vector.broadcast %239 : f32 to vector<16x16xf32>
    %242 = arith.mulf %241, %240 : vector<16x16xf32>
    %243 = arith.addf %223, %242 : vector<16x16xf32>
    %c37 = arith.constant 37 : index
    %244 = memref.load %arg2[%c37] : memref<98xf32, #tpu.memory_space<smem>>
    %245 = vector.extract_strided_slice %218 {offsets = [5, 0], sizes = [16, 16], strides = [1, 1]} : vector<22x16xf32> to vector<16x16xf32>
    %246 = vector.broadcast %244 : f32 to vector<16x16xf32>
    %247 = arith.mulf %246, %245 : vector<16x16xf32>
    %248 = arith.addf %228, %247 : vector<16x16xf32>
    %c44 = arith.constant 44 : index
    %249 = memref.load %arg2[%c44] : memref<98xf32, #tpu.memory_space<smem>>
    %250 = vector.extract_strided_slice %218 {offsets = [6, 0], sizes = [16, 16], strides = [1, 1]} : vector<22x16xf32> to vector<16x16xf32>
    %251 = vector.broadcast %249 : f32 to vector<16x16xf32>
    %252 = arith.mulf %251, %250 : vector<16x16xf32>
    %253 = arith.addf %233, %252 : vector<16x16xf32>
    %254 = vector.extract_strided_slice %145 {offsets = [0, 3], sizes = [22, 16], strides = [1, 1]} : vector<22x22xf32> to vector<22x16xf32>
    %c3_103 = arith.constant 3 : index
    %255 = memref.load %arg2[%c3_103] : memref<98xf32, #tpu.memory_space<smem>>
    %256 = vector.extract_strided_slice %254 {offsets = [0, 0], sizes = [16, 16], strides = [1, 1]} : vector<22x16xf32> to vector<16x16xf32>
    %257 = vector.broadcast %255 : f32 to vector<16x16xf32>
    %258 = arith.mulf %257, %256 : vector<16x16xf32>
    %259 = arith.addf %238, %258 : vector<16x16xf32>
    %c10_104 = arith.constant 10 : index
    %260 = memref.load %arg2[%c10_104] : memref<98xf32, #tpu.memory_space<smem>>
    %261 = vector.extract_strided_slice %254 {offsets = [1, 0], sizes = [16, 16], strides = [1, 1]} : vector<22x16xf32> to vector<16x16xf32>
    %262 = vector.broadcast %260 : f32 to vector<16x16xf32>
    %263 = arith.mulf %262, %261 : vector<16x16xf32>
    %264 = arith.addf %243, %263 : vector<16x16xf32>
    %c17_105 = arith.constant 17 : index
    %265 = memref.load %arg2[%c17_105] : memref<98xf32, #tpu.memory_space<smem>>
    %266 = vector.extract_strided_slice %254 {offsets = [2, 0], sizes = [16, 16], strides = [1, 1]} : vector<22x16xf32> to vector<16x16xf32>
    %267 = vector.broadcast %265 : f32 to vector<16x16xf32>
    %268 = arith.mulf %267, %266 : vector<16x16xf32>
    %269 = arith.addf %248, %268 : vector<16x16xf32>
    %c24 = arith.constant 24 : index
    %270 = memref.load %arg2[%c24] : memref<98xf32, #tpu.memory_space<smem>>
    %271 = vector.extract_strided_slice %254 {offsets = [3, 0], sizes = [16, 16], strides = [1, 1]} : vector<22x16xf32> to vector<16x16xf32>
    %272 = vector.broadcast %270 : f32 to vector<16x16xf32>
    %273 = arith.mulf %272, %271 : vector<16x16xf32>
    %274 = arith.addf %253, %273 : vector<16x16xf32>
    %c31 = arith.constant 31 : index
    %275 = memref.load %arg2[%c31] : memref<98xf32, #tpu.memory_space<smem>>
    %276 = vector.extract_strided_slice %254 {offsets = [4, 0], sizes = [16, 16], strides = [1, 1]} : vector<22x16xf32> to vector<16x16xf32>
    %277 = vector.broadcast %275 : f32 to vector<16x16xf32>
    %278 = arith.mulf %277, %276 : vector<16x16xf32>
    %279 = arith.addf %259, %278 : vector<16x16xf32>
    %c38 = arith.constant 38 : index
    %280 = memref.load %arg2[%c38] : memref<98xf32, #tpu.memory_space<smem>>
    %281 = vector.extract_strided_slice %254 {offsets = [5, 0], sizes = [16, 16], strides = [1, 1]} : vector<22x16xf32> to vector<16x16xf32>
    %282 = vector.broadcast %280 : f32 to vector<16x16xf32>
    %283 = arith.mulf %282, %281 : vector<16x16xf32>
    %284 = arith.addf %264, %283 : vector<16x16xf32>
    %c45 = arith.constant 45 : index
    %285 = memref.load %arg2[%c45] : memref<98xf32, #tpu.memory_space<smem>>
    %286 = vector.extract_strided_slice %254 {offsets = [6, 0], sizes = [16, 16], strides = [1, 1]} : vector<22x16xf32> to vector<16x16xf32>
    %287 = vector.broadcast %285 : f32 to vector<16x16xf32>
    %288 = arith.mulf %287, %286 : vector<16x16xf32>
    %289 = arith.addf %269, %288 : vector<16x16xf32>
    %290 = vector.extract_strided_slice %145 {offsets = [0, 4], sizes = [22, 16], strides = [1, 1]} : vector<22x22xf32> to vector<22x16xf32>
    %c4_106 = arith.constant 4 : index
    %291 = memref.load %arg2[%c4_106] : memref<98xf32, #tpu.memory_space<smem>>
    %292 = vector.extract_strided_slice %290 {offsets = [0, 0], sizes = [16, 16], strides = [1, 1]} : vector<22x16xf32> to vector<16x16xf32>
    %293 = vector.broadcast %291 : f32 to vector<16x16xf32>
    %294 = arith.mulf %293, %292 : vector<16x16xf32>
    %295 = arith.addf %274, %294 : vector<16x16xf32>
    %c11_107 = arith.constant 11 : index
    %296 = memref.load %arg2[%c11_107] : memref<98xf32, #tpu.memory_space<smem>>
    %297 = vector.extract_strided_slice %290 {offsets = [1, 0], sizes = [16, 16], strides = [1, 1]} : vector<22x16xf32> to vector<16x16xf32>
    %298 = vector.broadcast %296 : f32 to vector<16x16xf32>
    %299 = arith.mulf %298, %297 : vector<16x16xf32>
    %300 = arith.addf %279, %299 : vector<16x16xf32>
    %c18_108 = arith.constant 18 : index
    %301 = memref.load %arg2[%c18_108] : memref<98xf32, #tpu.memory_space<smem>>
    %302 = vector.extract_strided_slice %290 {offsets = [2, 0], sizes = [16, 16], strides = [1, 1]} : vector<22x16xf32> to vector<16x16xf32>
    %303 = vector.broadcast %301 : f32 to vector<16x16xf32>
    %304 = arith.mulf %303, %302 : vector<16x16xf32>
    %305 = arith.addf %284, %304 : vector<16x16xf32>
    %c25 = arith.constant 25 : index
    %306 = memref.load %arg2[%c25] : memref<98xf32, #tpu.memory_space<smem>>
    %307 = vector.extract_strided_slice %290 {offsets = [3, 0], sizes = [16, 16], strides = [1, 1]} : vector<22x16xf32> to vector<16x16xf32>
    %308 = vector.broadcast %306 : f32 to vector<16x16xf32>
    %309 = arith.mulf %308, %307 : vector<16x16xf32>
    %310 = arith.addf %289, %309 : vector<16x16xf32>
    %c32 = arith.constant 32 : index
    %311 = memref.load %arg2[%c32] : memref<98xf32, #tpu.memory_space<smem>>
    %312 = vector.extract_strided_slice %290 {offsets = [4, 0], sizes = [16, 16], strides = [1, 1]} : vector<22x16xf32> to vector<16x16xf32>
    %313 = vector.broadcast %311 : f32 to vector<16x16xf32>
    %314 = arith.mulf %313, %312 : vector<16x16xf32>
    %315 = arith.addf %295, %314 : vector<16x16xf32>
    %c39 = arith.constant 39 : index
    %316 = memref.load %arg2[%c39] : memref<98xf32, #tpu.memory_space<smem>>
    %317 = vector.extract_strided_slice %290 {offsets = [5, 0], sizes = [16, 16], strides = [1, 1]} : vector<22x16xf32> to vector<16x16xf32>
    %318 = vector.broadcast %316 : f32 to vector<16x16xf32>
    %319 = arith.mulf %318, %317 : vector<16x16xf32>
    %320 = arith.addf %300, %319 : vector<16x16xf32>
    %c46 = arith.constant 46 : index
    %321 = memref.load %arg2[%c46] : memref<98xf32, #tpu.memory_space<smem>>
    %322 = vector.extract_strided_slice %290 {offsets = [6, 0], sizes = [16, 16], strides = [1, 1]} : vector<22x16xf32> to vector<16x16xf32>
    %323 = vector.broadcast %321 : f32 to vector<16x16xf32>
    %324 = arith.mulf %323, %322 : vector<16x16xf32>
    %325 = arith.addf %305, %324 : vector<16x16xf32>
    %326 = vector.extract_strided_slice %145 {offsets = [0, 5], sizes = [22, 16], strides = [1, 1]} : vector<22x22xf32> to vector<22x16xf32>
    %c5_109 = arith.constant 5 : index
    %327 = memref.load %arg2[%c5_109] : memref<98xf32, #tpu.memory_space<smem>>
    %328 = vector.extract_strided_slice %326 {offsets = [0, 0], sizes = [16, 16], strides = [1, 1]} : vector<22x16xf32> to vector<16x16xf32>
    %329 = vector.broadcast %327 : f32 to vector<16x16xf32>
    %330 = arith.mulf %329, %328 : vector<16x16xf32>
    %331 = arith.addf %310, %330 : vector<16x16xf32>
    %c12_110 = arith.constant 12 : index
    %332 = memref.load %arg2[%c12_110] : memref<98xf32, #tpu.memory_space<smem>>
    %333 = vector.extract_strided_slice %326 {offsets = [1, 0], sizes = [16, 16], strides = [1, 1]} : vector<22x16xf32> to vector<16x16xf32>
    %334 = vector.broadcast %332 : f32 to vector<16x16xf32>
    %335 = arith.mulf %334, %333 : vector<16x16xf32>
    %336 = arith.addf %315, %335 : vector<16x16xf32>
    %c19 = arith.constant 19 : index
    %337 = memref.load %arg2[%c19] : memref<98xf32, #tpu.memory_space<smem>>
    %338 = vector.extract_strided_slice %326 {offsets = [2, 0], sizes = [16, 16], strides = [1, 1]} : vector<22x16xf32> to vector<16x16xf32>
    %339 = vector.broadcast %337 : f32 to vector<16x16xf32>
    %340 = arith.mulf %339, %338 : vector<16x16xf32>
    %341 = arith.addf %320, %340 : vector<16x16xf32>
    %c26 = arith.constant 26 : index
    %342 = memref.load %arg2[%c26] : memref<98xf32, #tpu.memory_space<smem>>
    %343 = vector.extract_strided_slice %326 {offsets = [3, 0], sizes = [16, 16], strides = [1, 1]} : vector<22x16xf32> to vector<16x16xf32>
    %344 = vector.broadcast %342 : f32 to vector<16x16xf32>
    %345 = arith.mulf %344, %343 : vector<16x16xf32>
    %346 = arith.addf %325, %345 : vector<16x16xf32>
    %c33 = arith.constant 33 : index
    %347 = memref.load %arg2[%c33] : memref<98xf32, #tpu.memory_space<smem>>
    %348 = vector.extract_strided_slice %326 {offsets = [4, 0], sizes = [16, 16], strides = [1, 1]} : vector<22x16xf32> to vector<16x16xf32>
    %349 = vector.broadcast %347 : f32 to vector<16x16xf32>
    %350 = arith.mulf %349, %348 : vector<16x16xf32>
    %351 = arith.addf %331, %350 : vector<16x16xf32>
    %c40 = arith.constant 40 : index
    %352 = memref.load %arg2[%c40] : memref<98xf32, #tpu.memory_space<smem>>
    %353 = vector.extract_strided_slice %326 {offsets = [5, 0], sizes = [16, 16], strides = [1, 1]} : vector<22x16xf32> to vector<16x16xf32>
    %354 = vector.broadcast %352 : f32 to vector<16x16xf32>
    %355 = arith.mulf %354, %353 : vector<16x16xf32>
    %356 = arith.addf %336, %355 : vector<16x16xf32>
    %c47 = arith.constant 47 : index
    %357 = memref.load %arg2[%c47] : memref<98xf32, #tpu.memory_space<smem>>
    %358 = vector.extract_strided_slice %326 {offsets = [6, 0], sizes = [16, 16], strides = [1, 1]} : vector<22x16xf32> to vector<16x16xf32>
    %359 = vector.broadcast %357 : f32 to vector<16x16xf32>
    %360 = arith.mulf %359, %358 : vector<16x16xf32>
    %361 = arith.addf %341, %360 : vector<16x16xf32>
    %362 = vector.extract_strided_slice %145 {offsets = [0, 6], sizes = [22, 16], strides = [1, 1]} : vector<22x22xf32> to vector<22x16xf32>
    %c6_111 = arith.constant 6 : index
    %363 = memref.load %arg2[%c6_111] : memref<98xf32, #tpu.memory_space<smem>>
    %364 = vector.extract_strided_slice %362 {offsets = [0, 0], sizes = [16, 16], strides = [1, 1]} : vector<22x16xf32> to vector<16x16xf32>
    %365 = vector.broadcast %363 : f32 to vector<16x16xf32>
    %366 = arith.mulf %365, %364 : vector<16x16xf32>
    %367 = arith.addf %346, %366 : vector<16x16xf32>
    %c13_112 = arith.constant 13 : index
    %368 = memref.load %arg2[%c13_112] : memref<98xf32, #tpu.memory_space<smem>>
    %369 = vector.extract_strided_slice %362 {offsets = [1, 0], sizes = [16, 16], strides = [1, 1]} : vector<22x16xf32> to vector<16x16xf32>
    %370 = vector.broadcast %368 : f32 to vector<16x16xf32>
    %371 = arith.mulf %370, %369 : vector<16x16xf32>
    %372 = arith.addf %351, %371 : vector<16x16xf32>
    %c20 = arith.constant 20 : index
    %373 = memref.load %arg2[%c20] : memref<98xf32, #tpu.memory_space<smem>>
    %374 = vector.extract_strided_slice %362 {offsets = [2, 0], sizes = [16, 16], strides = [1, 1]} : vector<22x16xf32> to vector<16x16xf32>
    %375 = vector.broadcast %373 : f32 to vector<16x16xf32>
    %376 = arith.mulf %375, %374 : vector<16x16xf32>
    %377 = arith.addf %356, %376 : vector<16x16xf32>
    %c27 = arith.constant 27 : index
    %378 = memref.load %arg2[%c27] : memref<98xf32, #tpu.memory_space<smem>>
    %379 = vector.extract_strided_slice %362 {offsets = [3, 0], sizes = [16, 16], strides = [1, 1]} : vector<22x16xf32> to vector<16x16xf32>
    %380 = vector.broadcast %378 : f32 to vector<16x16xf32>
    %381 = arith.mulf %380, %379 : vector<16x16xf32>
    %382 = arith.addf %361, %381 : vector<16x16xf32>
    %c34 = arith.constant 34 : index
    %383 = memref.load %arg2[%c34] : memref<98xf32, #tpu.memory_space<smem>>
    %384 = vector.extract_strided_slice %362 {offsets = [4, 0], sizes = [16, 16], strides = [1, 1]} : vector<22x16xf32> to vector<16x16xf32>
    %385 = vector.broadcast %383 : f32 to vector<16x16xf32>
    %386 = arith.mulf %385, %384 : vector<16x16xf32>
    %387 = arith.addf %367, %386 : vector<16x16xf32>
    %c41 = arith.constant 41 : index
    %388 = memref.load %arg2[%c41] : memref<98xf32, #tpu.memory_space<smem>>
    %389 = vector.extract_strided_slice %362 {offsets = [5, 0], sizes = [16, 16], strides = [1, 1]} : vector<22x16xf32> to vector<16x16xf32>
    %390 = vector.broadcast %388 : f32 to vector<16x16xf32>
    %391 = arith.mulf %390, %389 : vector<16x16xf32>
    %392 = arith.addf %372, %391 : vector<16x16xf32>
    %c48 = arith.constant 48 : index
    %393 = memref.load %arg2[%c48] : memref<98xf32, #tpu.memory_space<smem>>
    %394 = vector.extract_strided_slice %362 {offsets = [6, 0], sizes = [16, 16], strides = [1, 1]} : vector<22x16xf32> to vector<16x16xf32>
    %395 = vector.broadcast %393 : f32 to vector<16x16xf32>
    %396 = arith.mulf %395, %394 : vector<16x16xf32>
    %397 = arith.addf %377, %396 : vector<16x16xf32>
    %c1_113 = arith.constant 1 : index
    %c0_114 = arith.constant 0 : index
    %c0_115 = arith.constant 0 : index
    %398 = vector.load %arg5[%c1_113, %c0_114, %c0_115] : memref<2x22x22xf32, #tpu.memory_space<vmem>>, vector<1x22x22xf32>
    %399 = vector.shape_cast %398 : vector<1x22x22xf32> to vector<22x22xf32>
    %400 = vector.extract_strided_slice %399 {offsets = [0, 0], sizes = [22, 16], strides = [1, 1]} : vector<22x22xf32> to vector<22x16xf32>
    %c49 = arith.constant 49 : index
    %401 = memref.load %arg2[%c49] : memref<98xf32, #tpu.memory_space<smem>>
    %402 = vector.extract_strided_slice %400 {offsets = [0, 0], sizes = [16, 16], strides = [1, 1]} : vector<22x16xf32> to vector<16x16xf32>
    %403 = vector.broadcast %401 : f32 to vector<16x16xf32>
    %404 = arith.mulf %403, %402 : vector<16x16xf32>
    %405 = arith.addf %382, %404 : vector<16x16xf32>
    %c56 = arith.constant 56 : index
    %406 = memref.load %arg2[%c56] : memref<98xf32, #tpu.memory_space<smem>>
    %407 = vector.extract_strided_slice %400 {offsets = [1, 0], sizes = [16, 16], strides = [1, 1]} : vector<22x16xf32> to vector<16x16xf32>
    %408 = vector.broadcast %406 : f32 to vector<16x16xf32>
    %409 = arith.mulf %408, %407 : vector<16x16xf32>
    %410 = arith.addf %387, %409 : vector<16x16xf32>
    %c63 = arith.constant 63 : index
    %411 = memref.load %arg2[%c63] : memref<98xf32, #tpu.memory_space<smem>>
    %412 = vector.extract_strided_slice %400 {offsets = [2, 0], sizes = [16, 16], strides = [1, 1]} : vector<22x16xf32> to vector<16x16xf32>
    %413 = vector.broadcast %411 : f32 to vector<16x16xf32>
    %414 = arith.mulf %413, %412 : vector<16x16xf32>
    %415 = arith.addf %392, %414 : vector<16x16xf32>
    %c70 = arith.constant 70 : index
    %416 = memref.load %arg2[%c70] : memref<98xf32, #tpu.memory_space<smem>>
    %417 = vector.extract_strided_slice %400 {offsets = [3, 0], sizes = [16, 16], strides = [1, 1]} : vector<22x16xf32> to vector<16x16xf32>
    %418 = vector.broadcast %416 : f32 to vector<16x16xf32>
    %419 = arith.mulf %418, %417 : vector<16x16xf32>
    %420 = arith.addf %397, %419 : vector<16x16xf32>
    %c77 = arith.constant 77 : index
    %421 = memref.load %arg2[%c77] : memref<98xf32, #tpu.memory_space<smem>>
    %422 = vector.extract_strided_slice %400 {offsets = [4, 0], sizes = [16, 16], strides = [1, 1]} : vector<22x16xf32> to vector<16x16xf32>
    %423 = vector.broadcast %421 : f32 to vector<16x16xf32>
    %424 = arith.mulf %423, %422 : vector<16x16xf32>
    %425 = arith.addf %405, %424 : vector<16x16xf32>
    %c84 = arith.constant 84 : index
    %426 = memref.load %arg2[%c84] : memref<98xf32, #tpu.memory_space<smem>>
    %427 = vector.extract_strided_slice %400 {offsets = [5, 0], sizes = [16, 16], strides = [1, 1]} : vector<22x16xf32> to vector<16x16xf32>
    %428 = vector.broadcast %426 : f32 to vector<16x16xf32>
    %429 = arith.mulf %428, %427 : vector<16x16xf32>
    %430 = arith.addf %410, %429 : vector<16x16xf32>
    %c91 = arith.constant 91 : index
    %431 = memref.load %arg2[%c91] : memref<98xf32, #tpu.memory_space<smem>>
    %432 = vector.extract_strided_slice %400 {offsets = [6, 0], sizes = [16, 16], strides = [1, 1]} : vector<22x16xf32> to vector<16x16xf32>
    %433 = vector.broadcast %431 : f32 to vector<16x16xf32>
    %434 = arith.mulf %433, %432 : vector<16x16xf32>
    %435 = arith.addf %415, %434 : vector<16x16xf32>
    %436 = vector.extract_strided_slice %399 {offsets = [0, 1], sizes = [22, 16], strides = [1, 1]} : vector<22x22xf32> to vector<22x16xf32>
    %c50 = arith.constant 50 : index
    %437 = memref.load %arg2[%c50] : memref<98xf32, #tpu.memory_space<smem>>
    %438 = vector.extract_strided_slice %436 {offsets = [0, 0], sizes = [16, 16], strides = [1, 1]} : vector<22x16xf32> to vector<16x16xf32>
    %439 = vector.broadcast %437 : f32 to vector<16x16xf32>
    %440 = arith.mulf %439, %438 : vector<16x16xf32>
    %441 = arith.addf %420, %440 : vector<16x16xf32>
    %c57 = arith.constant 57 : index
    %442 = memref.load %arg2[%c57] : memref<98xf32, #tpu.memory_space<smem>>
    %443 = vector.extract_strided_slice %436 {offsets = [1, 0], sizes = [16, 16], strides = [1, 1]} : vector<22x16xf32> to vector<16x16xf32>
    %444 = vector.broadcast %442 : f32 to vector<16x16xf32>
    %445 = arith.mulf %444, %443 : vector<16x16xf32>
    %446 = arith.addf %425, %445 : vector<16x16xf32>
    %c64 = arith.constant 64 : index
    %447 = memref.load %arg2[%c64] : memref<98xf32, #tpu.memory_space<smem>>
    %448 = vector.extract_strided_slice %436 {offsets = [2, 0], sizes = [16, 16], strides = [1, 1]} : vector<22x16xf32> to vector<16x16xf32>
    %449 = vector.broadcast %447 : f32 to vector<16x16xf32>
    %450 = arith.mulf %449, %448 : vector<16x16xf32>
    %451 = arith.addf %430, %450 : vector<16x16xf32>
    %c71 = arith.constant 71 : index
    %452 = memref.load %arg2[%c71] : memref<98xf32, #tpu.memory_space<smem>>
    %453 = vector.extract_strided_slice %436 {offsets = [3, 0], sizes = [16, 16], strides = [1, 1]} : vector<22x16xf32> to vector<16x16xf32>
    %454 = vector.broadcast %452 : f32 to vector<16x16xf32>
    %455 = arith.mulf %454, %453 : vector<16x16xf32>
    %456 = arith.addf %435, %455 : vector<16x16xf32>
    %c78 = arith.constant 78 : index
    %457 = memref.load %arg2[%c78] : memref<98xf32, #tpu.memory_space<smem>>
    %458 = vector.extract_strided_slice %436 {offsets = [4, 0], sizes = [16, 16], strides = [1, 1]} : vector<22x16xf32> to vector<16x16xf32>
    %459 = vector.broadcast %457 : f32 to vector<16x16xf32>
    %460 = arith.mulf %459, %458 : vector<16x16xf32>
    %461 = arith.addf %441, %460 : vector<16x16xf32>
    %c85 = arith.constant 85 : index
    %462 = memref.load %arg2[%c85] : memref<98xf32, #tpu.memory_space<smem>>
    %463 = vector.extract_strided_slice %436 {offsets = [5, 0], sizes = [16, 16], strides = [1, 1]} : vector<22x16xf32> to vector<16x16xf32>
    %464 = vector.broadcast %462 : f32 to vector<16x16xf32>
    %465 = arith.mulf %464, %463 : vector<16x16xf32>
    %466 = arith.addf %446, %465 : vector<16x16xf32>
    %c92 = arith.constant 92 : index
    %467 = memref.load %arg2[%c92] : memref<98xf32, #tpu.memory_space<smem>>
    %468 = vector.extract_strided_slice %436 {offsets = [6, 0], sizes = [16, 16], strides = [1, 1]} : vector<22x16xf32> to vector<16x16xf32>
    %469 = vector.broadcast %467 : f32 to vector<16x16xf32>
    %470 = arith.mulf %469, %468 : vector<16x16xf32>
    %471 = arith.addf %451, %470 : vector<16x16xf32>
    %472 = vector.extract_strided_slice %399 {offsets = [0, 2], sizes = [22, 16], strides = [1, 1]} : vector<22x22xf32> to vector<22x16xf32>
    %c51 = arith.constant 51 : index
    %473 = memref.load %arg2[%c51] : memref<98xf32, #tpu.memory_space<smem>>
    %474 = vector.extract_strided_slice %472 {offsets = [0, 0], sizes = [16, 16], strides = [1, 1]} : vector<22x16xf32> to vector<16x16xf32>
    %475 = vector.broadcast %473 : f32 to vector<16x16xf32>
    %476 = arith.mulf %475, %474 : vector<16x16xf32>
    %477 = arith.addf %456, %476 : vector<16x16xf32>
    %c58 = arith.constant 58 : index
    %478 = memref.load %arg2[%c58] : memref<98xf32, #tpu.memory_space<smem>>
    %479 = vector.extract_strided_slice %472 {offsets = [1, 0], sizes = [16, 16], strides = [1, 1]} : vector<22x16xf32> to vector<16x16xf32>
    %480 = vector.broadcast %478 : f32 to vector<16x16xf32>
    %481 = arith.mulf %480, %479 : vector<16x16xf32>
    %482 = arith.addf %461, %481 : vector<16x16xf32>
    %c65 = arith.constant 65 : index
    %483 = memref.load %arg2[%c65] : memref<98xf32, #tpu.memory_space<smem>>
    %484 = vector.extract_strided_slice %472 {offsets = [2, 0], sizes = [16, 16], strides = [1, 1]} : vector<22x16xf32> to vector<16x16xf32>
    %485 = vector.broadcast %483 : f32 to vector<16x16xf32>
    %486 = arith.mulf %485, %484 : vector<16x16xf32>
    %487 = arith.addf %466, %486 : vector<16x16xf32>
    %c72 = arith.constant 72 : index
    %488 = memref.load %arg2[%c72] : memref<98xf32, #tpu.memory_space<smem>>
    %489 = vector.extract_strided_slice %472 {offsets = [3, 0], sizes = [16, 16], strides = [1, 1]} : vector<22x16xf32> to vector<16x16xf32>
    %490 = vector.broadcast %488 : f32 to vector<16x16xf32>
    %491 = arith.mulf %490, %489 : vector<16x16xf32>
    %492 = arith.addf %471, %491 : vector<16x16xf32>
    %c79 = arith.constant 79 : index
    %493 = memref.load %arg2[%c79] : memref<98xf32, #tpu.memory_space<smem>>
    %494 = vector.extract_strided_slice %472 {offsets = [4, 0], sizes = [16, 16], strides = [1, 1]} : vector<22x16xf32> to vector<16x16xf32>
    %495 = vector.broadcast %493 : f32 to vector<16x16xf32>
    %496 = arith.mulf %495, %494 : vector<16x16xf32>
    %497 = arith.addf %477, %496 : vector<16x16xf32>
    %c86 = arith.constant 86 : index
    %498 = memref.load %arg2[%c86] : memref<98xf32, #tpu.memory_space<smem>>
    %499 = vector.extract_strided_slice %472 {offsets = [5, 0], sizes = [16, 16], strides = [1, 1]} : vector<22x16xf32> to vector<16x16xf32>
    %500 = vector.broadcast %498 : f32 to vector<16x16xf32>
    %501 = arith.mulf %500, %499 : vector<16x16xf32>
    %502 = arith.addf %482, %501 : vector<16x16xf32>
    %c93 = arith.constant 93 : index
    %503 = memref.load %arg2[%c93] : memref<98xf32, #tpu.memory_space<smem>>
    %504 = vector.extract_strided_slice %472 {offsets = [6, 0], sizes = [16, 16], strides = [1, 1]} : vector<22x16xf32> to vector<16x16xf32>
    %505 = vector.broadcast %503 : f32 to vector<16x16xf32>
    %506 = arith.mulf %505, %504 : vector<16x16xf32>
    %507 = arith.addf %487, %506 : vector<16x16xf32>
    %508 = vector.extract_strided_slice %399 {offsets = [0, 3], sizes = [22, 16], strides = [1, 1]} : vector<22x22xf32> to vector<22x16xf32>
    %c52 = arith.constant 52 : index
    %509 = memref.load %arg2[%c52] : memref<98xf32, #tpu.memory_space<smem>>
    %510 = vector.extract_strided_slice %508 {offsets = [0, 0], sizes = [16, 16], strides = [1, 1]} : vector<22x16xf32> to vector<16x16xf32>
    %511 = vector.broadcast %509 : f32 to vector<16x16xf32>
    %512 = arith.mulf %511, %510 : vector<16x16xf32>
    %513 = arith.addf %492, %512 : vector<16x16xf32>
    %c59 = arith.constant 59 : index
    %514 = memref.load %arg2[%c59] : memref<98xf32, #tpu.memory_space<smem>>
    %515 = vector.extract_strided_slice %508 {offsets = [1, 0], sizes = [16, 16], strides = [1, 1]} : vector<22x16xf32> to vector<16x16xf32>
    %516 = vector.broadcast %514 : f32 to vector<16x16xf32>
    %517 = arith.mulf %516, %515 : vector<16x16xf32>
    %518 = arith.addf %497, %517 : vector<16x16xf32>
    %c66 = arith.constant 66 : index
    %519 = memref.load %arg2[%c66] : memref<98xf32, #tpu.memory_space<smem>>
    %520 = vector.extract_strided_slice %508 {offsets = [2, 0], sizes = [16, 16], strides = [1, 1]} : vector<22x16xf32> to vector<16x16xf32>
    %521 = vector.broadcast %519 : f32 to vector<16x16xf32>
    %522 = arith.mulf %521, %520 : vector<16x16xf32>
    %523 = arith.addf %502, %522 : vector<16x16xf32>
    %c73 = arith.constant 73 : index
    %524 = memref.load %arg2[%c73] : memref<98xf32, #tpu.memory_space<smem>>
    %525 = vector.extract_strided_slice %508 {offsets = [3, 0], sizes = [16, 16], strides = [1, 1]} : vector<22x16xf32> to vector<16x16xf32>
    %526 = vector.broadcast %524 : f32 to vector<16x16xf32>
    %527 = arith.mulf %526, %525 : vector<16x16xf32>
    %528 = arith.addf %507, %527 : vector<16x16xf32>
    %c80 = arith.constant 80 : index
    %529 = memref.load %arg2[%c80] : memref<98xf32, #tpu.memory_space<smem>>
    %530 = vector.extract_strided_slice %508 {offsets = [4, 0], sizes = [16, 16], strides = [1, 1]} : vector<22x16xf32> to vector<16x16xf32>
    %531 = vector.broadcast %529 : f32 to vector<16x16xf32>
    %532 = arith.mulf %531, %530 : vector<16x16xf32>
    %533 = arith.addf %513, %532 : vector<16x16xf32>
    %c87 = arith.constant 87 : index
    %534 = memref.load %arg2[%c87] : memref<98xf32, #tpu.memory_space<smem>>
    %535 = vector.extract_strided_slice %508 {offsets = [5, 0], sizes = [16, 16], strides = [1, 1]} : vector<22x16xf32> to vector<16x16xf32>
    %536 = vector.broadcast %534 : f32 to vector<16x16xf32>
    %537 = arith.mulf %536, %535 : vector<16x16xf32>
    %538 = arith.addf %518, %537 : vector<16x16xf32>
    %c94 = arith.constant 94 : index
    %539 = memref.load %arg2[%c94] : memref<98xf32, #tpu.memory_space<smem>>
    %540 = vector.extract_strided_slice %508 {offsets = [6, 0], sizes = [16, 16], strides = [1, 1]} : vector<22x16xf32> to vector<16x16xf32>
    %541 = vector.broadcast %539 : f32 to vector<16x16xf32>
    %542 = arith.mulf %541, %540 : vector<16x16xf32>
    %543 = arith.addf %523, %542 : vector<16x16xf32>
    %544 = vector.extract_strided_slice %399 {offsets = [0, 4], sizes = [22, 16], strides = [1, 1]} : vector<22x22xf32> to vector<22x16xf32>
    %c53 = arith.constant 53 : index
    %545 = memref.load %arg2[%c53] : memref<98xf32, #tpu.memory_space<smem>>
    %546 = vector.extract_strided_slice %544 {offsets = [0, 0], sizes = [16, 16], strides = [1, 1]} : vector<22x16xf32> to vector<16x16xf32>
    %547 = vector.broadcast %545 : f32 to vector<16x16xf32>
    %548 = arith.mulf %547, %546 : vector<16x16xf32>
    %549 = arith.addf %528, %548 : vector<16x16xf32>
    %c60 = arith.constant 60 : index
    %550 = memref.load %arg2[%c60] : memref<98xf32, #tpu.memory_space<smem>>
    %551 = vector.extract_strided_slice %544 {offsets = [1, 0], sizes = [16, 16], strides = [1, 1]} : vector<22x16xf32> to vector<16x16xf32>
    %552 = vector.broadcast %550 : f32 to vector<16x16xf32>
    %553 = arith.mulf %552, %551 : vector<16x16xf32>
    %554 = arith.addf %533, %553 : vector<16x16xf32>
    %c67 = arith.constant 67 : index
    %555 = memref.load %arg2[%c67] : memref<98xf32, #tpu.memory_space<smem>>
    %556 = vector.extract_strided_slice %544 {offsets = [2, 0], sizes = [16, 16], strides = [1, 1]} : vector<22x16xf32> to vector<16x16xf32>
    %557 = vector.broadcast %555 : f32 to vector<16x16xf32>
    %558 = arith.mulf %557, %556 : vector<16x16xf32>
    %559 = arith.addf %538, %558 : vector<16x16xf32>
    %c74 = arith.constant 74 : index
    %560 = memref.load %arg2[%c74] : memref<98xf32, #tpu.memory_space<smem>>
    %561 = vector.extract_strided_slice %544 {offsets = [3, 0], sizes = [16, 16], strides = [1, 1]} : vector<22x16xf32> to vector<16x16xf32>
    %562 = vector.broadcast %560 : f32 to vector<16x16xf32>
    %563 = arith.mulf %562, %561 : vector<16x16xf32>
    %564 = arith.addf %543, %563 : vector<16x16xf32>
    %c81 = arith.constant 81 : index
    %565 = memref.load %arg2[%c81] : memref<98xf32, #tpu.memory_space<smem>>
    %566 = vector.extract_strided_slice %544 {offsets = [4, 0], sizes = [16, 16], strides = [1, 1]} : vector<22x16xf32> to vector<16x16xf32>
    %567 = vector.broadcast %565 : f32 to vector<16x16xf32>
    %568 = arith.mulf %567, %566 : vector<16x16xf32>
    %569 = arith.addf %549, %568 : vector<16x16xf32>
    %c88 = arith.constant 88 : index
    %570 = memref.load %arg2[%c88] : memref<98xf32, #tpu.memory_space<smem>>
    %571 = vector.extract_strided_slice %544 {offsets = [5, 0], sizes = [16, 16], strides = [1, 1]} : vector<22x16xf32> to vector<16x16xf32>
    %572 = vector.broadcast %570 : f32 to vector<16x16xf32>
    %573 = arith.mulf %572, %571 : vector<16x16xf32>
    %574 = arith.addf %554, %573 : vector<16x16xf32>
    %c95 = arith.constant 95 : index
    %575 = memref.load %arg2[%c95] : memref<98xf32, #tpu.memory_space<smem>>
    %576 = vector.extract_strided_slice %544 {offsets = [6, 0], sizes = [16, 16], strides = [1, 1]} : vector<22x16xf32> to vector<16x16xf32>
    %577 = vector.broadcast %575 : f32 to vector<16x16xf32>
    %578 = arith.mulf %577, %576 : vector<16x16xf32>
    %579 = arith.addf %559, %578 : vector<16x16xf32>
    %580 = vector.extract_strided_slice %399 {offsets = [0, 5], sizes = [22, 16], strides = [1, 1]} : vector<22x22xf32> to vector<22x16xf32>
    %c54 = arith.constant 54 : index
    %581 = memref.load %arg2[%c54] : memref<98xf32, #tpu.memory_space<smem>>
    %582 = vector.extract_strided_slice %580 {offsets = [0, 0], sizes = [16, 16], strides = [1, 1]} : vector<22x16xf32> to vector<16x16xf32>
    %583 = vector.broadcast %581 : f32 to vector<16x16xf32>
    %584 = arith.mulf %583, %582 : vector<16x16xf32>
    %585 = arith.addf %564, %584 : vector<16x16xf32>
    %c61 = arith.constant 61 : index
    %586 = memref.load %arg2[%c61] : memref<98xf32, #tpu.memory_space<smem>>
    %587 = vector.extract_strided_slice %580 {offsets = [1, 0], sizes = [16, 16], strides = [1, 1]} : vector<22x16xf32> to vector<16x16xf32>
    %588 = vector.broadcast %586 : f32 to vector<16x16xf32>
    %589 = arith.mulf %588, %587 : vector<16x16xf32>
    %590 = arith.addf %569, %589 : vector<16x16xf32>
    %c68 = arith.constant 68 : index
    %591 = memref.load %arg2[%c68] : memref<98xf32, #tpu.memory_space<smem>>
    %592 = vector.extract_strided_slice %580 {offsets = [2, 0], sizes = [16, 16], strides = [1, 1]} : vector<22x16xf32> to vector<16x16xf32>
    %593 = vector.broadcast %591 : f32 to vector<16x16xf32>
    %594 = arith.mulf %593, %592 : vector<16x16xf32>
    %595 = arith.addf %574, %594 : vector<16x16xf32>
    %c75 = arith.constant 75 : index
    %596 = memref.load %arg2[%c75] : memref<98xf32, #tpu.memory_space<smem>>
    %597 = vector.extract_strided_slice %580 {offsets = [3, 0], sizes = [16, 16], strides = [1, 1]} : vector<22x16xf32> to vector<16x16xf32>
    %598 = vector.broadcast %596 : f32 to vector<16x16xf32>
    %599 = arith.mulf %598, %597 : vector<16x16xf32>
    %600 = arith.addf %579, %599 : vector<16x16xf32>
    %c82 = arith.constant 82 : index
    %601 = memref.load %arg2[%c82] : memref<98xf32, #tpu.memory_space<smem>>
    %602 = vector.extract_strided_slice %580 {offsets = [4, 0], sizes = [16, 16], strides = [1, 1]} : vector<22x16xf32> to vector<16x16xf32>
    %603 = vector.broadcast %601 : f32 to vector<16x16xf32>
    %604 = arith.mulf %603, %602 : vector<16x16xf32>
    %605 = arith.addf %585, %604 : vector<16x16xf32>
    %c89 = arith.constant 89 : index
    %606 = memref.load %arg2[%c89] : memref<98xf32, #tpu.memory_space<smem>>
    %607 = vector.extract_strided_slice %580 {offsets = [5, 0], sizes = [16, 16], strides = [1, 1]} : vector<22x16xf32> to vector<16x16xf32>
    %608 = vector.broadcast %606 : f32 to vector<16x16xf32>
    %609 = arith.mulf %608, %607 : vector<16x16xf32>
    %610 = arith.addf %590, %609 : vector<16x16xf32>
    %c96 = arith.constant 96 : index
    %611 = memref.load %arg2[%c96] : memref<98xf32, #tpu.memory_space<smem>>
    %612 = vector.extract_strided_slice %580 {offsets = [6, 0], sizes = [16, 16], strides = [1, 1]} : vector<22x16xf32> to vector<16x16xf32>
    %613 = vector.broadcast %611 : f32 to vector<16x16xf32>
    %614 = arith.mulf %613, %612 : vector<16x16xf32>
    %615 = arith.addf %595, %614 : vector<16x16xf32>
    %616 = vector.extract_strided_slice %399 {offsets = [0, 6], sizes = [22, 16], strides = [1, 1]} : vector<22x22xf32> to vector<22x16xf32>
    %c55 = arith.constant 55 : index
    %617 = memref.load %arg2[%c55] : memref<98xf32, #tpu.memory_space<smem>>
    %618 = vector.extract_strided_slice %616 {offsets = [0, 0], sizes = [16, 16], strides = [1, 1]} : vector<22x16xf32> to vector<16x16xf32>
    %619 = vector.broadcast %617 : f32 to vector<16x16xf32>
    %620 = arith.mulf %619, %618 : vector<16x16xf32>
    %621 = arith.addf %600, %620 : vector<16x16xf32>
    %c62 = arith.constant 62 : index
    %622 = memref.load %arg2[%c62] : memref<98xf32, #tpu.memory_space<smem>>
    %623 = vector.extract_strided_slice %616 {offsets = [1, 0], sizes = [16, 16], strides = [1, 1]} : vector<22x16xf32> to vector<16x16xf32>
    %624 = vector.broadcast %622 : f32 to vector<16x16xf32>
    %625 = arith.mulf %624, %623 : vector<16x16xf32>
    %626 = arith.addf %605, %625 : vector<16x16xf32>
    %c69 = arith.constant 69 : index
    %627 = memref.load %arg2[%c69] : memref<98xf32, #tpu.memory_space<smem>>
    %628 = vector.extract_strided_slice %616 {offsets = [2, 0], sizes = [16, 16], strides = [1, 1]} : vector<22x16xf32> to vector<16x16xf32>
    %629 = vector.broadcast %627 : f32 to vector<16x16xf32>
    %630 = arith.mulf %629, %628 : vector<16x16xf32>
    %631 = arith.addf %610, %630 : vector<16x16xf32>
    %c76 = arith.constant 76 : index
    %632 = memref.load %arg2[%c76] : memref<98xf32, #tpu.memory_space<smem>>
    %633 = vector.extract_strided_slice %616 {offsets = [3, 0], sizes = [16, 16], strides = [1, 1]} : vector<22x16xf32> to vector<16x16xf32>
    %634 = vector.broadcast %632 : f32 to vector<16x16xf32>
    %635 = arith.mulf %634, %633 : vector<16x16xf32>
    %636 = arith.addf %615, %635 : vector<16x16xf32>
    %c83 = arith.constant 83 : index
    %637 = memref.load %arg2[%c83] : memref<98xf32, #tpu.memory_space<smem>>
    %638 = vector.extract_strided_slice %616 {offsets = [4, 0], sizes = [16, 16], strides = [1, 1]} : vector<22x16xf32> to vector<16x16xf32>
    %639 = vector.broadcast %637 : f32 to vector<16x16xf32>
    %640 = arith.mulf %639, %638 : vector<16x16xf32>
    %641 = arith.addf %621, %640 : vector<16x16xf32>
    %c90 = arith.constant 90 : index
    %642 = memref.load %arg2[%c90] : memref<98xf32, #tpu.memory_space<smem>>
    %643 = vector.extract_strided_slice %616 {offsets = [5, 0], sizes = [16, 16], strides = [1, 1]} : vector<22x16xf32> to vector<16x16xf32>
    %644 = vector.broadcast %642 : f32 to vector<16x16xf32>
    %645 = arith.mulf %644, %643 : vector<16x16xf32>
    %646 = arith.addf %626, %645 : vector<16x16xf32>
    %c97 = arith.constant 97 : index
    %647 = memref.load %arg2[%c97] : memref<98xf32, #tpu.memory_space<smem>>
    %648 = vector.extract_strided_slice %616 {offsets = [6, 0], sizes = [16, 16], strides = [1, 1]} : vector<22x16xf32> to vector<16x16xf32>
    %649 = vector.broadcast %647 : f32 to vector<16x16xf32>
    %650 = arith.mulf %649, %648 : vector<16x16xf32>
    %651 = arith.addf %631, %650 : vector<16x16xf32>
    %652 = arith.addf %646, %651 : vector<16x16xf32>
    %653 = arith.addf %636, %641 : vector<16x16xf32>
    %654 = arith.addf %652, %653 : vector<16x16xf32>
    %c0_116 = arith.constant 0 : index
    %655 = memref.load %arg3[%c0_116] : memref<1xf32, #tpu.memory_space<smem>>
    %656 = vector.broadcast %655 : f32 to vector<16x16xf32>
    %657 = arith.addf %654, %656 : vector<16x16xf32>
    %cst_117 = arith.constant 0.000000e+00 : f32
    %658 = vector.broadcast %cst_117 : f32 to vector<16x16xf32>
    %659 = arith.maximumf %657, %658 : vector<16x16xf32>
    %cst_118 = arith.constant 0.000000e+00 : f32
    %660 = vector.broadcast %cst_118 : f32 to vector<16x16xf32>
    %661 = arith.subf %660, %659 : vector<16x16xf32>
    %662 = math.exp %661 : vector<16x16xf32>
    %cst_119 = arith.constant 1.000000e+00 : f32
    %663 = vector.broadcast %cst_119 : f32 to vector<16x16xf32>
    %664 = arith.addf %663, %662 : vector<16x16xf32>
    %665 = tpu.reciprocal %664 : vector<16x16xf32> -> vector<16x16xf32>
    %666 = vector.extract_strided_slice %665 {offsets = [0, 0], sizes = [1, 16], strides = [1, 1]} : vector<16x16xf32> to vector<1x16xf32>
    %c0_120 = arith.constant 0 : index
    %c0_121 = arith.constant 0 : index
    %667 = vector.load %arg6[%c0_120, %c0_121] : memref<1x256xf32, #tpu.memory_space<vmem>>, vector<1x16xf32>
    tpu.vector_store %arg6[%c0_120, %c0_121], %666 {strides = array<i32>} : memref<1x256xf32, #tpu.memory_space<vmem>>, vector<1x16xf32>,
    %668 = vector.extract_strided_slice %665 {offsets = [1, 0], sizes = [1, 16], strides = [1, 1]} : vector<16x16xf32> to vector<1x16xf32>
    %c0_122 = arith.constant 0 : index
    %c16_123 = arith.constant 16 : index
    %669 = vector.load %arg6[%c0_122, %c16_123] : memref<1x256xf32, #tpu.memory_space<vmem>>, vector<1x16xf32>
    tpu.vector_store %arg6[%c0_122, %c16_123], %668 {strides = array<i32>} : memref<1x256xf32, #tpu.memory_space<vmem>>, vector<1x16xf32>,
    %670 = vector.extract_strided_slice %665 {offsets = [2, 0], sizes = [1, 16], strides = [1, 1]} : vector<16x16xf32> to vector<1x16xf32>
    %c0_124 = arith.constant 0 : index
    %c32_125 = arith.constant 32 : index
    %671 = vector.load %arg6[%c0_124, %c32_125] : memref<1x256xf32, #tpu.memory_space<vmem>>, vector<1x16xf32>
    tpu.vector_store %arg6[%c0_124, %c32_125], %670 {strides = array<i32>} : memref<1x256xf32, #tpu.memory_space<vmem>>, vector<1x16xf32>,
    %672 = vector.extract_strided_slice %665 {offsets = [3, 0], sizes = [1, 16], strides = [1, 1]} : vector<16x16xf32> to vector<1x16xf32>
    %c0_126 = arith.constant 0 : index
    %c48_127 = arith.constant 48 : index
    %673 = vector.load %arg6[%c0_126, %c48_127] : memref<1x256xf32, #tpu.memory_space<vmem>>, vector<1x16xf32>
    tpu.vector_store %arg6[%c0_126, %c48_127], %672 {strides = array<i32>} : memref<1x256xf32, #tpu.memory_space<vmem>>, vector<1x16xf32>,
    %674 = vector.extract_strided_slice %665 {offsets = [4, 0], sizes = [1, 16], strides = [1, 1]} : vector<16x16xf32> to vector<1x16xf32>
    %c0_128 = arith.constant 0 : index
    %c64_129 = arith.constant 64 : index
    %675 = vector.load %arg6[%c0_128, %c64_129] : memref<1x256xf32, #tpu.memory_space<vmem>>, vector<1x16xf32>
    tpu.vector_store %arg6[%c0_128, %c64_129], %674 {strides = array<i32>} : memref<1x256xf32, #tpu.memory_space<vmem>>, vector<1x16xf32>,
    %676 = vector.extract_strided_slice %665 {offsets = [5, 0], sizes = [1, 16], strides = [1, 1]} : vector<16x16xf32> to vector<1x16xf32>
    %c0_130 = arith.constant 0 : index
    %c80_131 = arith.constant 80 : index
    %677 = vector.load %arg6[%c0_130, %c80_131] : memref<1x256xf32, #tpu.memory_space<vmem>>, vector<1x16xf32>
    tpu.vector_store %arg6[%c0_130, %c80_131], %676 {strides = array<i32>} : memref<1x256xf32, #tpu.memory_space<vmem>>, vector<1x16xf32>,
    %678 = vector.extract_strided_slice %665 {offsets = [6, 0], sizes = [1, 16], strides = [1, 1]} : vector<16x16xf32> to vector<1x16xf32>
    %c0_132 = arith.constant 0 : index
    %c96_133 = arith.constant 96 : index
    %679 = vector.load %arg6[%c0_132, %c96_133] : memref<1x256xf32, #tpu.memory_space<vmem>>, vector<1x16xf32>
    tpu.vector_store %arg6[%c0_132, %c96_133], %678 {strides = array<i32>} : memref<1x256xf32, #tpu.memory_space<vmem>>, vector<1x16xf32>,
    %680 = vector.extract_strided_slice %665 {offsets = [7, 0], sizes = [1, 16], strides = [1, 1]} : vector<16x16xf32> to vector<1x16xf32>
    %c0_134 = arith.constant 0 : index
    %c112 = arith.constant 112 : index
    %681 = vector.load %arg6[%c0_134, %c112] : memref<1x256xf32, #tpu.memory_space<vmem>>, vector<1x16xf32>
    tpu.vector_store %arg6[%c0_134, %c112], %680 {strides = array<i32>} : memref<1x256xf32, #tpu.memory_space<vmem>>, vector<1x16xf32>,
    %682 = vector.extract_strided_slice %665 {offsets = [8, 0], sizes = [1, 16], strides = [1, 1]} : vector<16x16xf32> to vector<1x16xf32>
    %c0_135 = arith.constant 0 : index
    %c128 = arith.constant 128 : index
    %683 = vector.load %arg6[%c0_135, %c128] : memref<1x256xf32, #tpu.memory_space<vmem>>, vector<1x16xf32>
    tpu.vector_store %arg6[%c0_135, %c128], %682 {strides = array<i32>} : memref<1x256xf32, #tpu.memory_space<vmem>>, vector<1x16xf32>,
    %684 = vector.extract_strided_slice %665 {offsets = [9, 0], sizes = [1, 16], strides = [1, 1]} : vector<16x16xf32> to vector<1x16xf32>
    %c0_136 = arith.constant 0 : index
    %c144 = arith.constant 144 : index
    %685 = vector.load %arg6[%c0_136, %c144] : memref<1x256xf32, #tpu.memory_space<vmem>>, vector<1x16xf32>
    tpu.vector_store %arg6[%c0_136, %c144], %684 {strides = array<i32>} : memref<1x256xf32, #tpu.memory_space<vmem>>, vector<1x16xf32>,
    %686 = vector.extract_strided_slice %665 {offsets = [10, 0], sizes = [1, 16], strides = [1, 1]} : vector<16x16xf32> to vector<1x16xf32>
    %c0_137 = arith.constant 0 : index
    %c160 = arith.constant 160 : index
    %687 = vector.load %arg6[%c0_137, %c160] : memref<1x256xf32, #tpu.memory_space<vmem>>, vector<1x16xf32>
    tpu.vector_store %arg6[%c0_137, %c160], %686 {strides = array<i32>} : memref<1x256xf32, #tpu.memory_space<vmem>>, vector<1x16xf32>,
    %688 = vector.extract_strided_slice %665 {offsets = [11, 0], sizes = [1, 16], strides = [1, 1]} : vector<16x16xf32> to vector<1x16xf32>
    %c0_138 = arith.constant 0 : index
    %c176 = arith.constant 176 : index
    %689 = vector.load %arg6[%c0_138, %c176] : memref<1x256xf32, #tpu.memory_space<vmem>>, vector<1x16xf32>
    tpu.vector_store %arg6[%c0_138, %c176], %688 {strides = array<i32>} : memref<1x256xf32, #tpu.memory_space<vmem>>, vector<1x16xf32>,
    %690 = vector.extract_strided_slice %665 {offsets = [12, 0], sizes = [1, 16], strides = [1, 1]} : vector<16x16xf32> to vector<1x16xf32>
    %c0_139 = arith.constant 0 : index
    %c192 = arith.constant 192 : index
    %691 = vector.load %arg6[%c0_139, %c192] : memref<1x256xf32, #tpu.memory_space<vmem>>, vector<1x16xf32>
    tpu.vector_store %arg6[%c0_139, %c192], %690 {strides = array<i32>} : memref<1x256xf32, #tpu.memory_space<vmem>>, vector<1x16xf32>,
    %692 = vector.extract_strided_slice %665 {offsets = [13, 0], sizes = [1, 16], strides = [1, 1]} : vector<16x16xf32> to vector<1x16xf32>
    %c0_140 = arith.constant 0 : index
    %c208 = arith.constant 208 : index
    %693 = vector.load %arg6[%c0_140, %c208] : memref<1x256xf32, #tpu.memory_space<vmem>>, vector<1x16xf32>
    tpu.vector_store %arg6[%c0_140, %c208], %692 {strides = array<i32>} : memref<1x256xf32, #tpu.memory_space<vmem>>, vector<1x16xf32>,
    %694 = vector.extract_strided_slice %665 {offsets = [14, 0], sizes = [1, 16], strides = [1, 1]} : vector<16x16xf32> to vector<1x16xf32>
    %c0_141 = arith.constant 0 : index
    %c224 = arith.constant 224 : index
    %695 = vector.load %arg6[%c0_141, %c224] : memref<1x256xf32, #tpu.memory_space<vmem>>, vector<1x16xf32>
    tpu.vector_store %arg6[%c0_141, %c224], %694 {strides = array<i32>} : memref<1x256xf32, #tpu.memory_space<vmem>>, vector<1x16xf32>,
    %696 = vector.extract_strided_slice %665 {offsets = [15, 0], sizes = [1, 16], strides = [1, 1]} : vector<16x16xf32> to vector<1x16xf32>
    %c0_142 = arith.constant 0 : index
    %c240 = arith.constant 240 : index
    %697 = vector.load %arg6[%c0_142, %c240] : memref<1x256xf32, #tpu.memory_space<vmem>>, vector<1x16xf32>
    tpu.vector_store %arg6[%c0_142, %c240], %696 {strides = array<i32>} : memref<1x256xf32, #tpu.memory_space<vmem>>, vector<1x16xf32>,
    %c0_143 = arith.constant 0 : index
    %c0_144 = arith.constant 0 : index
    %698 = vector.load %arg6[%c0_143, %c0_144] : memref<1x256xf32, #tpu.memory_space<vmem>>, vector<1x256xf32>
    %699 = vector.broadcast %698 : vector<1x256xf32> to vector<4x256xf32>
    %700 = arith.mulf %1, %699 : vector<4x256xf32>
    %c0_145 = arith.constant 0 : index
    %c0_146 = arith.constant 0 : index
    %c0_147 = arith.constant 0 : index
    %701 = vector.load %arg4[%c0_145, %c0_146, %c0_147] : memref<1x4x256xf32, #tpu.memory_space<vmem>>, vector<1x4x256xf32>
    %702 = vector.shape_cast %701 : vector<1x4x256xf32> to vector<4x256xf32>
    %703 = vector.shape_cast %700 : vector<4x256xf32> to vector<1x4x256xf32>
    tpu.vector_store %arg4[%c0_145, %c0_146, %c0_147], %703 {strides = array<i32>} : memref<1x4x256xf32, #tpu.memory_space<vmem>>, vector<1x4x256xf32>,
    return
  }
  func.func @transform_0(%arg0: i32) -> (i32, i32, i32) {
    %c0_i32 = arith.constant 0 : i32
    %c0_i32_0 = arith.constant 0 : i32
    %c0_i32_1 = arith.constant 0 : i32
    return %arg0, %c0_i32, %c0_i32_0 : i32, i32, i32
  }
  func.func @transform_1(%arg0: i32) -> i32 {
    %c0_i32 = arith.constant 0 : i32
    %c0_i32_0 = arith.constant 0 : i32
    return %c0_i32 : i32
  }
  func.func @transform_2(%arg0: i32) -> i32 {
    %c0_i32 = arith.constant 0 : i32
    %c0_i32_0 = arith.constant 0 : i32
    return %c0_i32 : i32
  }
  func.func @transform_3(%arg0: i32) -> (i32, i32, i32) {
    %c0_i32 = arith.constant 0 : i32
    %c0_i32_0 = arith.constant 0 : i32
    %c0_i32_1 = arith.constant 0 : i32
    return %arg0, %c0_i32, %c0_i32_0 : i32, i32, i32
  }
}

</mosaic_0001>

<bundles_post_ra>
// kernel: tpu_custom_call.1
= control target key start
LH: loop header
LB: loop body
LE: loop exit
PB: predicated region body
PF: predicated region fallthrough
CT: control target
= control target key end

     0   :  { %s6198_s0 = inlined_call_operand.hbm [shape: f32[2,4,256], index: 0, kind: input, shape index: {}]   ;;  %s6199_s1 = inlined_call_operand.vmem [shape: f32[98], index: 1, kind: input, shape index: {}]   ;;  %s6200_s2 = inlined_call_operand.<no memory space> [shape: f32[1], index: 2, kind: input, shape index: {}]   ;;  %s6201_s3 = inlined_call_operand.hbm [shape: f32[2,4,256], index: 3, kind: output, shape index: {}]  }
   0x1   :  { %6327 = sst [smem:[#allocation157_spill]] %s6198_s0 }
   0x2   :  { %6328 = sst [smem:[#allocation158_spill]] %s6199_s1 }
   0x3   :  { %6329 = sst [smem:[#allocation159_spill]] %s6201_s3 }
   0x4   :  { %8 = sst [smem:[#allocation4]] %s6200_s2 }
   0x5   :  { %9 = vsyncpa [#allocation6], 0 }
   0x6   :  { %11 = vsyncpa [#allocation6 + $0x1], 0 }
   0x7   :  { %12 = vsyncpa [#allocation8], 0 }
   0x8   :  { %13 = vsyncpa [#allocation7], 0 }
   0x9   :  { %15 = vsyncpa [#allocation7 + $0x1], 0  ;;  %s3240_s14 = smov 0   ;;  %s3242_s15 = smov 0  }
   0xa   :  { %s3244_s16 = smov 0   ;;  %s3246_s17 = smov 0  }
   0xb LB: > { %6330 = sst [smem:[#allocation14_spill]] %s3177_s14  ;;  %s3261_s2 = sadd.s32 4294967295, %s3189_s17   ;;  %s3189_s17 = sphi %s3246_s17, %s6937_s17   ;;  %s3185_s16 = sphi %s3244_s16, %s6940_s16   ;;  %s3181_s15 = sphi %s3242_s15, %s6939_s15   ;;  %s3177_s14 = sphi %s3240_s14, %s6938_s14  }
   0xc   : > { %6331 = sst [smem:[#allocation15_spill]] %s3181_s15  ;;  %s2863_s18 = sadd.s32 4294967294, %s3189_s17  }
   0xd   : > { %6332 = sst [smem:[#allocation16_spill]] %s3185_s16  ;;  %p41_p0 = scmp.ne.s32.totalorder %s3181_s15, %s3177_s14 }
   0xe   : > { %6333 = sst [smem:[#allocation17_spill]] %s3189_s17  ;;  %p6202_p1 = scmp.eq.s32.totalorder %s3261_s2, 0 }
   0xf   : > { %6334 = sst [smem:[#allocation18_spill]] %s3261_s2  ;;  %p113_p3 = scmp.eq.s32.totalorder %s2863_s18, 1 }
  0x10   : > { %p3270_p4 = por %p6202_p1, %p41_p0  ;;  %p2864_p5 = scmp.ge.s32.totalorder %s3189_s17, 1 }
  0x11   : > { %p3275_p6 = por %p113_p3, %p41_p0  ;;  %p120_p7 = scmp.lt.s32.totalorder %s3189_s17, 3 }
  0x12   : > { %s6335_s19 = scalar_select %p3270_p4, 1, 0 }
  0x13   : > { %s6336_s20 = scalar_select %p3275_p6, 1, 0 }
  0x14   : > { %s6338_s1 = sld [smem:[#allocation158_spill]]  ;;  %p3283_p8 = pnand %p2864_p5, %p120_p7 }
  0x15   : > { %6337 = sst [smem:[#allocation19_spill]] %s6336_s20  ;;  %s3291_s25 = sadd.s32 1, %s3189_s17  }
  0x16   : > { %p2986_p10 = pneg %p3283_p8  ;;  %6340 = sst [smem:[#allocation20_spill]] %s3291_s25 }
  0x17   : > { %s25_s27 = ssub.s32 %s3189_s17, %s3291_s25  ;;  %s28_s29 = sadd.s32 1, %s3185_s16 }
  0x18   : > { %p3295_p11 = pnand %p2986_p10, %p6202_p1  ;;  %p3301_p12 = scmp.eq.s32.totalorder %s25_s27, 0 }
  0x19   : > { %p35_p13 = scmp.ne.s32.totalorder %s3185_s16, %s3181_s15 }
  0x1a   : > { %s133_s23 = sshll.u32 %s6338_s1, 4  ;;  %p3076_p3 = pneg %p3295_p11  ;;  %s134_s23 = int_to_ptr.vmem [resolvable:$true] %s133_s23 }
  0x1b   : > { %s3074_s30 = scalar_lea.vmem %s134_s23, 16  ;;  %p3082_p9 = scmp.lt.s32.totalorder %s134_s23, %s134_s23 }
  0x1c   : > { %p3075_p0 = scmp.ne.s32.totalorder %s134_s23, %s3074_s30  ;;  %p3083_p2 = scmp.lt.s32.totalorder %s3074_s30, %s3074_s30 }
  0x1e   : > { %p3077_p5 = pnand %p3076_p3, %p3075_p0  ;;  %p3084_p10 = por %p3083_p2, %p3082_p9 }
  0x20   : > { %p3078_p7 = pneg %p3077_p5 }
  0x22   : > { %p3085_p1 = pnand %p3084_p10, %p3078_p7 }
  0x24   : > { %3088 = shalt.err (!%p3085_p1)
}
  0x25   : > { %s3191_s4 = smov [#allocation9]   ;;  %p36_p2 = scmp.eq.s32.totalorder %s3189_s17, 0 }
  0x26   : > { %2989 = dma.vmem_to_smem (!%p3295_p11), %s134_s23, 16, %s3191_s4, [#allocation8]  }
  0x27   : > { %s3315_s5 = scalar_select %p3301_p12, %s3185_s16, %s28_s29  }
  0x28   : > { %p6344_p1 = scmp.eq.s32.totalorder %s3261_s2, 1  ;;  %p2999_p0 = scmp.lt.s32.totalorder %s3189_s17, 2 }
  0x29   : > { %6343 = sst [smem:[#allocation21_spill]] %s3315_s5  ;;  %s147_s7 = sand.u32 1, %s3185_s16  }
  0x2a   : > { %p3323_p9 = por %p6344_p1, %p35_p13  ;;  %p37_p3 = por %p36_p2, %p35_p13 }
  0x2b   : > { %s2867_s8 = sshll.u32 %s147_s7, 3  ;;  %s2976_s9 = sshll.u32 %s3189_s17, 7 }
  0x2c   : > { %s6345_s6 = scalar_select %p3323_p9, 1, 0 }
  0x2d   : > { %s6347_s0 = sld [smem:[#allocation157_spill]]  ;;  %s151_s13 = scalar_lea.vmem [#allocation5], %s2867_s8 }
  0x2e   : > { %6346 = sst [smem:[#allocation22_spill]] %s6345_s6  ;;  %s159_s18 = sshll.u32 %s151_s13, 4  ;;  %s3342_s18 = int_to_ptr.vmem [resolvable:$true] %s159_s18 }
  0x2f   : > { %p3338_p11 = pnand %p2999_p0, %p37_p3  ;;  %s148_s22 = scalar_lea.sflag [#allocation6], %s147_s7 }
  0x31   : > { %p3091_p13 = pneg %p3338_p11 }
  0x33   : > { %s3336_s12 = scalar_lea.hbm %s6347_s0, %s2976_s9  ;;  %s3094_s28 = scalar_lea.hbm %s6347_s0, 256 }
  0x34   : > { %s3089_s23 = scalar_lea.hbm %s3336_s12, 128  ;;  %p3095_p10 = scmp.lt.u32.totalorder %s3336_s12, %s6347_s0 }
  0x35   : > { %p3090_p12 = scmp.ne.s32.totalorder %s3336_s12, %s3089_s23  ;;  %p3096_p2 = scmp.lt.u32.totalorder %s3094_s28, %s3089_s23 }
  0x36   : > { %p3098_p0 = scmp.lt.u32.totalorder %s3089_s23, %s3336_s12 }
  0x37   : > { %p3092_p5 = pnand %p3091_p13, %p3090_p12  ;;  %p3097_p1 = por %p3096_p2, %p3095_p10 }
  0x39   : > { %p3093_p7 = pneg %p3092_p5  ;;  %p3099_p3 = por %p3098_p0, %p3097_p1 }
  0x3b   : > { %p3100_p6 = pnand %p3099_p3, %p3093_p7 }
  0x3d   : > { %3103 = shalt.err (!%p3100_p6)
}
  0x3e   : > { %s3104_s4 = scalar_lea.vmem %s3342_s18, 128  ;;  %s3192_s7 = smov [#allocation5]  }
  0x3f   : > { %p3105_p12 = scmp.ne.s32.totalorder %s3342_s18, %s3104_s4  ;;  %s3109_s8 = sshll.u32 %s3192_s7, 4  ;;  %s3110_s8 = int_to_ptr.vmem [resolvable:$false] %s3109_s8 }
  0x40   : > { %s3111_s9 = scalar_lea.vmem %s3110_s8, 256  ;;  %p3112_p4 = scmp.lt.s32.totalorder %s3342_s18, %s3110_s8 }
  0x41   : > { %p3107_p5 = pnand %p3105_p12, %p3091_p13  ;;  %p3113_p10 = scmp.lt.s32.totalorder %s3111_s9, %s3104_s4 }
  0x43   : > { %p3108_p9 = pneg %p3107_p5  ;;  %p3114_p2 = por %p3113_p10, %p3112_p4 }
  0x45   : > { %p3115_p1 = pnand %p3114_p2, %p3108_p9 }
  0x47   : > { %3118 = shalt.err (!%p3115_p1)
}
  0x48   : > { %2993 = dma.hbm_to_vmem [thread:$0]  (!%p3338_p11), %s3336_s12, 128, %s3342_s18, %s148_s22  }
  0x49   : > { %168 = sbr.rel (%p3283_p8) target bundleno = 1081 (0x439), region = 32 }
  0x50   : > { %s3372_s10 = sand.u32 1, %s3181_s15   ;;  %p6351_p4 = scmp.ne.s32.totalorder %s6335_s19, 0 }
  0x51   : > { %6349 = sst [smem:[#allocation23_spill]] %s3372_s10  ;;  %s6205_s11 = sshll.u32 %s3372_s10, 3 }
  0x52   : > { %s171_s13 = scalar_lea.sflag [#allocation6], %s3372_s10  ;;  %s3378_s23 = scalar_lea.vmem [#allocation5], %s6205_s11 }
  0x53   : > { %6350 = sst [smem:[#allocation24_spill]] %s3378_s23 }
  0x54   : > { %3164 = dma.done.wait (%p6351_p4), %s171_s13, 128  }
  0x55   : > { %3166 = vsyncadd (%p6351_p4), %s171_s13, 4294967168  ;;  %p6352_p6 = scmp.eq.s32.totalorder %s3261_s2, 0 }
  0x57   : > { %3168 = dma.done.wait (%p6352_p6), [#allocation8], 16   ;;  %p6353_p8 = pmov %p6352_p6 }
  0x59   : > { %3170 = vsyncadd (%p6353_p8), [#allocation8], 4294967280 }
  0x5a   : > { %183 = sfence }
  0x5b   : > { %v202_v0 = vld [vmem:[%s3378_s23] sm:$0xff]  ;;  %vm206_vm0 = vcmask 1043456   ;;  %vm239_vm1 = vcmask 179200   ;;  %v3193_v3 = vmov 0.0   ;;  %s3194_s19 = smov 115   ;;  %s3195_s24 = smov 3  }
  0x5c   : > { %v207_v1 = vsel %vm206_vm0, %v202_v0, -inf  ;;  %v221_v2 = vsel %vm206_vm0, %v202_v0, 0.0  ;;  %240 = vst.msk [vmem:[#allocation2] sm:$0xff] %vm239_vm1, %v3193_v3  ;;  %241 = vst.msk [vmem:[#allocation2 + $0x8] sm:$0xff] %vm239_vm1, %v3193_v3  ;;  %v204_v14 = vcombine.high %v202_v0, %v202_v0  ;;  %s3196_s12 = smov 99   ;;  %s3197_s18 = smov 83  }
  0x5d   : > { %244 = vst.msk [vmem:[#allocation2 + $0x18] sm:$0xff] %vm239_vm1, %v3193_v3  ;;  %245 = vst.msk [vmem:[#allocation2 + $0x20] sm:$0xff] %vm239_vm1, %v3193_v3  ;;  %v208_v4 = vrot.slane %v207_v1, 4  ;;  %v222_v5 = vrot.slane %v221_v2, 4  ;;  %s3198_s21 = smov 67   ;;  %s3199_s22 = smov 51  }
  0x5e   : > { %v228_v18 = vsel %vm206_vm0, %v204_v14, 0.0  ;;  %v214_v20 = vsel %vm206_vm0, %v204_v14, -inf  ;;  %s3200_s26 = smov 35   ;;  %s3201_s27 = smov 19   ;;  %vm242_vm2 = vcmask 177152   ;;  %vm251_vm3 = vcmask 147480  }
  0x5f   : > { %v209_v6 = vmax.f32 %v207_v1, %v208_v4  ;;  %v223_v7 = vadd.f32 %v222_v5, %v221_v2  ;;  %v229_v19 = vrot.slane %v228_v18, 4  ;;  %v215_v22 = vrot.slane %v214_v20, 4  ;;  %243 = vst.msk [vmem:[#allocation2 + $0x10] sm:$0x3f] %vm242_vm2, %v3193_v3  ;;  %246 = vst.msk [vmem:[#allocation2 + $0x28] sm:$0x3f] %vm242_vm2, %v3193_v3 }
  0x60   : > { %s3425_s28 = sld [smem:[#allocation9 + $0x2]]  ;;  %s3427_s29 = sld [smem:[#allocation9 + $0x1]]  ;;  %vm640_vm4 = vcmask 1041408   ;;  %vm689_vm5 = vcmask 1045504   ;;  %vm805_vm6 = vcmask 1040384   ;;  %vm499_vm7 = vcmask 1046528  }
  0x61   : > { %v210_v8 = vrot.slane %v209_v6, 2  ;;  %v224_v9 = vrot.slane %v223_v7, 2  ;;  %v230_v21 = vadd.f32 %v229_v19, %v228_v18  ;;  %v216_v24 = vmax.f32 %v214_v20, %v215_v22  ;;  %s2895_s30 = sld [smem:[#allocation9 + $0xa]]  ;;  %s2888_s4 = sld [smem:[#allocation9 + $0x9]] }
  0x62   : > { %s3431_s7 = sld [smem:[#allocation9 + $0x3]]  ;;  %s3435_s8 = sld [smem:[#allocation9 + $0x16]]  ;;  %vm475_vm8 = vcmask 1042432   ;;  %vm879_vm9 = vcmask 1044480  }
  0x63   : > { %v211_v10 = vmax.f32 %v209_v6, %v210_v8  ;;  %v225_v11 = vadd.f32 %v224_v9, %v223_v7  ;;  %v231_v23 = vrot.slane %v230_v21, 2  ;;  %v217_v26 = vrot.slane %v216_v24, 2  ;;  %s3437_s9 = sld [smem:[#allocation9 + $0xf]]  ;;  %s3441_s13 = sld [smem:[#allocation9 + $0x2b]] }
  0x64   : > { %s6208_s11 = smov 126   ;;  %s6212_s0 = smov 127  }
  0x65   : > { %v212_v12 = vrot.slane %v211_v10, 1  ;;  %v226_v13 = vrot.slane %v225_v11, 1  ;;  %v232_v25 = vadd.f32 %v231_v23, %v230_v21  ;;  %v218_v28 = vmax.f32 %v216_v24, %v217_v26  ;;  %s3500_s1 = sld [smem:[#allocation9 + $0x1f]]  ;;  %s3502_s5 = sld [smem:[#allocation9 + $0x26]] }
  0x66   : > { %6354 = sst [smem:[#allocation25_spill]] %s3425_s28  ;;  %v6236_v43 = vstv %s3425_s28  ;;  %v6237_v44 = vstv %s3427_s29  ;;  %s3504_s16 = sld [smem:[#allocation9 + $0x2d]] }
  0x67   : > { %v213_v15 = vmax.f32 %v211_v10, %v212_v12  ;;  %v227_v16 = vadd.f32 %v226_v13, %v225_v11  ;;  %v233_v27 = vrot.slane %v232_v25, 1  ;;  %v219_v30 = vrot.slane %v218_v28, 1  ;;  %6355 = sst [smem:[#allocation26_spill]] %s3427_s29  ;;  %s3506_s15 = sld [smem:[#allocation9 + $0x7]] }
  0x68   : > { %6356 = sst [smem:[#allocation27_spill]] %s3431_s7  ;;  %v3451_v48 = vstv %s2895_s30  ;;  %v3453_v49 = vstv %s2888_s4  ;;  %s3487_s30 = sld [smem:[#allocation9 + $0x11]]  ;;  %v6235_v58 = vstv %s3431_s7  ;;  %v3562_v3 = vstv %s3435_s8 }
  0x69   : > { %259 = vrot.lane.b32.xlu1 %v213_v15, %s3194_s19  ;;  %248 = vrot.lane.b32.xlu0 %v213_v15, %s3195_s24  ;;  %v237_v17 = vmul.f32 0.25, %v227_v16  ;;  %v234_v29 = vadd.f32 %v233_v27, %v232_v25  ;;  %v220_v32 = vmax.f32 %v218_v28, %v219_v30  ;;  %s3490_s4 = sld [smem:[#allocation9 + $0x18]]  ;;  %s3517_s25 = sld [smem:[#allocation9 + $0xe]]  ;;  %v3565_v4 = vstv %s3437_s9 }
  0x6a   : > { %s3521_s17 = sld [smem:[#allocation9 + $0x20]]  ;;  %s6224_s20 = smov 125   ;;  %v3568_v5 = vstv %s3441_s13 }
  0x6b   : > { %v238_v31 = vmul.f32 0.25, %v234_v29  ;;  %s6359_s14 = smov 126   ;;  %s3531_s3 = sld [smem:[#allocation9 + $0x27]]  ;;  %v3613_v18 = vstv %s3500_s1  ;;  %v3616_v19 = vstv %s3502_s5 }
  0x6c   : > { %s3533_s6 = sld [smem:[#allocation9]]  ;;  %s3535_s23 = sld [smem:[#allocation9 + $0x1c]]  ;;  %6365 = vst [vmem:[#allocation34_spill] sm:$0xff] %v3613_v18  ;;  %6366 = vst [vmem:[#allocation35_spill] sm:$0xff] %v3616_v19  ;;  %v3621_v20 = vstv %s3504_s16 }
  0x6d   : > { %263 = vrot.lane.b32.xlu1 %v237_v17, %s3194_s19  ;;  %267 = vrot.lane.b32.xlu0 %v213_v15, %s3196_s12  ;;  %s3537_s10 = sld [smem:[#allocation9 + $0x2e]]  ;;  %s3540_s2 = sld [smem:[#allocation9 + $0x5]]  ;;  %6369 = vst [vmem:[#allocation36_spill] sm:$0xff] %v3621_v20  ;;  %v3624_v21 = vstv %s3506_s15 }
  0x6e   : > { %s3546_s7 = sld [smem:[#allocation9 + $0x1a]]  ;;  %s6364_s28 = smov 125   ;;  %v3607_v16 = vstv %s3487_s30  ;;  %6370 = vst [vmem:[#allocation37_spill] sm:$0xff] %v3624_v21 }
  0x6f   : > { %s3553_s29 = sld [smem:[#allocation9 + $0x21]]  ;;  %s3586_s8 = sld [smem:[#allocation9 + $0x1b]]  ;;  %v3630_v23 = vstv %s3517_s25 }
  0x70   : > { %s3588_s9 = sld [smem:[#allocation9 + $0x22]]  ;;  %s3604_s13 = sld [smem:[#allocation9 + $0x29]]  ;;  %6372 = vst [vmem:[#allocation38_spill] sm:$0xff] %v3630_v23  ;;  %v3636_v27 = vstv %s3521_s17 }
  0x71   : > { %271 = vrot.lane.b32.xlu1 %v237_v17, %s3196_s12  ;;  %275 = vrot.lane.b32.xlu0 %v213_v15, %s3197_s18  ;;  %6374 = vst [vmem:[#allocation39_spill] sm:$0xff] %v3636_v27  ;;  %v3639_v28 = vstv %s3531_s3  ;;  %s6414_s1 = sld [smem:[#allocation25_spill]]  ;;  %s6415_s3 = smov 127  }
  0x72   : > { %6375 = vst [vmem:[#allocation40_spill] sm:$0xff] %v3639_v28  ;;  %v3645_v30 = vstv %s3535_s23  ;;  %s6418_s15 = sld [smem:[#allocation27_spill]]  ;;  %s6448_s16 = smov 126  }
  0x73   : > { %6360 = sst [smem:[#allocation30_spill]] %s3540_s2  ;;  %s3557_s2 = sld [smem:[#allocation9 + $0x2f]] }
  0x74   : > { %6363 = sst [smem:[#allocation33_spill]] %s3546_s7  ;;  %s3570_s7 = sld [smem:[#allocation9 + $0xd]] }
  0x75   : > { %279 = vrot.lane.b32.xlu1 %v237_v17, %s3197_s18  ;;  %283 = vrot.lane.b32.xlu0 %v213_v15, %s3198_s21  ;;  %s6456_s17 = smov 125   ;;  %s2903_s25 = sld [smem:[#allocation9 + $0x12]] }
  0x76   : > { %s2904_s5 = sld [smem:[#allocation9 + $0x19]]  ;;  %s2937_s30 = sld [smem:[#allocation9 + $0x3a]] }
  0x77   : > { %s2930_s23 = sld [smem:[#allocation9 + $0x39]] }
  0x79   : > { %287 = vrot.lane.b32.xlu1 %v237_v17, %s3198_s21  ;;  %254 = vrot.lane.b32.xlu0 %v237_v17, %s3195_s24 }
  0x7d   : > { %295 = vrot.lane.b32.xlu1 %v237_v17, %s3199_s22  ;;  %291 = vrot.lane.b32.xlu0 %v213_v15, %s3199_s22 }
  0x81   : > { %303 = vrot.lane.b32.xlu1 %v237_v17, %s3200_s26  ;;  %299 = vrot.lane.b32.xlu0 %v213_v15, %s3200_s26 }
  0x85   : > { %311 = vrot.lane.b32.xlu1 %v237_v17, %s3201_s27  ;;  %307 = vrot.lane.b32.xlu0 %v213_v15, %s3201_s27  ;;  %v3610_v17 = vstv %s3490_s4  ;;  %s2938_s4 = sld [smem:[#allocation9 + $0x41]] }
  0x89   : > { %321 = vrot.lane.b32.xlu1 %v238_v31, %s3195_s24  ;;  %316 = vrot.lane.b32.xlu0 %v220_v32, %s3195_s24  ;;  %s3445_s24 = sld [smem:[#allocation9 + $0x1e]] }
  0x8d   : > { %329 = vrot.lane.b32.xlu1 %v238_v31, %s3194_s19  ;;  %325 = vrot.lane.b32.xlu0 %v220_v32, %s3194_s19  ;;  %s3443_s19 = sld [smem:[#allocation9 + $0x1d]] }
  0x8f   : > { %v3578_v9 = vstv %s3445_s24  ;;  %s3618_s24 = sld [smem:[#allocation9 + $0x30]] }
  0x91   : > { %337 = vrot.lane.b32.xlu1 %v238_v31, %s3196_s12  ;;  %333 = vrot.lane.b32.xlu0 %v220_v32, %s3196_s12  ;;  %s3447_s12 = sld [smem:[#allocation9 + $0x17]] }
  0x93   : > { %v3575_v8 = vstv %s3443_s19  ;;  %s6367_s19 = sld [smem:[#allocation30_spill]] }
  0x95   : > { %345 = vrot.lane.b32.xlu1 %v238_v31, %s3197_s18  ;;  %341 = vrot.lane.b32.xlu0 %v220_v32, %s3197_s18  ;;  %s3455_s18 = sld [smem:[#allocation9 + $0x25]] }
  0x97   : > { %v3581_v10 = vstv %s3447_s12 }
  0x99   : > { %353 = vrot.lane.b32.xlu1 %v238_v31, %s3198_s21  ;;  %349 = vrot.lane.b32.xlu0 %v220_v32, %s3198_s21  ;;  %s3457_s21 = sld [smem:[#allocation9 + $0x8]] }
  0x9b   : > { %v3584_v11 = vstv %s3455_s18 }
  0x9d   : > { %357 = vrot.lane.b32.xlu0 %v220_v32, %s3199_s22  ;;  %361 = vrot.lane.b32.xlu1 %v238_v31, %s3199_s22  ;;  %s3471_s22 = sld [smem:[#allocation9 + $0x24]] }
  0x9f   : > { %v3593_v12 = vstv %s3457_s21  ;;  %s6373_s21 = sld [smem:[#allocation33_spill]] }
  0xa1   : > { %365 = vrot.lane.b32.xlu0 %v220_v32, %s3200_s26  ;;  %369 = vrot.lane.b32.xlu1 %v238_v31, %s3200_s26  ;;  %s3473_s26 = sld [smem:[#allocation9 + $0x10]] }
  0xa3   : > { %v3596_v13 = vstv %s3471_s22  ;;  %s2934_s22 = sld [smem:[#allocation9 + $0x55]] }
  0xa5   : > { %373 = vrot.lane.b32.xlu0 %v220_v32, %s3201_s27  ;;  %377 = vrot.lane.b32.xlu1 %v238_v31, %s3201_s27  ;;  %s3485_s27 = sld [smem:[#allocation9 + $0x2c]]  ;;  %v3648_v31 = vstv %s3537_s10  ;;  %s3207_s10 = smov 122  }
  0xa6   : > { %6376 = vst [vmem:[#allocation41_spill] sm:$0xff] %v3648_v31 }
  0xa7   : > { %v3599_v14 = vstv %s3473_s26  ;;  %s2935_s26 = sld [smem:[#allocation9 + $0x5c]] }
  0xab   : > { %v3602_v15 = vstv %s3485_s27  ;;  %s4959_s27 = sld [smem:[#allocation9 + $0x33]] }
  0xdb   : > { %v260_v33 = vpop.permute.xlu1 %259  ;;  %v249_v34 = vpop.permute.xlu0 %248 }
  0xdc   : > { %262 = vst.msk [vmem:[#allocation2 + $0x4] sm:$0x1] %vm251_vm3, %v260_v33  ;;  %252 = vst.msk [vmem:[#allocation2 + $0x3] sm:$0x1] %vm251_vm3, %v249_v34 }
  0xdf   : > { %v264_v35 = vpop.permute.xlu1 %263  ;;  %v268_v36 = vpop.permute.xlu0 %267 }
  0xe0   : > { %266 = vst.msk [vmem:[#allocation2 + $0x1c] sm:$0x1] %vm251_vm3, %v264_v35  ;;  %270 = vst.msk [vmem:[#allocation2 + $0x5] sm:$0x1] %vm251_vm3, %v268_v36 }
  0xe3   : > { %v272_v37 = vpop.permute.xlu1 %271  ;;  %v276_v38 = vpop.permute.xlu0 %275 }
  0xe4   : > { %274 = vst.msk [vmem:[#allocation2 + $0x1d] sm:$0x1] %vm251_vm3, %v272_v37  ;;  %278 = vst.msk [vmem:[#allocation2 + $0x6] sm:$0x1] %vm251_vm3, %v276_v38  ;;  %v3666_v37 = vstv %s6373_s21  ;;  %v3669_v38 = vstv %s3553_s29  ;;  %s2933_s29 = sld [smem:[#allocation9 + $0x4e]] }
  0xe5   : > { %6379 = vst [vmem:[#allocation44_spill] sm:$0xff] %v3666_v37  ;;  %6380 = vst [vmem:[#allocation45_spill] sm:$0xff] %v3669_v38  ;;  %s2941_s21 = sld [smem:[#allocation9 + $0x56]] }
  0xe7   : > { %v280_v39 = vpop.permute.xlu1 %279  ;;  %v284_v40 = vpop.permute.xlu0 %283 }
  0xe8   : > { %282 = vst.msk [vmem:[#allocation2 + $0x1e] sm:$0x1] %vm251_vm3, %v280_v39  ;;  %286 = vst.msk [vmem:[#allocation2 + $0x7] sm:$0x1] %vm251_vm3, %v284_v40  ;;  %v3675_v40 = vstv %s3557_s2  ;;  %s2902_s2 = sld [smem:[#allocation9 + $0xb]] }
  0xe9   : > { %6382 = vst [vmem:[#allocation47_spill] sm:$0xff] %v3675_v40 }
  0xeb   : > { %v288_v41 = vpop.permute.xlu1 %287  ;;  %v255_v42 = vpop.permute.xlu0 %254 }
  0xec   : > { %290 = vst.msk [vmem:[#allocation2 + $0x1f] sm:$0x1] %vm251_vm3, %v288_v41  ;;  %258 = vst.msk [vmem:[#allocation2 + $0x1b] sm:$0x1] %vm251_vm3, %v255_v42 }
  0xef   : > { %v3449_v45 = vld [vmem:[#allocation2] sm:$0xff]  ;;  %v296_v46 = vpop.permute.xlu1 %295  ;;  %v292_v47 = vpop.permute.xlu0 %291 }
  0xf0   : > { %6357 = vst [vmem:[#allocation28_spill] sm:$0xff] %v3449_v45  ;;  %298 = vst.msk [vmem:[#allocation2 + $0x20] sm:$0x1] %vm251_vm3, %v296_v46  ;;  %v3464_v50 = vmul.f32 %v6236_v43, %v3449_v45  ;;  %v3469_v51 = vmul.f32 %v6237_v44, %v3449_v45  ;;  %v3479_v54 = vmul.f32 %v3451_v48, %v3449_v45  ;;  %v6392_v44 = vstv %s3533_s6 }
  0xf1   : > { %294 = vst.msk [vmem:[#allocation2 + $0x8] sm:$0x1] %vm251_vm3, %v292_v47  ;;  %v3483_v55 = vmul.f32 %v3453_v49, %v3449_v45  ;;  %v3513_v61 = vmul.f32 %v6235_v58, %v3449_v45  ;;  %v3656_v34 = vmul.f32 %v3593_v12, %v3449_v45  ;;  %v3660_v35 = vmul.f32 %v3562_v3, %v3449_v45 }
  0xf2   : > { %v6231_v52 = vrot.slane %v3464_v50, 6  ;;  %v6232_v53 = vrot.slane %v3469_v51, 5  ;;  %v6233_v59 = vrot.slane %v3479_v54, 7  ;;  %v3679_v47 = vstv %s3570_s7  ;;  %s2932_s7 = sld [smem:[#allocation9 + $0x47]] }
  0xf3   : > { %v304_v56 = vpop.permute.xlu1 %303  ;;  %v300_v57 = vpop.permute.xlu0 %299  ;;  %v6234_v60 = vrot.slane %v3483_v55, 6  ;;  %6358 = vst [vmem:[#allocation29_spill] sm:$0xff] %v3513_v61  ;;  %v6230_v0 = vrot.slane %v3513_v61, 7  ;;  %6383 = vst [vmem:[#allocation48_spill] sm:$0xff] %v3679_v47  ;;  %v3742_v58 = vmul.f32 %v3616_v19, %v3449_v45  ;;  %v3746_v43 = vmul.f32 %v3621_v20, %v3449_v45 }
  0xf4   : > { %306 = vst.msk [vmem:[#allocation2 + $0x21] sm:$0x1] %vm251_vm3, %v304_v56  ;;  %302 = vst.msk [vmem:[#allocation2 + $0x9] sm:$0x1] %vm251_vm3, %v300_v57  ;;  %644 = vrot.lane.b32.xlu1 %v6231_v52, %s6208_s11  ;;  %479 = vrot.lane.b32.xlu0 %v6232_v53, %s6212_s0  ;;  %s3515_s11 = sld [smem:[#allocation9 + $0x23]]  ;;  %s3519_s0 = sld [smem:[#allocation9 + $0x2a]]  ;;  %v3685_v57 = vstv %s3586_s8  ;;  %v3726_v52 = vmul.f32 %v3602_v15, %v3449_v45  ;;  %v3755_v29 = vmul.f32 %v3599_v14, %v3449_v45 }
  0xf5   : > { %6385 = vst [vmem:[#allocation50_spill] sm:$0xff] %v3685_v57  ;;  %v3760_v20 = vmul.f32 %v3636_v27, %v3449_v45  ;;  %v3783_v41 = vmul.f32 %v6392_v44, %v3449_v45  ;;  %v3787_v61 = vmul.f32 %v3645_v30, %v3449_v45  ;;  %v3791_v19 = vmul.f32 %v3630_v23, %v3449_v45  ;;  %s2939_s8 = sld [smem:[#allocation9 + $0x48]] }
  0xf6   : > { %6389 = vst [vmem:[#allocation54_spill] sm:$0xff] %v3755_v29  ;;  %v3807_v32 = vmul.f32 %v3624_v21, %v3449_v45 }
  0xf7   : > { %v312_v62 = vpop.permute.xlu1 %311  ;;  %v308_v63 = vpop.permute.xlu0 %307  ;;  %6393 = vst [vmem:[#allocation57_spill] sm:$0xff] %v3783_v41  ;;  %6394 = vst [vmem:[#allocation58_spill] sm:$0xff] %v3787_v61 }
  0xf8   : > { %314 = vst.msk [vmem:[#allocation2 + $0x22] sm:$0x1] %vm251_vm3, %v312_v62  ;;  %310 = vst.msk [vmem:[#allocation2 + $0xa] sm:$0x1] %vm251_vm3, %v308_v63  ;;  %834 = vrot.lane.b32.xlu1 %v6233_v59, %s6224_s20  ;;  %669 = vrot.lane.b32.xlu0 %v6234_v60, %s6359_s14  ;;  %s3542_s20 = sld [smem:[#allocation9 + $0xc]]  ;;  %s3544_s14 = sld [smem:[#allocation9 + $0x13]]  ;;  %v3688_v62 = vstv %s3588_s9  ;;  %v3694_v63 = vmul.f32 %v3565_v4, %v3449_v45  ;;  %v3734_v59 = vmul.f32 %v3610_v17, %v3449_v45 }
  0xf9   : > { %6386 = vst [vmem:[#allocation51_spill] sm:$0xff] %v3688_v62  ;;  %v3738_v60 = vmul.f32 %v3613_v18, %v3449_v45  ;;  %6395 = vst [vmem:[#allocation59_spill] sm:$0xff] %v3791_v19  ;;  %s2940_s9 = sld [smem:[#allocation9 + $0x4f]] }
  0xfa   : > { %v3627_v22 = vstv %s3515_s11  ;;  %v3633_v26 = vstv %s3519_s0  ;;  %s6397_s0 = sld [smem:[#allocation26_spill]]  ;;  %6400 = vst [vmem:[#allocation62_spill] sm:$0xff] %v3807_v32  ;;  %v3825_v32 = vmul.f32 %v3666_v37, %v3449_v45  ;;  %s2929_s11 = sld [smem:[#allocation9 + $0x32]] }
  0xfb   : > { %v322_v1 = vpop.permute.xlu1 %321  ;;  %v317_v2 = vpop.permute.xlu0 %316  ;;  %v3795_v18 = vmul.f32 %v3633_v26, %v3449_v45  ;;  %v3811_v23 = vmul.f32 %v3627_v22, %v3449_v45 }
  0xfc   : > { %324 = vst.msk [vmem:[#allocation2 + $0x23] sm:$0x1] %vm251_vm3, %v322_v1  ;;  %319 = vst.msk [vmem:[#allocation2 + $0xb] sm:$0x1] %vm251_vm3, %v317_v2  ;;  %809 = vrot.lane.b32.xlu0 %v6230_v0, %s6364_s28  ;;  %s3572_s28 = sld [smem:[#allocation9 + $0x14]]  ;;  %v3698_v1 = vmul.f32 %v3596_v13, %v3449_v45  ;;  %v3702_v2 = vmul.f32 %v3575_v8, %v3449_v45  ;;  %v3722_v0 = vmul.f32 %v3584_v11, %v3449_v45 }
  0xfd   : > { %6396 = vst [vmem:[#allocation60_spill] sm:$0xff] %v3795_v18  ;;  %6401 = vst [vmem:[#allocation63_spill] sm:$0xff] %v3811_v23 }
  0xfe   : > { %6361 = sst [smem:[#allocation31_spill]] %s3542_s20  ;;  %s3555_s20 = sld [smem:[#allocation9 + $0x28]]  ;;  %6404 = vst [vmem:[#allocation66_spill] sm:$0xff] %v3825_v32 }
  0xff   : > { %6362 = sst [smem:[#allocation32_spill]] %s3544_s14  ;;  %s3559_s14 = sld [smem:[#allocation9 + $0x6]]  ;;  %v330_v6 = vpop.permute.xlu1 %329  ;;  %v326_v7 = vpop.permute.xlu0 %325 }
 0x100   : > { %332 = vst.msk [vmem:[#allocation2 + $0x24] sm:$0x1] %vm251_vm3, %v330_v6  ;;  %328 = vst.msk [vmem:[#allocation2 + $0xc] sm:$0x1] %vm251_vm3, %v326_v7  ;;  %s6368_s12 = sld [smem:[#allocation31_spill]]  ;;  %s6371_s18 = sld [smem:[#allocation32_spill]]  ;;  %v3705_v6 = vstv %s3604_s13  ;;  %v6408_v41 = vstv %s6397_s0 }
 0x101   : > { %6387 = vst [vmem:[#allocation52_spill] sm:$0xff] %v3705_v6  ;;  %s2944_s13 = sld [smem:[#allocation9 + $0x3b]] }
 0x102   : > { %v3682_v56 = vstv %s3572_s28  ;;  %s2931_s28 = sld [smem:[#allocation9 + $0x40]]  ;;  %s2952_s0 = sld [smem:[#allocation9 + $0x43]] }
 0x103   : > { %v338_v24 = vpop.permute.xlu1 %337  ;;  %v334_v25 = vpop.permute.xlu0 %333  ;;  %6384 = vst [vmem:[#allocation49_spill] sm:$0xff] %v3682_v56 }
 0x104   : > { %340 = vst.msk [vmem:[#allocation2 + $0x25] sm:$0x1] %vm251_vm3, %v338_v24  ;;  %336 = vst.msk [vmem:[#allocation2 + $0xd] sm:$0x1] %vm251_vm3, %v334_v25  ;;  %v3672_v39 = vstv %s3555_s20  ;;  %v3711_v25 = vmul.f32 %v3568_v5, %v3449_v45  ;;  %v3730_v24 = vmul.f32 %v3607_v16, %v3449_v45  ;;  %s3205_s20 = smov 124  }
 0x105   : > { %6381 = vst [vmem:[#allocation46_spill] sm:$0xff] %v3672_v39  ;;  %v6409_v37 = vstv %s3559_s14 }
 0x106   : > { %v3652_v33 = vstv %s6368_s12  ;;  %v3663_v36 = vstv %s6371_s18  ;;  %s2943_s12 = sld [smem:[#allocation9 + $0x34]]  ;;  %s2946_s18 = sld [smem:[#allocation9 + $0x49]] }
 0x107   : > { %6377 = vst [vmem:[#allocation42_spill] sm:$0xff] %v3652_v33  ;;  %6378 = vst [vmem:[#allocation43_spill] sm:$0xff] %v3663_v36  ;;  %v346_v42 = vpop.permute.xlu1 %345  ;;  %v342_v46 = vpop.permute.xlu0 %341  ;;  %v3819_v44 = vmul.f32 %v3663_v36, %v3449_v45  ;;  %v3837_v36 = vmul.f32 %v3675_v40, %v3449_v45  ;;  %v3854_v40 = vmul.f32 %v3679_v47, %v3449_v45 }
 0x108   : > { %348 = vst.msk [vmem:[#allocation2 + $0x26] sm:$0x1] %vm251_vm3, %v346_v42  ;;  %344 = vst.msk [vmem:[#allocation2 + $0xe] sm:$0x1] %vm251_vm3, %v342_v46  ;;  %v3714_v42 = vstv %s3618_s24  ;;  %v3718_v46 = vmul.f32 %v3578_v9, %v3449_v45  ;;  %s2948_s24 = sld [smem:[#allocation9 + $0x57]] }
 0x109   : > { %6388 = vst [vmem:[#allocation53_spill] sm:$0xff] %v3714_v42  ;;  %6403 = vst [vmem:[#allocation65_spill] sm:$0xff] %v3819_v44  ;;  %v6427_v44 = vrot.slane %v3722_v0, 2 }
 0x10a   : > { %6407 = vst [vmem:[#allocation69_spill] sm:$0xff] %v3837_v36  ;;  %6411 = vst [vmem:[#allocation71_spill] sm:$0xff] %v3854_v40 }
 0x10b   : > { %v354_v7 = vpop.permute.xlu1 %353  ;;  %v350_v53 = vpop.permute.xlu0 %349 }
 0x10c   : > { %356 = vst.msk [vmem:[#allocation2 + $0x27] sm:$0x1] %vm251_vm3, %v354_v7  ;;  %352 = vst.msk [vmem:[#allocation2 + $0xf] sm:$0x1] %vm251_vm3, %v350_v53  ;;  %v3764_v53 = vmul.f32 %v3639_v28, %v3449_v45  ;;  %v3768_v7 = vmul.f32 %v3648_v31, %v3449_v45  ;;  %v6398_v31 = vstv %s6367_s19 }
 0x10d   : > { %v3803_v28 = vmul.f32 %v6398_v31, %v3449_v45 }
 0x10e   : > { %6390 = vst [vmem:[#allocation55_spill] sm:$0xff] %v3764_v53  ;;  %6391 = vst [vmem:[#allocation56_spill] sm:$0xff] %v3768_v7  ;;  %v3829_v7 = vmul.f32 %v3669_v38, %v3449_v45  ;;  %v3881_v53 = vmul.f32 %v3688_v62, %v3449_v45 }
 0x10f   : > { %v358_v29 = vpop.permute.xlu0 %357  ;;  %v362_v27 = vpop.permute.xlu1 %361  ;;  %6399 = vst [vmem:[#allocation61_spill] sm:$0xff] %v3803_v28  ;;  %v3885_v28 = vmul.f32 %v3705_v6, %v3449_v45 }
 0x110   : > { %360 = vst.msk [vmem:[#allocation2 + $0x10] sm:$0x1] %vm251_vm3, %v358_v29  ;;  %364 = vst.msk [vmem:[#allocation2 + $0x28] sm:$0x1] %vm251_vm3, %v362_v27  ;;  %v3815_v29 = vmul.f32 %v3652_v33, %v3449_v45  ;;  %v3833_v33 = vmul.f32 %v3672_v39, %v3449_v45  ;;  %v3850_v39 = vmul.f32 %v6409_v37, %v3449_v45 }
 0x111   : > { %6405 = vst [vmem:[#allocation67_spill] sm:$0xff] %v3829_v7  ;;  %v6421_v7 = vstv %s6418_s15  ;;  %s2945_s15 = sld [smem:[#allocation9 + $0x42]] }
 0x112   : > { %6402 = vst [vmem:[#allocation64_spill] sm:$0xff] %v3815_v29  ;;  %6406 = vst [vmem:[#allocation68_spill] sm:$0xff] %v3833_v33  ;;  %v6422_v29 = vrot.slane %v3483_v55, 6  ;;  %v6429_v55 = vrot.slane %v3726_v52, 6 }
 0x113   : > { %v3821_v27 = vld [vmem:[#allocation2 + $0x8] sm:$0xff]  ;;  %v366_v31 = vpop.permute.xlu0 %365  ;;  %v370_v19 = vpop.permute.xlu1 %369  ;;  %6410 = vst [vmem:[#allocation70_spill] sm:$0xff] %v3850_v39 }
 0x114   : > { %368 = vst.msk [vmem:[#allocation2 + $0x11] sm:$0x1] %vm251_vm3, %v366_v31  ;;  %v3843_v21 = vmul.f32 %v6408_v41, %v3821_v27  ;;  %372 = vst.msk [vmem:[#allocation2 + $0x29] sm:$0x1] %vm251_vm3, %v370_v19  ;;  %v3860_v41 = vmul.f32 %v3682_v56, %v3449_v45  ;;  %v3864_v19 = vmul.f32 %v3685_v57, %v3449_v45 }
 0x115   : > { %v3900_v47 = vmul.f32 %v3593_v12, %v3821_v27  ;;  %v3904_v61 = vmul.f32 %v3565_v4, %v3821_v27  ;;  %v3916_v56 = vmul.f32 %v3578_v9, %v3821_v27  ;;  %v3920_v37 = vmul.f32 %v3584_v11, %v3821_v27 }
 0x116   : > { %6412 = vst [vmem:[#allocation72_spill] sm:$0xff] %v3860_v41  ;;  %6413 = vst [vmem:[#allocation73_spill] sm:$0xff] %v3864_v19  ;;  %v477_v38 = vrot.slane %v3843_v21, 5  ;;  %v3896_v21 = vmul.f32 %v3714_v42, %v3449_v45  ;;  %v3924_v45 = vmul.f32 %v3602_v15, %v3821_v27  ;;  %v3932_v42 = vmul.f32 %v3575_v8, %v3821_v27 }
 0x117   : > { %v374_v31 = vpop.permute.xlu0 %373  ;;  %v378_v18 = vpop.permute.xlu1 %377  ;;  %6419 = vst [vmem:[#allocation75_spill] sm:$0xff] %v3916_v56  ;;  %6420 = vst [vmem:[#allocation76_spill] sm:$0xff] %v3920_v37  ;;  %v3936_v19 = vmul.f32 %v3596_v13, %v3821_v27  ;;  %v3940_v6 = vmul.f32 %v3568_v5, %v3821_v27  ;;  %v3951_v32 = vmul.f32 %v6421_v7, %v3821_v27  ;;  %v6426_v7 = vrot.slane %v3920_v37, 2 }
 0x118   : > { %376 = vst.msk [vmem:[#allocation2 + $0x12] sm:$0x1] %vm251_vm3, %v374_v31  ;;  %483 = vrot.lane.b32.xlu0 %v477_v38, %s6415_s3  ;;  %380 = vst.msk [vmem:[#allocation2 + $0x2a] sm:$0x1] %vm251_vm3, %v378_v18  ;;  %v6416_v31 = vstv %s6414_s1  ;;  %v3912_v18 = vmul.f32 %v3453_v49, %v3821_v27  ;;  %v787_v39 = vrot.slane %v3924_v45, 6  ;;  %v6423_v45 = vrot.slane %v3916_v56, 2 }
 0x119   : > { %v3890_v57 = vmul.f32 %v6416_v31, %v3821_v27  ;;  %6417 = vst [vmem:[#allocation74_spill] sm:$0xff] %v3896_v21  ;;  %v3908_v31 = vmul.f32 %v3562_v3, %v3821_v27  ;;  %v3928_v21 = vmul.f32 %v3451_v48, %v3821_v27  ;;  %v3975_v23 = vsel %vm689_vm5, %v6427_v44, %v6426_v7  ;;  %s2947_s1 = sld [smem:[#allocation9 + $0x50]] }
 0x11a   : > { %v6299_v62 = vrot.slane %v3912_v18, 6  ;;  %6428 = vst [vmem:[#allocation78_spill] sm:$0xff] %v3975_v23 }
 0x11b   : > { %v830_v36 = vrot.slane %v3928_v21, 7  ;;  %v642_v33 = vrot.slane %v3890_v57, 6  ;;  %v6424_v21 = vrot.slane %v3718_v46, 2 }
 0x11c   : > { %v3959_v41 = vsel %vm640_vm4, %v6422_v29, %v6299_v62  ;;  %v3980_v29 = vsel %vm640_vm4, %v6429_v55, %v787_v39  ;;  %v6431_v62 = vrot.slane %v3479_v54, 7  ;;  %v6435_v54 = vrot.slane %v3656_v34, 1 }
 0x11d   : > { %v3968_v57 = vsel %vm689_vm5, %v6424_v21, %v6423_v45  ;;  %6430 = vst [vmem:[#allocation79_spill] sm:$0xff] %v3980_v29  ;;  %v6433_v45 = vrot.slane %v3469_v51, 5 }
 0x11e   : > { %6425 = vst [vmem:[#allocation77_spill] sm:$0xff] %v3968_v57  ;;  %v3985_v56 = vsel %vm805_vm6, %v6431_v62, %v830_v36  ;;  %v6434_v62 = vrot.slane %v3900_v47, 1  ;;  %v6447_v57 = vld [vmem:[#allocation34_spill] sm:$0xff] }
 0x11f   : > { %v3961_v40 = vld [vmem:[#allocation2 + $0x10] sm:$0x3f]  ;;  %6432 = vst [vmem:[#allocation80_spill] sm:$0xff] %v3985_v56  ;;  %v4014_v21 = vsel %vm475_vm8, %v6433_v45, %v477_v38  ;;  %v6438_v38 = vrot.slane %v3660_v35, 1 }
 0x120   : > { %v3989_v46 = vmul.f32 %v3562_v3, %v3961_v40  ;;  %v3993_v0 = vmul.f32 %v3565_v4, %v3961_v40  ;;  %v4005_v4 = vmul.f32 %v3568_v5, %v3961_v40  ;;  %v4009_v55 = vmul.f32 %v3575_v8, %v3961_v40 }
 0x121   : > { %v4021_v44 = vsel %vm499_vm7, %v6435_v54, %v6434_v62  ;;  %v6436_v5 = vrot.slane %v3464_v50, 6  ;;  %v4037_v51 = vmul.f32 %v3578_v9, %v3961_v40  ;;  %v6437_v50 = vrot.slane %v3908_v31, 1 }
 0x122   : > { %v6301_v7 = vrot.slane %v3989_v46, 1  ;;  %v6302_v3 = vrot.slane %v3993_v0, 1  ;;  %v6439_v54 = vrot.slane %v3904_v61, 1  ;;  %v6440_v62 = vrot.slane %v3694_v63, 1 }
 0x123   : > { %v4026_v52 = vsel %vm640_vm4, %v6436_v5, %v642_v33  ;;  %v4045_v45 = vsel %vm499_vm7, %v6438_v38, %v6437_v50  ;;  %v4056_v9 = vmul.f32 %v3581_v10, %v3961_v40  ;;  %v6441_v8 = vrot.slane %v3936_v19, 5 }
 0x124   : > { %555 = vrot.lane.b32.xlu0 %v6301_v7, %s6415_s3  ;;  %530 = vrot.lane.b32.xlu1 %v6302_v3, %s6415_s3  ;;  %v4052_v5 = vsel %vm499_vm7, %v6440_v62, %v6439_v54  ;;  %v6442_v7 = vrot.slane %v3698_v1, 5  ;;  %v6443_v50 = vrot.slane %v3932_v42, 1  ;;  %v6444_v38 = vrot.slane %v3702_v2, 1 }
 0x125   : > { %v4074_v54 = vmul.f32 %v3599_v14, %v3821_v27  ;;  %v6303_v62 = vrot.slane %v4005_v4, 5  ;;  %v574_v3 = vrot.slane %v4009_v55, 1  ;;  %v6445_v1 = vrot.slane %v3940_v6, 5 }
 0x126   : > { %v4063_v35 = vsel %vm475_vm8, %v6442_v7, %v6441_v8  ;;  %v4070_v63 = vsel %vm499_vm7, %v6444_v38, %v6443_v50  ;;  %v6446_v7 = vrot.slane %v3711_v25, 5  ;;  %v4087_v2 = vmul.f32 %v3581_v10, %v3821_v27 }
 0x127   : > { %v4091_v50 = vmul.f32 %v3584_v11, %v3961_v40  ;;  %v495_v38 = vmul.f32 %v3593_v12, %v3961_v40  ;;  %v782_v55 = vmul.f32 %v3602_v15, %v3961_v40  ;;  %v825_v25 = vmul.f32 %v3451_v48, %v3961_v40 }
 0x128   : > { %v4083_v8 = vsel %vm475_vm8, %v6446_v7, %v6445_v1  ;;  %626 = vrot.lane.b32.xlu0 %v6303_v62, %s6415_s3  ;;  %580 = vrot.lane.b32.xlu1 %v574_v3, %s6415_s3  ;;  %v849_v11 = vmul.f32 %v3607_v16, %v3821_v27  ;;  %v850_v12 = vmul.f32 %v3607_v16, %v3961_v40 }
 0x129   : > { %v874_v15 = vmul.f32 %v3610_v17, %v3821_v27  ;;  %v592_v48 = vmul.f32 %v3596_v13, %v3961_v40  ;;  %v789_v34 = vrot.slane %v782_v55, 6  ;;  %v832_v62 = vrot.slane %v825_v25, 7 }
 0x12a   : > { %v660_v56 = vmul.f32 %v3453_v49, %v3961_v40  ;;  %v855_v1 = vrot.slane %v849_v11, 7  ;;  %v857_v29 = vrot.slane %v850_v12, 7  ;;  %v875_v23 = vmul.f32 %v3610_v17, %v3961_v40 }
 0x12b   : > { %v4118_v16 = vsel %vm640_vm4, %v787_v39, %v789_v34  ;;  %v4121_v37 = vsel %vm805_vm6, %v830_v36, %v832_v62  ;;  %v881_v7 = vrot.slane %v874_v15, 3  ;;  %v896_v13 = vmul.f32 %v6447_v57, %v3821_v27 }
 0x12c   : > { %v6449_v55 = vrot.slane %v4037_v51, 2  ;;  %648 = vrot.lane.b32.xlu1 %v642_v33, %s6448_s16  ;;  %v4130_v49 = vsel %vm805_vm6, %v855_v1, %v857_v29  ;;  %v6450_v17 = vrot.slane %v3730_v24, 7  ;;  %v883_v36 = vrot.slane %v875_v23, 3  ;;  %v6452_v33 = vld [vmem:[#allocation35_spill] sm:$0xff] }
 0x12d   : > { %v4139_v34 = vmul.f32 %v6447_v57, %v3961_v40  ;;  %v6451_v62 = vrot.slane %v3734_v59, 3  ;;  %v902_v11 = vrot.slane %v896_v13, 3  ;;  %v921_v29 = vmul.f32 %v6452_v33, %v3821_v27  ;;  %v6453_v57 = vld [vmem:[#allocation36_spill] sm:$0xff] }
 0x12e   : > { %745 = vrot.lane.b32.xlu0 %v6449_v55, %s6448_s16  ;;  %v4135_v39 = vsel %vm805_vm6, %v6450_v17, %v855_v1  ;;  %v4150_v12 = vmul.f32 %v6452_v33, %v3961_v40  ;;  %v4153_v1 = vsel %vm879_vm9, %v881_v7, %v883_v36  ;;  %v946_v15 = vmul.f32 %v6453_v57, %v3821_v27 }
 0x12f   : > { %v4144_v25 = vsel %vm879_vm9, %v6451_v62, %v881_v7  ;;  %v6305_v23 = vrot.slane %v4139_v34, 3  ;;  %v4160_v59 = vmul.f32 %v6453_v57, %v3961_v40  ;;  %v503_v13 = vrot.slane %v495_v38, 1 }
 0x130   : > { %v6454_v55 = vrot.slane %v3738_v60, 3  ;;  %v927_v62 = vrot.slane %v921_v29, 3  ;;  %v6457_v7 = vrot.slane %v3951_v32, 7  ;;  %v6458_v36 = vrot.slane %v4056_v9, 2 }
 0x131   : > { %v4178_v60 = vsel %vm879_vm9, %v902_v11, %v6305_v23  ;;  %v952_v38 = vrot.slane %v946_v15, 3  ;;  %v6306_v29 = vrot.slane %v4160_v59, 3  ;;  %v4183_v33 = vmul.f32 %v3599_v14, %v3961_v40 }
 0x132   : > { %v4165_v17 = vsel %vm879_vm9, %v6454_v55, %v902_v11  ;;  %813 = vrot.lane.b32.xlu0 %v6457_v7, %s6456_s17  ;;  %720 = vrot.lane.b32.xlu1 %v6458_v36, %s6448_s16  ;;  %v599_v55 = vrot.slane %v592_v48, 5  ;;  %v6459_v7 = vrot.slane %v3742_v58, 3  ;;  %v6460_v36 = vrot.slane %v4150_v12, 3 }
 0x133   : > { %6455 = vst [vmem:[#allocation34_spill] sm:$0xff] %v4165_v17  ;;  %v6461_v11 = vrot.slane %v3993_v0, 1  ;;  %v6462_v15 = vrot.slane %v3904_v61, 1  ;;  %v667_v23 = vrot.slane %v660_v56, 6  ;;  %v4203_v14 = vsel %vm879_vm9, %v952_v38, %v6306_v29 }
 0x134   : > { %v4188_v17 = vsel %vm879_vm9, %v6459_v7, %v927_v62  ;;  %v4193_v57 = vsel %vm879_vm9, %v927_v62, %v6460_v36  ;;  %v6463_v58 = vrot.slane %v3746_v43, 3  ;;  %v6464_v62 = vrot.slane %v3900_v47, 1 }
 0x135   : > { %v525_v48 = vsel %vm499_vm7, %v6462_v15, %v6461_v11  ;;  %v6465_v0 = vrot.slane %v3932_v42, 1  ;;  %v4218_v56 = vmul.f32 %v3627_v22, %v3961_v40  ;;  %v4222_v11 = vmul.f32 %v3633_v26, %v3961_v40 }
 0x136   : > { %v4208_v7 = vsel %vm879_vm9, %v6463_v58, %v952_v38  ;;  %v504_v36 = vsel %vm499_vm7, %v6464_v62, %v503_v13  ;;  %v6468_v43 = vrot.slane %v4091_v50, 2  ;;  %v6469_v47 = vrot.slane %v3989_v46, 1  ;;  %v6473_v62 = vld [vmem:[#allocation39_spill] sm:$0xff] }
 0x137   : > { %v575_v61 = vsel %vm499_vm7, %v6465_v0, %v574_v3  ;;  %6466 = vst [vmem:[#allocation35_spill] sm:$0xff] %v4218_v56  ;;  %6467 = vst [vmem:[#allocation36_spill] sm:$0xff] %v4222_v11  ;;  %507 = vrot.lane.b32.xlu0 %v504_v36, %s6415_s3  ;;  %v6470_v42 = vrot.slane %v3908_v31, 1  ;;  %v6471_v13 = vrot.slane %v4005_v4, 5  ;;  %v6472_v38 = vrot.slane %v3940_v6, 5  ;;  %v6475_v6 = vld [vmem:[#allocation40_spill] sm:$0xff] }
 0x138   : > { %770 = vrot.lane.b32.xlu1 %v6468_v43, %s6448_s16  ;;  %v1045_v0 = vmul.f32 %v6473_v62, %v3821_v27  ;;  %v6474_v36 = vrot.slane %v3936_v19, 5  ;;  %v1046_v4 = vmul.f32 %v6473_v62, %v3961_v40  ;;  %v1066_v43 = vmul.f32 %v6475_v6, %v3821_v27  ;;  %v6485_v62 = vld [vmem:[#allocation58_spill] sm:$0xff] }
 0x139   : > { %v4233_v3 = vsel %vm499_vm7, %v6470_v42, %v6469_v47  ;;  %v4240_v15 = vsel %vm475_vm8, %v6472_v38, %v6471_v13  ;;  %v6476_v47 = vrot.slane %v3912_v18, 6  ;;  %v4262_v19 = vmul.f32 %v6475_v6, %v3961_v40 }
 0x13a   : > { %v4248_v46 = vsel %vm475_vm8, %v6474_v36, %v599_v55  ;;  %v1051_v13 = vrot.slane %v1045_v0, 4  ;;  %v417_v55 = vmul.f32 %v3645_v30, %v3821_v27  ;;  %v1053_v36 = vrot.slane %v1046_v4, 4 }
 0x13b   : > { %v4258_v42 = vsel %vm640_vm4, %v6476_v47, %v667_v23  ;;  %6477 = vst [vmem:[#allocation39_spill] sm:$0xff] %v4262_v19  ;;  %v1072_v29 = vrot.slane %v1066_v43, 4  ;;  %528 = vrot.lane.b32.xlu0 %v525_v48, %s6415_s3  ;;  %v6478_v18 = vrot.slane %v3760_v20, 4  ;;  %v6307_v0 = vrot.slane %v4262_v19, 4  ;;  %v6483_v48 = vld [vmem:[#allocation41_spill] sm:$0xff] }
 0x13c   : > { %481 = vrot.lane.b32.xlu1 %v4014_v21, %s6415_s3  ;;  %v418_v6 = vmul.f32 %v3645_v30, %v3961_v40  ;;  %v423_v47 = vrot.slane %v417_v55, 4  ;;  %v4280_v58 = vsel %vm206_vm0, %v1051_v13, %v1053_v36  ;;  %v6479_v4 = vstv %s3533_s6  ;;  %v6480_v21 = vld [vmem:[#allocation55_spill] sm:$0xff]  ;;  %s3206_s6 = smov 123  }
 0x13d   : > { %v4274_v23 = vsel %vm206_vm0, %v6478_v18, %v1051_v13  ;;  %v387_v43 = vmul.f32 %v6479_v4, %v3821_v27  ;;  %v6481_v31 = vrot.slane %v6480_v21, 4  ;;  %v1091_v18 = vmul.f32 %v6483_v48, %v3821_v27  ;;  %v6484_v13 = vld [vmem:[#allocation37_spill] sm:$0xff] }
 0x13e   : > { %v4295_v30 = vsel %vm206_vm0, %v1072_v29, %v6307_v0  ;;  %v425_v55 = vrot.slane %v418_v6, 4  ;;  %v393_v36 = vmul.f32 %v6484_v13, %v3821_v27  ;;  %v434_v4 = vmul.f32 %v3627_v22, %v3821_v27  ;;  %v6491_v13 = vld [vmem:[#allocation56_spill] sm:$0xff] }
 0x13f   : > { %v4288_v20 = vsel %vm206_vm0, %v6481_v31, %v1072_v29  ;;  %v1097_v21 = vrot.slane %v1091_v18, 4  ;;  %v4303_v31 = vmul.f32 %v6483_v48, %v3961_v40  ;;  %v6486_v38 = vrot.slane %v6485_v62, 4  ;;  %551 = vrot.lane.b32.xlu0 %v4045_v45, %s6415_s3  ;;  %v6487_v18 = vld [vmem:[#allocation57_spill] sm:$0xff] }
 0x140   : > { %6482 = vst [vmem:[#allocation40_spill] sm:$0xff] %v4288_v20  ;;  %v453_v29 = vmul.f32 %v3633_v26, %v3821_v27  ;;  %505 = vrot.lane.b32.xlu1 %v4021_v44, %s6415_s3  ;;  %v426_v22 = vsel %vm206_vm0, %v423_v47, %v425_v55  ;;  %v440_v6 = vrot.slane %v434_v4, 4  ;;  %v6489_v48 = vstv %s6367_s19  ;;  %v6494_v4 = vld [vmem:[#allocation63_spill] sm:$0xff]  ;;  %s2942_s19 = sld [smem:[#allocation9 + $0x5d]] }
 0x141   : > { %v424_v20 = vsel %vm206_vm0, %v6486_v38, %v423_v47  ;;  %v4321_v62 = vmul.f32 %v6489_v48, %v3821_v27  ;;  %v4323_v38 = vadd.f32 %v426_v22, %v387_v43  ;;  %v6492_v26 = vrot.slane %v6491_v13, 4  ;;  %v6496_v43 = vld [vmem:[#allocation42_spill] sm:$0xff] }
 0x142   : > { %v4316_v0 = vadd.f32 %v424_v20, %v6487_v18  ;;  %v459_v45 = vrot.slane %v453_v29, 4  ;;  %v6493_v47 = vrot.slane %v4218_v56, 4  ;;  %v6495_v18 = vrot.slane %v6494_v4, 4  ;;  %v6506_v4 = vld [vmem:[#allocation61_spill] sm:$0xff] }
 0x143   : > { %6490 = vst [vmem:[#allocation41_spill] sm:$0xff] %v4323_v38  ;;  %v4328_v19 = vsel %vm206_vm0, %v6492_v26, %v1097_v21  ;;  %v1137_v22 = vmul.f32 %v6496_v43, %v3821_v27  ;;  %v6498_v26 = vld [vmem:[#allocation60_spill] sm:$0xff]  ;;  %v6500_v29 = vrot.slane %v4303_v31, 4  ;;  %578 = vrot.lane.b32.xlu0 %v575_v61, %s6415_s3  ;;  %v6510_v61 = vld [vmem:[#allocation43_spill] sm:$0xff] }
 0x144   : > { %6488 = vst [vmem:[#allocation55_spill] sm:$0xff] %v4316_v0  ;;  %v443_v55 = vsel %vm206_vm0, %v440_v6, %v6493_v47  ;;  %v441_v48 = vsel %vm206_vm0, %v6495_v18, %v440_v6  ;;  %v6499_v0 = vrot.slane %v6498_v26, 4  ;;  %v6501_v47 = vld [vmem:[#allocation62_spill] sm:$0xff]  ;;  %526 = vrot.lane.b32.xlu1 %v4052_v5, %s6415_s3  ;;  %v6503_v6 = vld [vmem:[#allocation59_spill] sm:$0xff] }
 0x145   : > { %v4340_v13 = vadd.f32 %v443_v55, %v393_v36  ;;  %v4348_v38 = vsel %vm206_vm0, %v1097_v21, %v6500_v29  ;;  %v4351_v20 = vadd.f32 %v441_v48, %v6501_v47  ;;  %v6505_v55 = vrot.slane %v4321_v62, 5  ;;  %v6508_v26 = vld [vmem:[#allocation38_spill] sm:$0xff] }
 0x146   : > { %v460_v44 = vsel %vm206_vm0, %v6499_v0, %v459_v45  ;;  %v6507_v0 = vrot.slane %v6506_v4, 5  ;;  %v1143_v21 = vrot.slane %v1137_v22, 1  ;;  %v401_v48 = vmul.f32 %v6508_v26, %v3821_v27  ;;  %v6525_v26 = vld [vmem:[#allocation66_spill] sm:$0xff] }
 0x147   : > { %6497 = vst [vmem:[#allocation58_spill] sm:$0xff] %v4340_v13  ;;  %6502 = vst [vmem:[#allocation57_spill] sm:$0xff] %v4351_v20  ;;  %v4357_v36 = vadd.f32 %v460_v44, %v6503_v6  ;;  %v6509_v29 = vrot.slane %v4222_v11, 4  ;;  %v1158_v47 = vmul.f32 %v6510_v61, %v3821_v27  ;;  %v1138_v44 = vmul.f32 %v6496_v43, %v3961_v40  ;;  %v6515_v20 = vld [vmem:[#allocation44_spill] sm:$0xff] }
 0x148   : > { %v4364_v18 = vsel %vm475_vm8, %v6507_v0, %v6505_v55  ;;  %v4377_v6 = vmul.f32 %v6510_v61, %v3961_v40  ;;  %v6512_v55 = vld [vmem:[#allocation64_spill] sm:$0xff]  ;;  %v6517_v61 = vld [vmem:[#allocation45_spill] sm:$0xff]  ;;  %553 = vrot.lane.b32.xlu1 %v4233_v3, %s6415_s3  ;;  %601 = vrot.lane.b32.xlu0 %v4063_v35, %s6415_s3 }
 0x149   : > { %6504 = vst [vmem:[#allocation56_spill] sm:$0xff] %v4357_v36  ;;  %v462_v5 = vsel %vm206_vm0, %v459_v45, %v6509_v29  ;;  %v6513_v0 = vrot.slane %v6512_v55, 1  ;;  %v1183_v45 = vmul.f32 %v6515_v20, %v3821_v27  ;;  %v4390_v29 = vmul.f32 %v6515_v20, %v3961_v40  ;;  %v6520_v55 = vld [vmem:[#allocation65_spill] sm:$0xff] }
 0x14a   : > { %6511 = vst [vmem:[#allocation63_spill] sm:$0xff] %v4377_v6  ;;  %v4384_v36 = vadd.f32 %v462_v5, %v401_v48  ;;  %v1164_v13 = vrot.slane %v1158_v47, 1  ;;  %v1145_v43 = vrot.slane %v1138_v44, 1  ;;  %v1208_v56 = vmul.f32 %v6517_v61, %v3821_v27  ;;  %v6519_v47 = vld [vmem:[#allocation46_spill] sm:$0xff] }
 0x14b   : > { %v4382_v22 = vsel %vm499_vm7, %v6513_v0, %v1143_v21  ;;  %6516 = vst [vmem:[#allocation60_spill] sm:$0xff] %v4390_v29  ;;  %v1189_v48 = vrot.slane %v1183_v45, 1  ;;  %v4402_v20 = vmul.f32 %v6517_v61, %v3961_v40  ;;  %v1233_v44 = vmul.f32 %v6519_v47, %v3821_v27 }
 0x14c   : > { %6514 = vst [vmem:[#allocation42_spill] sm:$0xff] %v4384_v36  ;;  %v6521_v0 = vrot.slane %v6520_v55, 1  ;;  %v4412_v3 = vsel %vm499_vm7, %v1143_v21, %v1145_v43  ;;  %v6523_v35 = vrot.slane %v4377_v6, 1  ;;  %v1214_v5 = vrot.slane %v1208_v56, 1  ;;  %v6528_v43 = vld [vmem:[#allocation67_spill] sm:$0xff]  ;;  %576 = vrot.lane.b32.xlu1 %v4070_v63, %s6415_s3  ;;  %622 = vrot.lane.b32.xlu0 %v4083_v8, %s6415_s3 }
 0x14d   : > { %6518 = vst [vmem:[#allocation62_spill] sm:$0xff] %v4402_v20  ;;  %v6524_v61 = vrot.slane %v4390_v29, 1  ;;  %v6526_v55 = vrot.slane %v6525_v26, 1  ;;  %v1234_v21 = vmul.f32 %v6519_v47, %v3961_v40  ;;  %v6529_v6 = vrot.slane %v6528_v43, 1 }
 0x14e   : > { %v4409_v11 = vsel %vm499_vm7, %v6521_v0, %v1164_v13  ;;  %v4417_v45 = vsel %vm499_vm7, %v1164_v13, %v6523_v35  ;;  %v1239_v56 = vrot.slane %v1233_v44, 5  ;;  %v6531_v35 = vld [vmem:[#allocation47_spill] sm:$0xff]  ;;  %v6534_v47 = vstv %s3559_s14  ;;  %s2901_s14 = sld [smem:[#allocation9 + $0x4]] }
 0x14f   : > { %6522 = vst [vmem:[#allocation59_spill] sm:$0xff] %v4409_v11  ;;  %v4422_v36 = vsel %vm499_vm7, %v1189_v48, %v6524_v61  ;;  %v4427_v0 = vsel %vm499_vm7, %v6526_v55, %v1189_v48  ;;  %v6314_v11 = vrot.slane %v4402_v20, 1  ;;  %v4435_v13 = vsel %vm499_vm7, %v6529_v6, %v1214_v5  ;;  %v6536_v55 = vld [vmem:[#allocation48_spill] sm:$0xff]  ;;  %v6540_v20 = vld [vmem:[#allocation49_spill] sm:$0xff] }
 0x150   : > { %6527 = vst [vmem:[#allocation61_spill] sm:$0xff] %v4427_v0  ;;  %6530 = vst [vmem:[#allocation43_spill] sm:$0xff] %v4435_v13  ;;  %v1254_v61 = vmul.f32 %v6531_v35, %v3821_v27  ;;  %v4441_v26 = vmul.f32 %v6531_v35, %v3961_v40  ;;  %v1241_v6 = vrot.slane %v1234_v21, 5  ;;  %v4455_v44 = vmul.f32 %v6534_v47, %v3821_v27  ;;  %v6537_v35 = vld [vmem:[#allocation68_spill] sm:$0xff] }
 0x151   : > { %v4450_v48 = vsel %vm499_vm7, %v1214_v5, %v6314_v11  ;;  %v1300_v43 = vmul.f32 %v6536_v55, %v3821_v27  ;;  %v6538_v29 = vrot.slane %v6537_v35, 5  ;;  %v1325_v5 = vmul.f32 %v6540_v20, %v3821_v27  ;;  %603 = vrot.lane.b32.xlu1 %v4248_v46, %s6415_s3  ;;  %646 = vrot.lane.b32.xlu0 %v4026_v52, %s6448_s16  ;;  %v6550_v46 = vld [vmem:[#allocation72_spill] sm:$0xff] }
 0x152   : > { %6532 = vst [vmem:[#allocation64_spill] sm:$0xff] %v4441_v26  ;;  %6533 = vst [vmem:[#allocation44_spill] sm:$0xff] %v4450_v48  ;;  %v1260_v13 = vrot.slane %v1254_v61, 5  ;;  %v6315_v8 = vrot.slane %v4441_v26, 5  ;;  %v4468_v21 = vsel %vm475_vm8, %v1239_v56, %v1241_v6  ;;  %v6318_v47 = vrot.slane %v4455_v44, 6  ;;  %v6541_v61 = vld [vmem:[#allocation69_spill] sm:$0xff] }
 0x153   : > { %6535 = vst [vmem:[#allocation45_spill] sm:$0xff] %v4455_v44  ;;  %v4462_v63 = vsel %vm475_vm8, %v6538_v29, %v1239_v56  ;;  %v1306_v11 = vrot.slane %v1300_v43, 6  ;;  %v1301_v48 = vmul.f32 %v6536_v55, %v3961_v40  ;;  %v6542_v35 = vrot.slane %v6541_v61, 5  ;;  %v6544_v56 = vld [vmem:[#allocation50_spill] sm:$0xff]  ;;  %v6547_v61 = vld [vmem:[#allocation71_spill] sm:$0xff] }
 0x154   : > { %6539 = vst [vmem:[#allocation46_spill] sm:$0xff] %v4462_v63  ;;  %v4476_v29 = vsel %vm475_vm8, %v1260_v13, %v6315_v8  ;;  %v1331_v0 = vrot.slane %v1325_v5, 2  ;;  %v1346_v6 = vmul.f32 %v6544_v56, %v3821_v27  ;;  %v6545_v55 = vld [vmem:[#allocation70_spill] sm:$0xff]  ;;  %v1326_v26 = vmul.f32 %v6540_v20, %v3961_v40 }
 0x155   : > { %v4481_v63 = vsel %vm475_vm8, %v6542_v35, %v1260_v13  ;;  %v6546_v43 = vrot.slane %v6545_v55, 6  ;;  %v6548_v13 = vrot.slane %v6547_v61, 6  ;;  %v1308_v35 = vrot.slane %v1301_v48, 6  ;;  %624 = vrot.lane.b32.xlu1 %v4240_v15, %s6415_s3  ;;  %673 = vrot.lane.b32.xlu0 %v4258_v42, %s6448_s16 }
 0x156   : > { %6543 = vst [vmem:[#allocation65_spill] sm:$0xff] %v4481_v63  ;;  %v6551_v63 = vrot.slane %v6550_v46, 2  ;;  %v1352_v44 = vrot.slane %v1346_v6, 2  ;;  %v4510_v55 = vmul.f32 %v6544_v56, %v3961_v40  ;;  %v1333_v48 = vrot.slane %v1326_v26, 2  ;;  %v6555_v46 = vld [vmem:[#allocation52_spill] sm:$0xff] }
 0x157   : > { %v4494_v8 = vsel %vm640_vm4, %v6546_v43, %v6318_v47  ;;  %v4499_v5 = vsel %vm640_vm4, %v6548_v13, %v1306_v11  ;;  %v6553_v43 = vld [vmem:[#allocation51_spill] sm:$0xff]  ;;  %v4515_v13 = vsel %vm640_vm4, %v1306_v11, %v1308_v35  ;;  %v4531_v11 = vmul.f32 %v6555_v46, %v3961_v40 }
 0x158   : > { %6549 = vst [vmem:[#allocation66_spill] sm:$0xff] %v4499_v5  ;;  %v4506_v52 = vsel %vm689_vm5, %v6551_v63, %v1331_v0  ;;  %v1371_v47 = vmul.f32 %v6553_v43, %v3821_v27  ;;  %v4519_v20 = vmul.f32 %v6553_v43, %v3961_v40  ;;  %v1396_v63 = vmul.f32 %v6555_v46, %v3821_v27  ;;  %v6558_v43 = vld [vmem:[#allocation53_spill] sm:$0xff] }
 0x159   : > { %6552 = vst [vmem:[#allocation67_spill] sm:$0xff] %v4506_v52  ;;  %v6556_v52 = vld [vmem:[#allocation73_spill] sm:$0xff]  ;;  %v6319_v56 = vrot.slane %v4510_v55, 2  ;;  %v4538_v26 = vsel %vm689_vm5, %v1331_v0, %v1333_v48  ;;  %v6560_v46 = vrot.slane %v3881_v53, 2  ;;  %v1422_v0 = vmul.f32 %v6558_v43, %v3961_v40  ;;  %v6563_v53 = vld [vmem:[#allocation74_spill] sm:$0xff]  ;;  %671 = vrot.lane.b32.xlu1 %v3959_v41, %s6448_s16 }
 0x15a   : > { %6554 = vst [vmem:[#allocation47_spill] sm:$0xff] %v4519_v20  ;;  %v6557_v6 = vrot.slane %v6556_v52, 2  ;;  %v1377_v5 = vrot.slane %v1371_v47, 2  ;;  %v1379_v35 = vrot.slane %v4519_v20, 2  ;;  %v1402_v52 = vrot.slane %v1396_v63, 2 }
 0x15b   : > { %v4546_v47 = vsel %vm689_vm5, %v1352_v44, %v6319_v56  ;;  %v6562_v63 = vrot.slane %v3885_v28, 2  ;;  %v6565_v42 = vrot.slane %v4074_v54, 2  ;;  %v6570_v41 = vrot.slane %v4056_v9, 2 }
 0x15c   : > { %v4526_v61 = vsel %vm689_vm5, %v6557_v6, %v1352_v44  ;;  %v1421_v6 = vmul.f32 %v6558_v43, %v3821_v27  ;;  %6559 = vst [vmem:[#allocation48_spill] sm:$0xff] %v4546_v47  ;;  %v4551_v15 = vsel %vm689_vm5, %v6560_v46, %v1377_v5  ;;  %v4559_v48 = vsel %vm689_vm5, %v1377_v5, %v1379_v35 }
 0x15d   : > { %6561 = vst [vmem:[#allocation68_spill] sm:$0xff] %v4551_v15  ;;  %v4564_v44 = vsel %vm689_vm5, %v6562_v63, %v1402_v52  ;;  %v1426_v47 = vrot.slane %v6563_v53, 6  ;;  %v6564_v46 = vrot.slane %v4183_v33, 2  ;;  %v6566_v43 = vrot.slane %v4531_v11, 2  ;;  %v6568_v53 = vld [vmem:[#allocation28_spill] sm:$0xff] }
 0x15e   : > { %v1427_v56 = vrot.slane %v1421_v6, 6  ;;  %v1429_v5 = vrot.slane %v1422_v0, 6  ;;  %v6567_v6 = vld [vmem:[#allocation54_spill] sm:$0xff]  ;;  %v712_v63 = vrot.slane %v4087_v2, 2 }
 0x15f   : > { %v694_v15 = vsel %vm689_vm5, %v6565_v42, %v6564_v46  ;;  %v4575_v20 = vsel %vm689_vm5, %v1402_v52, %v6566_v43  ;;  %v690_v33 = vrot.slane %v6567_v6, 2  ;;  %v705_v42 = vmul.f32 %v3581_v10, %v6568_v53  ;;  %v6571_v10 = vld [vmem:[#allocation77_spill] sm:$0xff]  ;;  %v6576_v6 = vld [vmem:[#allocation76_spill] sm:$0xff] }
 0x160   : > { %697 = vrot.lane.b32.xlu0 %v694_v15, %s6448_s16  ;;  %v4581_v28 = vsel %vm640_vm4, %v1426_v47, %v1427_v56  ;;  %v4588_v46 = vsel %vm640_vm4, %v1427_v56, %v1429_v5  ;;  %v6569_v52 = vrot.slane %v4074_v54, 2  ;;  %v715_v15 = vsel %vm689_vm5, %v712_v63, %v6570_v41  ;;  %v6573_v56 = vld [vmem:[#allocation75_spill] sm:$0xff] }
 0x161   : > { %v711_v47 = vrot.slane %v705_v42, 2  ;;  %v6572_v54 = vrot.slane %v4037_v51, 2  ;;  %v6574_v43 = vrot.slane %v6573_v56, 2  ;;  %v6575_v5 = vrot.slane %v4091_v50, 2  ;;  %v6579_v42 = vld [vmem:[#allocation79_spill] sm:$0xff]  ;;  %v6580_v51 = vld [vmem:[#allocation80_spill] sm:$0xff] }
 0x162   : > { %v692_v0 = vsel %vm689_vm5, %v690_v33, %v6569_v52  ;;  %v6577_v33 = vrot.slane %v6576_v6, 2  ;;  %v6581_v50 = vrot.slane %v3951_v32, 7  ;;  %v6582_v52 = vld [vmem:[#allocation29_spill] sm:$0xff]  ;;  %v6585_v32 = vld [vmem:[#allocation34_spill] sm:$0xff]  ;;  %v1023_v56 = vstv %s2904_s5  ;;  %s2924_s5 = sld [smem:[#allocation9 + $0x3f]] }
 0x163   : > { %695 = vrot.lane.b32.xlu1 %v692_v0, %s6448_s16  ;;  %v713_v2 = vsel %vm689_vm5, %v711_v47, %v712_v63  ;;  %v740_v9 = vsel %vm689_vm5, %v6574_v43, %v6572_v54  ;;  %v6578_v63 = vld [vmem:[#allocation78_spill] sm:$0xff]  ;;  %v6583_v0 = vrot.slane %v6582_v52, 7  ;;  %v1003_v47 = vstv %s2903_s25  ;;  %s5155_s25 = sld [smem:[#allocation9 + $0x38]] }
 0x164   : > { %718 = vrot.lane.b32.xlu0 %v715_v15, %s6448_s16  ;;  %v765_v53 = vsel %vm689_vm5, %v6577_v33, %v6575_v5  ;;  %v6584_v15 = vrot.slane %v3730_v24, 7  ;;  %v6586_v24 = vrot.slane %v4139_v34, 3  ;;  %v1005_v54 = vmul.f32 %v1003_v47, %v3821_v27 }
 0x165   : > { %v808_v41 = vsel %vm805_vm6, %v6583_v0, %v6581_v50  ;;  %v1025_v52 = vmul.f32 %v1023_v56, %v3821_v27 }
 0x167   : > { %716 = vrot.lane.b32.xlu1 %v713_v2, %s6448_s16 }
 0x168   : > { %741 = vrot.lane.b32.xlu0 %v6571_v10, %s6448_s16 }
 0x16b   : > { %743 = vrot.lane.b32.xlu1 %v740_v9, %s6448_s16 }
 0x16c   : > { %768 = vrot.lane.b32.xlu0 %v765_v53, %s6448_s16 }
 0x16f   : > { %766 = vrot.lane.b32.xlu1 %v6578_v63, %s6448_s16  ;;  %v1006_v63 = vmul.f32 %v1003_v47, %v3961_v40 }
 0x170   : > { %791 = vrot.lane.b32.xlu0 %v6579_v42, %s6448_s16  ;;  %v1026_v42 = vmul.f32 %v1023_v56, %v3961_v40 }
 0x173   : > { %793 = vrot.lane.b32.xlu1 %v4118_v16, %s6448_s16  ;;  %v4653_v16 = vpop.permute.xlu0 %479 }
 0x174   : > { %836 = vrot.lane.b32.xlu0 %v6580_v51, %s6456_s17 }
 0x177   : > { %811 = vrot.lane.b32.xlu1 %v808_v41, %s6456_s17  ;;  %v4662_v34 = vpop.permute.xlu0 %669 }
 0x178   : > { %859 = vrot.lane.b32.xlu0 %v6584_v15, %s6456_s17 }
 0x17b   : > { %838 = vrot.lane.b32.xlu1 %v4121_v37, %s6456_s17  ;;  %v6587_v37 = vrot.slane %v4150_v12, 3 }
 0x17c   : > { %863 = vrot.lane.b32.xlu0 %v4130_v49, %s6456_s17  ;;  %v969_v49 = vstv %s2901_s14  ;;  %s5148_s14 = sld [smem:[#allocation9 + $0x15]] }
 0x17f   : > { %861 = vrot.lane.b32.xlu1 %v4135_v39, %s6456_s17  ;;  %v4659_v39 = vld [vmem:[#allocation2] sm:$0xff] }
 0x180   : > { %887 = vrot.lane.b32.xlu0 %v4153_v1, %s6456_s17  ;;  %v983_v1 = vstv %s2902_s2  ;;  %v1004_v5 = vmul.f32 %v4659_v39, %v1003_v47  ;;  %v1024_v6 = vmul.f32 %v4659_v39, %v1023_v56  ;;  %s5153_s2 = sld [smem:[#allocation9 + $0x31]] }
 0x181   : > { %v984_v12 = vmul.f32 %v4659_v39, %v983_v1 }
 0x183   : > { %885 = vrot.lane.b32.xlu1 %v4144_v25, %s6456_s17  ;;  %v970_v25 = vmul.f32 %v4659_v39, %v969_v49 }
 0x184   : > { %908 = vrot.lane.b32.xlu0 %v4178_v60, %s6456_s17  ;;  %v4674_v60 = vpop.permute.xlu0 %809 }
 0x185   : > { %6590 = vst [vmem:[#allocation69_spill] sm:$0xff] %v4674_v60 }
 0x187   : > { %906 = vrot.lane.b32.xlu1 %v6585_v32, %s6456_s17 }
 0x188   : > { %931 = vrot.lane.b32.xlu0 %v4188_v17, %s6456_s17  ;;  %v4668_v17 = vpop.permute.xlu1 %644 }
 0x189   : > { %6588 = vst [vmem:[#allocation49_spill] sm:$0xff] %v4668_v17 }
 0x18a   : > { %v4682_v10 = vpop.permute.xlu0 %483 }
 0x18b   : > { %910 = vrot.lane.b32.xlu1 %v6586_v24, %s6456_s17  ;;  %v6598_v24 = vld [vmem:[#allocation39_spill] sm:$0xff] }
 0x18c   : > { %935 = vrot.lane.b32.xlu0 %v6587_v37, %s6456_s17  ;;  %v4680_v2 = vpop.permute.xlu1 %834 }
 0x18d   : > { %6591 = vst [vmem:[#allocation50_spill] sm:$0xff] %v4680_v2  ;;  %v1644_v2 = vstv %s2933_s29  ;;  %s5180_s29 = sld [smem:[#allocation9 + $0x3c]] }
 0x18f   : > { %933 = vrot.lane.b32.xlu1 %v4193_v57, %s6456_s17  ;;  %v6589_v57 = vrot.slane %v4160_v59, 3  ;;  %v985_v59 = vmul.f32 %v983_v1, %v3821_v27 }
 0x190   : > { %958 = vrot.lane.b32.xlu0 %v4203_v14, %s6456_s17  ;;  %v971_v14 = vmul.f32 %v969_v49, %v3821_v27  ;;  %v6597_v27 = vld [vmem:[#allocation40_spill] sm:$0xff] }
 0x193   : > { %956 = vrot.lane.b32.xlu1 %v4208_v7, %s6456_s17  ;;  %v986_v7 = vmul.f32 %v983_v1, %v3961_v40  ;;  %v6603_v1 = vrot.slane %v6506_v4, 5  ;;  %v6609_v4 = vld [vmem:[#allocation63_spill] sm:$0xff] }
 0x194   : > { %974 = vrot.lane.b32.xlu0 %v970_v25, %s3205_s20 }
 0x196   : > { %v4688_v43 = vpop.permute.xlu1 %530  ;;  %v4690_v9 = vpop.permute.xlu0 %555 }
 0x197   : > { %960 = vrot.lane.b32.xlu1 %v6589_v57, %s6456_s17  ;;  %6592 = vst [vmem:[#allocation72_spill] sm:$0xff] %v4688_v43 }
 0x198   : > { %990 = vrot.lane.b32.xlu0 %v984_v12, %s3205_s20 }
 0x19a   : > { %v4696_v33 = vpop.permute.xlu1 %580  ;;  %v4698_v53 = vpop.permute.xlu0 %626 }
 0x19b   : > { %976 = vrot.lane.b32.xlu1 %v971_v14, %s3205_s20  ;;  %6593 = vst [vmem:[#allocation51_spill] sm:$0xff] %v4698_v53 }
 0x19c   : > { %994 = vrot.lane.b32.xlu0 %v986_v7, %s3205_s20 }
 0x19e   : > { %v4704_v51 = vpop.permute.xlu1 %648 }
 0x19f   : > { %992 = vrot.lane.b32.xlu1 %v985_v59, %s3205_s20 }
 0x1a0   : > { %1012 = vrot.lane.b32.xlu0 %v1005_v54, %s3205_s20  ;;  %v4706_v50 = vpop.permute.xlu0 %745  ;;  %v6614_v54 = vld [vmem:[#allocation43_spill] sm:$0xff] }
 0x1a3   : > { %1010 = vrot.lane.b32.xlu1 %v1004_v5, %s3205_s20 }
 0x1a4   : > { %1030 = vrot.lane.b32.xlu0 %v1024_v6, %s3205_s20  ;;  %v4712_v0 = vpop.permute.xlu1 %720  ;;  %v4714_v41 = vpop.permute.xlu0 %813  ;;  %v6616_v6 = vld [vmem:[#allocation60_spill] sm:$0xff] }
 0x1a5   : > { %6594 = vst [vmem:[#allocation52_spill] sm:$0xff] %v4712_v0  ;;  %6595 = vst [vmem:[#allocation73_spill] sm:$0xff] %v4714_v41  ;;  %v1715_v41 = vstv %s4959_s27  ;;  %v1878_v0 = vstv %s2943_s12  ;;  %s5353_s27 = sld [smem:[#allocation9 + $0x58]]  ;;  %s5492_s12 = sld [smem:[#allocation9 + $0x53]] }
 0x1a7   : > { %1014 = vrot.lane.b32.xlu1 %v1006_v63, %s3205_s20 }
 0x1a8   : > { %1034 = vrot.lane.b32.xlu0 %v1026_v42, %s3205_s20 }
 0x1a9   : > { %v4722_v15 = vpop.permute.xlu0 %507 }
 0x1aa   : > { %v4720_v40 = vpop.permute.xlu1 %770  ;;  %6596 = vst [vmem:[#allocation53_spill] sm:$0xff] %v4722_v15 }
 0x1ab   : > { %1032 = vrot.lane.b32.xlu1 %v1025_v52, %s3205_s20 }
 0x1ac   : > { %1057 = vrot.lane.b32.xlu0 %v4280_v58, %s3205_s20 }
 0x1ad   : > { %v4730_v32 = vpop.permute.xlu0 %528 }
 0x1ae   : > { %v4728_v58 = vpop.permute.xlu1 %481 }
 0x1af   : > { %1055 = vrot.lane.b32.xlu1 %v4274_v23, %s3205_s20  ;;  %v6599_v23 = vrot.slane %v6598_v24, 4 }
 0x1b0   : > { %1078 = vrot.lane.b32.xlu0 %v4295_v30, %s3205_s20  ;;  %v6600_v30 = vrot.slane %v4303_v31, 4 }
 0x1b1   : > { %v4740_v49 = vpop.permute.xlu0 %551 }
 0x1b2   : > { %v4738_v37 = vpop.permute.xlu1 %505  ;;  %6602 = vst [vmem:[#allocation54_spill] sm:$0xff] %v4740_v49 }
 0x1b3   : > { %1076 = vrot.lane.b32.xlu1 %v6597_v27, %s3205_s20  ;;  %6601 = vst [vmem:[#allocation74_spill] sm:$0xff] %v4738_v37  ;;  %v6622_v27 = vld [vmem:[#allocation44_spill] sm:$0xff] }
 0x1b4   : > { %1101 = vrot.lane.b32.xlu0 %v4328_v19, %s3205_s20 }
 0x1b5   : > { %v4748_v25 = vpop.permute.xlu0 %578 }
 0x1b6   : > { %v4746_v19 = vpop.permute.xlu1 %526 }
 0x1b7   : > { %1080 = vrot.lane.b32.xlu1 %v6599_v23, %s3205_s20 }
 0x1b8   : > { %1105 = vrot.lane.b32.xlu0 %v6600_v30, %s3205_s20  ;;  %v6625_v30 = vld [vmem:[#allocation46_spill] sm:$0xff] }
 0x1ba   : > { %v4755_v31 = vpop.permute.xlu1 %553  ;;  %v4757_v12 = vpop.permute.xlu0 %601 }
 0x1bb   : > { %1103 = vrot.lane.b32.xlu1 %v4348_v38, %s3205_s20  ;;  %6604 = vst [vmem:[#allocation28_spill] sm:$0xff] %v4755_v31  ;;  %6605 = vst [vmem:[#allocation77_spill] sm:$0xff] %v4757_v12  ;;  %v6606_v38 = vrot.slane %v4321_v62, 5 }
 0x1bc   : > { %1124 = vrot.lane.b32.xlu0 %v4364_v18, %s3206_s6  ;;  %v6607_v18 = vld [vmem:[#allocation59_spill] sm:$0xff] }
 0x1be   : > { %v4764_v57 = vpop.permute.xlu1 %576  ;;  %v4766_v14 = vpop.permute.xlu0 %622 }
 0x1bf   : > { %1122 = vrot.lane.b32.xlu1 %v6603_v1, %s3206_s6  ;;  %6608 = vst [vmem:[#allocation75_spill] sm:$0xff] %v4766_v14  ;;  %v3069_v14 = vld [vmem:[#allocation2 + $0x8] sm:$0xff] }
 0x1c0   : > { %1147 = vrot.lane.b32.xlu0 %v4382_v22, %s3206_s6  ;;  %v6610_v22 = vrot.slane %v6609_v4, 1 }
 0x1c3   : > { %1126 = vrot.lane.b32.xlu1 %v6606_v38, %s3206_s6  ;;  %v4773_v7 = vpop.permute.xlu1 %603  ;;  %v4775_v47 = vpop.permute.xlu0 %646 }
 0x1c4   : > { %1168 = vrot.lane.b32.xlu0 %v6607_v18, %s3206_s6  ;;  %6611 = vst [vmem:[#allocation76_spill] sm:$0xff] %v4773_v7  ;;  %6612 = vst [vmem:[#allocation78_spill] sm:$0xff] %v4775_v47  ;;  %v6627_v18 = vld [vmem:[#allocation65_spill] sm:$0xff] }
 0x1c7   : > { %1149 = vrot.lane.b32.xlu1 %v4412_v3, %s3206_s6  ;;  %v4781_v62 = vpop.permute.xlu1 %624  ;;  %v4783_v59 = vpop.permute.xlu0 %673  ;;  %v6613_v3 = vld [vmem:[#allocation61_spill] sm:$0xff] }
 0x1c8   : > { %1172 = vrot.lane.b32.xlu0 %v6610_v22, %s3206_s6 }
 0x1cb   : > { %1170 = vrot.lane.b32.xlu1 %v4417_v45, %s3206_s6  ;;  %v4789_v56 = vpop.permute.xlu1 %671  ;;  %v6617_v45 = vrot.slane %v6616_v6, 1 }
 0x1cc   : > { %1195 = vrot.lane.b32.xlu0 %v4422_v36, %s3206_s6  ;;  %v6618_v36 = vld [vmem:[#allocation62_spill] sm:$0xff] }
 0x1cd   : > { %v6619_v63 = vrot.slane %v6618_v36, 1 }
 0x1cf   : > { %1193 = vrot.lane.b32.xlu1 %v6613_v3, %s3206_s6 }
 0x1d0   : > { %1218 = vrot.lane.b32.xlu0 %v6614_v54, %s3206_s6  ;;  %v6631_v54 = vld [vmem:[#allocation64_spill] sm:$0xff] }
 0x1d1   : > { %v6632_v6 = vrot.slane %v6631_v54, 5  ;;  %v6641_v54 = vld [vmem:[#allocation67_spill] sm:$0xff] }
 0x1d2   : > { %v4791_v5 = vpop.permute.xlu0 %697 }
 0x1d3   : > { %6615 = vst [vmem:[#allocation79_spill] sm:$0xff] %v4791_v5  ;;  %1197 = vrot.lane.b32.xlu1 %v6617_v45, %s3206_s6 }
 0x1d4   : > { %1222 = vrot.lane.b32.xlu0 %v6619_v63, %s3206_s6 }
 0x1d5   : > { %v4799_v42 = vpop.permute.xlu1 %695 }
 0x1d6   : > { %6620 = vst [vmem:[#allocation80_spill] sm:$0xff] %v4799_v42  ;;  %v4801_v52 = vpop.permute.xlu0 %718 }
 0x1d7   : > { %6621 = vst [vmem:[#allocation29_spill] sm:$0xff] %v4801_v52  ;;  %1220 = vrot.lane.b32.xlu1 %v6622_v27, %s3206_s6  ;;  %v6637_v27 = vld [vmem:[#allocation66_spill] sm:$0xff] }
 0x1d8   : > { %1245 = vrot.lane.b32.xlu0 %v4468_v21, %s3206_s6  ;;  %v6628_v21 = vld [vmem:[#allocation70_spill] sm:$0xff] }
 0x1d9   : > { %v4807_v24 = vpop.permute.xlu1 %716  ;;  %v6629_v4 = vrot.slane %v6628_v21, 6  ;;  %v6639_v21 = vld [vmem:[#allocation71_spill] sm:$0xff] }
 0x1da   : > { %6623 = vst [vmem:[#allocation34_spill] sm:$0xff] %v4807_v24  ;;  %v4809_v23 = vpop.permute.xlu0 %741 }
 0x1db   : > { %6624 = vst [vmem:[#allocation40_spill] sm:$0xff] %v4809_v23  ;;  %1243 = vrot.lane.b32.xlu1 %v6625_v30, %s3206_s6 }
 0x1dc   : > { %1266 = vrot.lane.b32.xlu0 %v4476_v29, %s3206_s6  ;;  %v6633_v29 = vld [vmem:[#allocation45_spill] sm:$0xff] }
 0x1dd   : > { %v4815_v1 = vpop.permute.xlu1 %743  ;;  %v6634_v45 = vrot.slane %v6633_v29, 6 }
 0x1de   : > { %6626 = vst [vmem:[#allocation39_spill] sm:$0xff] %v4815_v1  ;;  %v4817_v38 = vpop.permute.xlu0 %768 }
 0x1df   : > { %1264 = vrot.lane.b32.xlu1 %v6627_v18, %s3206_s6 }
 0x1e0   : > { %1285 = vrot.lane.b32.xlu0 %v6629_v4, %s3207_s10  ;;  %v6640_v4 = vrot.slane %v6639_v21, 6 }
 0x1e1   : > { %v4824_v22 = vpop.permute.xlu1 %766 }
 0x1e2   : > { %v4826_v3 = vpop.permute.xlu0 %791 }
 0x1e3   : > { %6630 = vst [vmem:[#allocation59_spill] sm:$0xff] %v4826_v3  ;;  %1268 = vrot.lane.b32.xlu1 %v6632_v6, %s3206_s6 }
 0x1e4   : > { %1289 = vrot.lane.b32.xlu0 %v6634_v45, %s3207_s10 }
 0x1e5   : > { %v4834_v36 = vpop.permute.xlu1 %793 }
 0x1e6   : > { %6635 = vst [vmem:[#allocation63_spill] sm:$0xff] %v4834_v36  ;;  %v4836_v63 = vpop.permute.xlu0 %836 }
 0x1e7   : > { %6636 = vst [vmem:[#allocation61_spill] sm:$0xff] %v4836_v63  ;;  %1287 = vrot.lane.b32.xlu1 %v4494_v8, %s3207_s10 }
 0x1e8   : > { %1312 = vrot.lane.b32.xlu0 %v6637_v27, %s3207_s10  ;;  %v6644_v27 = vrot.slane %v4510_v55, 2 }
 0x1e9   : > { %v4842_v30 = vpop.permute.xlu1 %811 }
 0x1ea   : > { %6638 = vst [vmem:[#allocation43_spill] sm:$0xff] %v4842_v30  ;;  %v4844_v18 = vpop.permute.xlu0 %859 }
 0x1eb   : > { %1310 = vrot.lane.b32.xlu1 %v6640_v4, %s3207_s10 }
 0x1ec   : > { %1335 = vrot.lane.b32.xlu0 %v6641_v54, %s3207_s10 }
 0x1ed   : > { %v4851_v6 = vpop.permute.xlu1 %838 }
 0x1ee   : > { %6642 = vst [vmem:[#allocation60_spill] sm:$0xff] %v4851_v6  ;;  %v4853_v29 = vpop.permute.xlu0 %863  ;;  %v6722_v6 = vld [vmem:[#allocation35_spill] sm:$0xff] }
 0x1ef   : > { %1314 = vrot.lane.b32.xlu1 %v4515_v13, %s3207_s10  ;;  %v6647_v13 = vld [vmem:[#allocation48_spill] sm:$0xff] }
 0x1f0   : > { %1356 = vrot.lane.b32.xlu0 %v4526_v61, %s3207_s10 }
 0x1f1   : > { %v4859_v8 = vpop.permute.xlu1 %861 }
 0x1f2   : > { %v4861_v45 = vpop.permute.xlu0 %887 }
 0x1f3   : > { %6643 = vst [vmem:[#allocation62_spill] sm:$0xff] %v4861_v45  ;;  %1337 = vrot.lane.b32.xlu1 %v4538_v26, %s3207_s10  ;;  %v6650_v26 = vld [vmem:[#allocation68_spill] sm:$0xff] }
 0x1f4   : > { %1360 = vrot.lane.b32.xlu0 %v6644_v27, %s3207_s10 }
 0x1f5   : > { %v4868_v21 = vpop.permute.xlu1 %885 }
 0x1f6   : > { %6645 = vst [vmem:[#allocation44_spill] sm:$0xff] %v4868_v21  ;;  %v4870_v4 = vpop.permute.xlu0 %908 }
 0x1f7   : > { %6646 = vst [vmem:[#allocation46_spill] sm:$0xff] %v4870_v4  ;;  %1358 = vrot.lane.b32.xlu1 %v6647_v13, %s3207_s10  ;;  %v1570_v13 = vstv %s2929_s11  ;;  %s5159_s11 = sld [smem:[#allocation9 + $0x4d]] }
 0x1f8   : > { %1383 = vrot.lane.b32.xlu0 %v4559_v48, %s3207_s10  ;;  %v6654_v48 = vrot.slane %v4531_v11, 2 }
 0x1f9   : > { %v4876_v61 = vpop.permute.xlu1 %906 }
 0x1fa   : > { %6648 = vst [vmem:[#allocation65_spill] sm:$0xff] %v4876_v61  ;;  %v4878_v54 = vpop.permute.xlu0 %931  ;;  %v1782_v61 = vstv %s2939_s8  ;;  %s5389_s8 = sld [smem:[#allocation9 + $0x3d]] }
 0x1fb   : > { %6649 = vst [vmem:[#allocation70_spill] sm:$0xff] %v4878_v54  ;;  %1381 = vrot.lane.b32.xlu1 %v6650_v26, %s3207_s10 }
 0x1fc   : > { %1406 = vrot.lane.b32.xlu0 %v4564_v44, %s3207_s10  ;;  %v4902_v44 = vld [vmem:[#allocation2 + $0x20] sm:$0xff] }
 0x1fd   : > { %v4884_v55 = vpop.permute.xlu1 %910  ;;  %v1572_v11 = vmul.f32 %v1570_v13, %v4902_v44  ;;  %v1646_v12 = vmul.f32 %v1644_v2, %v4902_v44 }
 0x1fe   : > { %6651 = vst [vmem:[#allocation64_spill] sm:$0xff] %v4884_v55  ;;  %v4886_v27 = vpop.permute.xlu0 %935 }
 0x1ff   : > { %6652 = vst [vmem:[#allocation45_spill] sm:$0xff] %v4886_v27  ;;  %1385 = vrot.lane.b32.xlu1 %v1379_v35, %s3207_s10  ;;  %v1652_v63 = vrot.slane %v1646_v12, 4 }
 0x200   : > { %1410 = vrot.lane.b32.xlu0 %v6654_v48, %s3207_s10  ;;  %v4909_v48 = vld [vmem:[#allocation2 + $0x18] sm:$0xff] }
 0x201   : > { %v4894_v21 = vpop.permute.xlu1 %933  ;;  %v1571_v42 = vmul.f32 %v1570_v13, %v4909_v48  ;;  %v4930_v13 = vld [vmem:[#allocation2 + $0x28] sm:$0x3f]  ;;  %v1783_v49 = vmul.f32 %v1782_v61, %v4909_v48 }
 0x202   : > { %6655 = vst [vmem:[#allocation66_spill] sm:$0xff] %v4894_v21  ;;  %v4896_v26 = vpop.permute.xlu0 %958  ;;  %v1647_v12 = vmul.f32 %v1644_v2, %v4930_v13 }
 0x203   : > { %1408 = vrot.lane.b32.xlu1 %v4575_v20, %s3207_s10  ;;  %v1584_v20 = vstv %s2930_s23  ;;  %s2956_s23 = sld [smem:[#allocation9 + $0x5f]] }
 0x204   : > { %1433 = vrot.lane.b32.xlu0 %v4588_v46, %s3207_s10  ;;  %v1586_v36 = vmul.f32 %v1584_v20, %v4902_v44 }
 0x205   : > { %v4904_v35 = vpop.permute.xlu1 %956 }
 0x206   : > { %6656 = vst [vmem:[#allocation71_spill] sm:$0xff] %v4904_v35  ;;  %v4906_v3 = vpop.permute.xlu0 %974 }
 0x207   : > { %6657 = vst [vmem:[#allocation67_spill] sm:$0xff] %v4906_v3  ;;  %1431 = vrot.lane.b32.xlu1 %v4581_v28, %s3207_s10  ;;  %v1604_v3 = vstv %s2931_s28  ;;  %s2927_s28 = sld [smem:[#allocation9 + $0x54]] }
 0x208   : > { %1577 = vrot.lane.b32.xlu0 %v1572_v11, %s6415_s3  ;;  %v1585_v11 = vmul.f32 %v1584_v20, %v4909_v48  ;;  %v1605_v7 = vmul.f32 %v1604_v3, %v4909_v48 }
 0x209   : > { %v4914_v45 = vpop.permute.xlu1 %960 }
 0x20a   : > { %v4916_v46 = vpop.permute.xlu0 %990 }
 0x20b   : > { %6658 = vst [vmem:[#allocation48_spill] sm:$0xff] %v4916_v46  ;;  %1575 = vrot.lane.b32.xlu1 %v1571_v42, %s6415_s3 }
 0x20c   : > { %1593 = vrot.lane.b32.xlu0 %v1586_v36, %s6415_s3  ;;  %v1587_v36 = vmul.f32 %v1584_v20, %v4930_v13 }
 0x20d   : > { %v4922_v5 = vpop.permute.xlu1 %976 }
 0x20e   : > { %6659 = vst [vmem:[#allocation68_spill] sm:$0xff] %v4922_v5  ;;  %v4924_v28 = vpop.permute.xlu0 %994  ;;  %v1607_v5 = vmul.f32 %v1604_v3, %v4930_v13 }
 0x20f   : > { %6660 = vst [vmem:[#allocation47_spill] sm:$0xff] %v4924_v28  ;;  %1591 = vrot.lane.b32.xlu1 %v1585_v11, %s6415_s3  ;;  %v1624_v11 = vstv %s2932_s7  ;;  %v1665_v28 = vstv %s2934_s22  ;;  %s5227_s7 = sld [smem:[#allocation9 + $0x5b]]  ;;  %s5238_s22 = sld [smem:[#allocation9 + $0x51]] }
 0x210   : > { %1611 = vrot.lane.b32.xlu0 %v1605_v7, %s6415_s3  ;;  %v1645_v7 = vmul.f32 %v1644_v2, %v4909_v48  ;;  %v1626_v20 = vmul.f32 %v1624_v11, %v4902_v44  ;;  %v1667_v23 = vmul.f32 %v1665_v28, %v4902_v44  ;;  %v1627_v46 = vmul.f32 %v1624_v11, %v4930_v13 }
 0x211   : > { %v4932_v54 = vpop.permute.xlu1 %992  ;;  %v1668_v47 = vmul.f32 %v1665_v28, %v4930_v13  ;;  %v1654_v2 = vrot.slane %v1647_v12, 4 }
 0x212   : > { %6661 = vst [vmem:[#allocation81_spill] sm:$0xff] %v4932_v54  ;;  %v4934_v42 = vpop.permute.xlu0 %1012  ;;  %v1673_v17 = vrot.slane %v1667_v23, 4 }
 0x213   : > { %6662 = vst [vmem:[#allocation82_spill] sm:$0xff] %v4934_v42  ;;  %1595 = vrot.lane.b32.xlu1 %v1587_v36, %s6415_s3  ;;  %v1606_v42 = vmul.f32 %v1604_v3, %v4902_v44  ;;  %v1666_v36 = vmul.f32 %v1665_v28, %v4909_v48  ;;  %v1625_v3 = vmul.f32 %v1624_v11, %v4909_v48 }
 0x214   : > { %1615 = vrot.lane.b32.xlu0 %v1607_v5, %s6415_s3  ;;  %v1651_v5 = vrot.slane %v1645_v7, 4  ;;  %v1655_v28 = vsel %vm206_vm0, %v1652_v63, %v1654_v2 }
 0x215   : > { %v4942_v21 = vpop.permute.xlu1 %1010 }
 0x216   : > { %6663 = vst [vmem:[#allocation83_spill] sm:$0xff] %v4942_v21  ;;  %v4944_v37 = vpop.permute.xlu0 %1030  ;;  %v1653_v1 = vsel %vm206_vm0, %v1651_v5, %v1652_v63  ;;  %v1690_v5 = vstv %s2935_s26  ;;  %s5247_s26 = sld [smem:[#allocation9 + $0x5e]] }
 0x217   : > { %6664 = vst [vmem:[#allocation84_spill] sm:$0xff] %v4944_v37  ;;  %1613 = vrot.lane.b32.xlu1 %v1606_v42, %s6415_s3  ;;  %v1672_v42 = vrot.slane %v1666_v36, 4  ;;  %v1693_v15 = vmul.f32 %v1690_v5, %v4930_v13 }
 0x218   : > { %1633 = vrot.lane.b32.xlu0 %v1626_v20, %s6415_s3 }
 0x219   : > { %v4952_v55 = vpop.permute.xlu1 %1014  ;;  %v1674_v23 = vsel %vm206_vm0, %v1672_v42, %v1673_v17  ;;  %v1700_v11 = vrot.slane %v1693_v15, 4 }
 0x21a   : > { %6665 = vst [vmem:[#allocation85_spill] sm:$0xff] %v4952_v55  ;;  %v4954_v21 = vpop.permute.xlu0 %1034 }
 0x21b   : > { %1631 = vrot.lane.b32.xlu1 %v1625_v3, %s6415_s3 }
 0x21c   : > { %1656 = vrot.lane.b32.xlu0 %v1653_v1, %s6415_s3  ;;  %v1692_v1 = vmul.f32 %v1690_v5, %v4902_v44 }
 0x21d   : > { %v4963_v7 = vpop.permute.xlu1 %1032 }
 0x21e   : > { %6666 = vst [vmem:[#allocation86_spill] sm:$0xff] %v4963_v7  ;;  %v4965_v20 = vpop.permute.xlu0 %1057  ;;  %v1698_v12 = vrot.slane %v1692_v1, 4 }
 0x21f   : > { %6667 = vst [vmem:[#allocation87_spill] sm:$0xff] %v4965_v20  ;;  %1635 = vrot.lane.b32.xlu1 %v1627_v46, %s6415_s3  ;;  %v1675_v20 = vrot.slane %v1668_v47, 4  ;;  %v1691_v46 = vmul.f32 %v1690_v5, %v4909_v48 }
 0x220   : > { %1677 = vrot.lane.b32.xlu0 %v1674_v23, %s6415_s3  ;;  %v1701_v63 = vsel %vm206_vm0, %v1698_v12, %v1700_v11 }
 0x221   : > { %v4974_v36 = vpop.permute.xlu1 %1055  ;;  %v1676_v47 = vsel %vm206_vm0, %v1673_v17, %v1675_v20  ;;  %v1697_v15 = vrot.slane %v1691_v46, 4 }
 0x222   : > { %6668 = vst [vmem:[#allocation88_spill] sm:$0xff] %v4974_v36  ;;  %v4976_v3 = vpop.permute.xlu0 %1078  ;;  %v1716_v36 = vmul.f32 %v1715_v41, %v4909_v48 }
 0x223   : > { %6669 = vst [vmem:[#allocation89_spill] sm:$0xff] %v4976_v3  ;;  %1658 = vrot.lane.b32.xlu1 %v1655_v28, %s6415_s3  ;;  %v1717_v28 = vmul.f32 %v1715_v41, %v4902_v44 }
 0x224   : > { %1681 = vrot.lane.b32.xlu0 %v1675_v20, %s6415_s3  ;;  %v1720_v5 = vrot.slane %v1716_v36, 5  ;;  %v1757_v36 = vstv %s2938_s4  ;;  %s5374_s4 = sld [smem:[#allocation9 + $0x4b]] }
 0x225   : > { %v4983_v42 = vpop.permute.xlu1 %1076 }
 0x226   : > { %6670 = vst [vmem:[#allocation90_spill] sm:$0xff] %v4983_v42  ;;  %v4985_v23 = vpop.permute.xlu0 %1101  ;;  %v1699_v42 = vsel %vm206_vm0, %v1697_v15, %v1698_v12  ;;  %v1759_v15 = vmul.f32 %v1757_v36, %v4902_v44 }
 0x227   : > { %6671 = vst [vmem:[#allocation91_spill] sm:$0xff] %v4985_v23  ;;  %1679 = vrot.lane.b32.xlu1 %v1676_v47, %s6415_s3  ;;  %v1736_v23 = vstv %s2937_s30  ;;  %s5370_s30 = sld [smem:[#allocation9 + $0x4a]] }
 0x228   : > { %1704 = vrot.lane.b32.xlu0 %v1701_v63, %s6415_s3  ;;  %v1739_v17 = vmul.f32 %v1736_v23, %v4930_v13  ;;  %v1738_v20 = vmul.f32 %v1736_v23, %v4902_v44  ;;  %v1721_v63 = vrot.slane %v1717_v28, 5 }
 0x229   : > { %v4992_v2 = vpop.permute.xlu1 %1080 }
 0x22a   : > { %6672 = vst [vmem:[#allocation92_spill] sm:$0xff] %v4992_v2  ;;  %v4994_v1 = vpop.permute.xlu0 %1105  ;;  %v1746_v41 = vrot.slane %v1739_v17, 1  ;;  %v1760_v2 = vmul.f32 %v1757_v36, %v4930_v13  ;;  %v1744_v12 = vrot.slane %v1738_v20, 1  ;;  %v1722_v28 = vsel %vm475_vm8, %v1720_v5, %v1721_v63 }
 0x22b   : > { %6673 = vst [vmem:[#allocation93_spill] sm:$0xff] %v4994_v1  ;;  %1702 = vrot.lane.b32.xlu1 %v1699_v42, %s6415_s3  ;;  %v1737_v42 = vmul.f32 %v1736_v23, %v4909_v48  ;;  %v1784_v1 = vmul.f32 %v1782_v61, %v4902_v44  ;;  %v1765_v23 = vrot.slane %v1759_v15, 1  ;;  %v1758_v20 = vmul.f32 %v1757_v36, %v4909_v48 }
 0x22c   : > { %1723 = vrot.lane.b32.xlu0 %v1720_v5, %s6448_s16  ;;  %v1747_v17 = vsel %vm499_vm7, %v1744_v12, %v1746_v41  ;;  %v1767_v31 = vrot.slane %v1760_v2, 1  ;;  %v1807_v5 = vstv %s2940_s9  ;;  %s5395_s9 = sld [smem:[#allocation9 + $0x37]] }
 0x22d   : > { %v5002_v46 = vpop.permute.xlu1 %1103  ;;  %v1790_v41 = vrot.slane %v1784_v1, 1  ;;  %v1764_v36 = vrot.slane %v1758_v20, 1  ;;  %v1808_v15 = vmul.f32 %v1807_v5, %v4909_v48  ;;  %v1785_v1 = vmul.f32 %v1782_v61, %v4930_v13 }
 0x22e   : > { %6674 = vst [vmem:[#allocation94_spill] sm:$0xff] %v5002_v46  ;;  %v5004_v47 = vpop.permute.xlu0 %1124 }
 0x22f   : > { %6675 = vst [vmem:[#allocation95_spill] sm:$0xff] %v5004_v47  ;;  %1706 = vrot.lane.b32.xlu1 %v1700_v11, %s6415_s3  ;;  %v1743_v11 = vrot.slane %v1737_v42, 1  ;;  %v1789_v42 = vrot.slane %v1783_v49, 1  ;;  %v1766_v60 = vsel %vm499_vm7, %v1764_v36, %v1765_v23  ;;  %v1792_v36 = vrot.slane %v1785_v1, 1  ;;  %s5136_s3 = sld [smem:[#allocation9 + $0x35]] }
 0x230   : > { %1727 = vrot.lane.b32.xlu0 %v1721_v63, %s6448_s16  ;;  %v1768_v63 = vsel %vm499_vm7, %v1765_v23, %v1767_v31  ;;  %v5245_v47 = vstv %s5180_s29  ;;  %s6928_s29 = sld [smem:[#allocation22_spill]] }
 0x231   : > { %v5011_v3 = vpop.permute.xlu1 %1122  ;;  %v1745_v2 = vsel %vm499_vm7, %v1743_v11, %v1744_v12  ;;  %v1791_v12 = vsel %vm499_vm7, %v1789_v42, %v1790_v41  ;;  %v5280_v35 = vmul.f32 %v5245_v47, %v4902_v44 }
 0x232   : > { %6676 = vst [vmem:[#allocation96_spill] sm:$0xff] %v5011_v3  ;;  %v5013_v46 = vpop.permute.xlu0 %1147 }
 0x233   : > { %6677 = vst [vmem:[#allocation97_spill] sm:$0xff] %v5013_v46  ;;  %1725 = vrot.lane.b32.xlu1 %v1722_v28, %s6448_s16  ;;  %v1809_v28 = vmul.f32 %v1807_v5, %v4902_v44 }
 0x234   : > { %1750 = vrot.lane.b32.xlu0 %v1747_v17, %s6448_s16 }
 0x235   : > { %v5022_v54 = vpop.permute.xlu1 %1126  ;;  %v1815_v11 = vrot.slane %v1809_v28, 1 }
 0x236   : > { %v5024_v46 = vpop.permute.xlu0 %1168  ;;  %p6931_p11 = scmp.ne.s32.totalorder %s6928_s29, 0 }
 0x237   : > { %6678 = vst [vmem:[#allocation98_spill] sm:$0xff] %v5024_v46  ;;  %1748 = vrot.lane.b32.xlu1 %v1745_v2, %s6448_s16  ;;  %v1814_v2 = vrot.slane %v1808_v15, 1 }
 0x238   : > { %1771 = vrot.lane.b32.xlu0 %v1768_v63, %s6448_s16  ;;  %v1810_v63 = vmul.f32 %v1807_v5, %v4930_v13  ;;  %v1793_v5 = vsel %vm499_vm7, %v1790_v41, %v1792_v36 }
 0x239   : > { %v5032_v17 = vpop.permute.xlu1 %1149  ;;  %v1816_v23 = vsel %vm499_vm7, %v1814_v2, %v1815_v11 }
 0x23a   : > { %6679 = vst [vmem:[#allocation99_spill] sm:$0xff] %v5032_v17  ;;  %v5034_v46 = vpop.permute.xlu0 %1172  ;;  %v1899_v17 = vstv %s2944_s13  ;;  %v1817_v15 = vrot.slane %v1810_v63, 1  ;;  %s5432_s13 = sld [smem:[#allocation9 + $0x44]] }
 0x23b   : > { %6680 = vst [vmem:[#allocation100_spill] sm:$0xff] %v5034_v46  ;;  %1769 = vrot.lane.b32.xlu1 %v1766_v60, %s6448_s16  ;;  %v1901_v28 = vmul.f32 %v1899_v17, %v4902_v44  ;;  %v1900_v60 = vmul.f32 %v1899_v17, %v4909_v48  ;;  %v1902_v63 = vmul.f32 %v1899_v17, %v4930_v13 }
 0x23c   : > { %1794 = vrot.lane.b32.xlu0 %v1791_v12, %s6448_s16 }
 0x23d   : > { %v5041_v20 = vpop.permute.xlu1 %1170  ;;  %v1907_v12 = vrot.slane %v1901_v28, 6  ;;  %v1906_v1 = vrot.slane %v1900_v60, 6 }
 0x23e   : > { %6681 = vst [vmem:[#allocation101_spill] sm:$0xff] %v5041_v20  ;;  %v5043_v49 = vpop.permute.xlu0 %1195  ;;  %v1909_v20 = vrot.slane %v1902_v63, 6 }
 0x23f   : > { %6682 = vst [vmem:[#allocation102_spill] sm:$0xff] %v5043_v49  ;;  %1773 = vrot.lane.b32.xlu1 %v1767_v31, %s6448_s16  ;;  %v1818_v49 = vsel %vm499_vm7, %v1815_v11, %v1817_v15 }
 0x240   : > { %1819 = vrot.lane.b32.xlu0 %v1816_v23, %s6448_s16  ;;  %v1853_v23 = vstv %s2942_s19  ;;  %s5447_s19 = sld [smem:[#allocation9 + $0x59]] }
 0x241   : > { %v5051_v61 = vpop.permute.xlu1 %1193  ;;  %v1856_v46 = vmul.f32 %v1853_v23, %v4930_v13  ;;  %v1855_v41 = vmul.f32 %v1853_v23, %v4902_v44 }
 0x242   : > { %6683 = vst [vmem:[#allocation103_spill] sm:$0xff] %v5051_v61  ;;  %v5053_v42 = vpop.permute.xlu0 %1218  ;;  %v1908_v61 = vsel %vm640_vm4, %v1906_v1, %v1907_v12 }
 0x243   : > { %6684 = vst [vmem:[#allocation104_spill] sm:$0xff] %v5053_v42  ;;  %1796 = vrot.lane.b32.xlu1 %v1793_v5, %s6448_s16  ;;  %v1995_v5 = vstv %s2948_s24  ;;  %v1863_v11 = vrot.slane %v1856_v46, 5  ;;  %v1861_v17 = vrot.slane %v1855_v41, 5  ;;  %s5465_s24 = sld [smem:[#allocation9 + $0x36]] }
 0x244   : > { %1823 = vrot.lane.b32.xlu0 %v1817_v15, %s6448_s16  ;;  %v1997_v15 = vmul.f32 %v1995_v5, %v4902_v44 }
 0x245   : > { %v5058_v2 = vpop.permute.xlu1 %1197  ;;  %v1864_v46 = vsel %vm475_vm8, %v1861_v17, %v1863_v11 }
 0x246   : > { %6685 = vst [vmem:[#allocation105_spill] sm:$0xff] %v5058_v2  ;;  %v5060_v31 = vpop.permute.xlu0 %1222  ;;  %v2003_v63 = vrot.slane %v1997_v15, 2 }
 0x247   : > { %6686 = vst [vmem:[#allocation106_spill] sm:$0xff] %v5060_v31  ;;  %1821 = vrot.lane.b32.xlu1 %v1818_v49, %s6448_s16  ;;  %v1854_v49 = vmul.f32 %v1853_v23, %v4909_v48 }
 0x248   : > { %1913 = vrot.lane.b32.xlu0 %v1908_v61, %s6456_s17  ;;  %v1996_v61 = vmul.f32 %v1995_v5, %v4909_v48 }
 0x249   : > { %v5069_v28 = vpop.permute.xlu1 %1220 }
 0x24a   : > { %6687 = vst [vmem:[#allocation107_spill] sm:$0xff] %v5069_v28  ;;  %v5071_v60 = vpop.permute.xlu0 %1245 }
 0x24b   : > { %6688 = vst [vmem:[#allocation108_spill] sm:$0xff] %v5071_v60  ;;  %1911 = vrot.lane.b32.xlu1 %v1906_v1, %s6456_s17  ;;  %v1910_v60 = vsel %vm640_vm4, %v1907_v12, %v1909_v20  ;;  %v2002_v1 = vrot.slane %v1996_v61, 2  ;;  %v1880_v12 = vmul.f32 %v1878_v0, %v4902_v44 }
 0x24c   : > { %1798 = vrot.lane.b32.xlu0 %v1792_v36, %s6448_s16  ;;  %v1860_v36 = vrot.slane %v1854_v49, 5 }
 0x24d   : > { %v5078_v2 = vpop.permute.xlu1 %1243  ;;  %v2004_v20 = vsel %vm689_vm5, %v2002_v1, %v2003_v63 }
 0x24e   : > { %6689 = vst [vmem:[#allocation109_spill] sm:$0xff] %v5078_v2  ;;  %v5080_v42 = vpop.permute.xlu0 %1266  ;;  %v1998_v2 = vmul.f32 %v1995_v5, %v4930_v13  ;;  %v1884_v5 = vrot.slane %v1880_v12, 6 }
 0x24f   : > { %6690 = vst [vmem:[#allocation110_spill] sm:$0xff] %v5080_v42  ;;  %1915 = vrot.lane.b32.xlu1 %v1910_v60, %s6456_s17  ;;  %v1862_v42 = vsel %vm475_vm8, %v1860_v36, %v1861_v17  ;;  %v1879_v60 = vmul.f32 %v1878_v0, %v4909_v48 }
 0x250   : > { %1867 = vrot.lane.b32.xlu0 %v1864_v46, %s6448_s16  ;;  %v2005_v61 = vrot.slane %v1998_v2, 2  ;;  %v1945_v46 = vstv %s2946_s18  ;;  %s5692_s18 = sld [smem:[#allocation9 + $0x45]] }
 0x251   : > { %v5086_v41 = vpop.permute.xlu1 %1264  ;;  %v1947_v17 = vmul.f32 %v1945_v46, %v4902_v44  ;;  %v1883_v36 = vrot.slane %v1879_v60, 6 }
 0x252   : > { %6691 = vst [vmem:[#allocation111_spill] sm:$0xff] %v5086_v41  ;;  %v5088_v23 = vpop.permute.xlu0 %1285 }
 0x253   : > { %6692 = vst [vmem:[#allocation112_spill] sm:$0xff] %v5088_v23  ;;  %1865 = vrot.lane.b32.xlu1 %v1862_v42, %s6448_s16  ;;  %v1946_v42 = vmul.f32 %v1945_v46, %v4909_v48  ;;  %v1885_v2 = vsel %vm640_vm4, %v1883_v36, %v1884_v5  ;;  %v1953_v23 = vrot.slane %v1947_v17, 2 }
 0x254   : > { %2007 = vrot.lane.b32.xlu0 %v2004_v20, %s6456_s17  ;;  %v2006_v20 = vsel %vm689_vm5, %v2003_v63, %v2005_v61 }
 0x255   : > { %v5097_v15 = vpop.permute.xlu1 %1268 }
 0x256   : > { %6693 = vst [vmem:[#allocation113_spill] sm:$0xff] %v5097_v15  ;;  %v5099_v49 = vpop.permute.xlu0 %1289  ;;  %v1948_v15 = vmul.f32 %v1945_v46, %v4930_v13 }
 0x257   : > { %6694 = vst [vmem:[#allocation114_spill] sm:$0xff] %v5099_v49  ;;  %1869 = vrot.lane.b32.xlu1 %v1863_v11, %s6448_s16  ;;  %v1952_v11 = vrot.slane %v1946_v42, 2 }
 0x258   : > { %2011 = vrot.lane.b32.xlu0 %v2005_v61, %s6456_s17 }
 0x259   : > { %v5105_v1 = vpop.permute.xlu1 %1287  ;;  %v1954_v41 = vsel %vm689_vm5, %v1952_v11, %v1953_v23 }
 0x25a   : > { %6695 = vst [vmem:[#allocation115_spill] sm:$0xff] %v5105_v1  ;;  %v5107_v0 = vpop.permute.xlu0 %1312  ;;  %v1832_v1 = vstv %s2941_s21  ;;  %s5838_s21 = sld [smem:[#allocation9 + $0x4c]] }
 0x25b   : > { %6696 = vst [vmem:[#allocation116_spill] sm:$0xff] %v5107_v0  ;;  %2009 = vrot.lane.b32.xlu1 %v2006_v20, %s6456_s17  ;;  %v1835_v63 = vmul.f32 %v1832_v1, %v4930_v13  ;;  %v1834_v61 = vmul.f32 %v1832_v1, %v4902_v44  ;;  %v1955_v20 = vrot.slane %v1948_v15, 2  ;;  %v1970_v0 = vstv %s2947_s1  ;;  %s5922_s1 = sld [smem:[#allocation9 + $0x3e]] }
 0x25c   : > { %1888 = vrot.lane.b32.xlu0 %v1885_v2, %s6456_s17  ;;  %v2087_v2 = vstv %s2952_s0  ;;  %s5892_s0 = sld [smem:[#allocation9 + $0x61]] }
 0x25d   : > { %v5113_v12 = vpop.permute.xlu1 %1310  ;;  %v2089_v46 = vmul.f32 %v2087_v2, %v4902_v44  ;;  %v1840_v11 = vrot.slane %v1834_v61, 5  ;;  %v1956_v15 = vsel %vm689_vm5, %v1953_v23, %v1955_v20 }
 0x25e   : > { %6697 = vst [vmem:[#allocation117_spill] sm:$0xff] %v5113_v12  ;;  %v5115_v60 = vpop.permute.xlu0 %1335 }
 0x25f   : > { %6698 = vst [vmem:[#allocation118_spill] sm:$0xff] %v5115_v60  ;;  %1886 = vrot.lane.b32.xlu1 %v1883_v36, %s6456_s17  ;;  %v1842_v60 = vrot.slane %v1835_v63, 5  ;;  %v1833_v36 = vmul.f32 %v1832_v1, %v4909_v48 }
 0x260   : > { %1957 = vrot.lane.b32.xlu0 %v1954_v41, %s6456_s17  ;;  %v2088_v41 = vmul.f32 %v2087_v2, %v4909_v48 }
 0x261   : > { %v5123_v17 = vpop.permute.xlu1 %1314  ;;  %v1843_v63 = vsel %vm475_vm8, %v1840_v11, %v1842_v60  ;;  %v1839_v1 = vrot.slane %v1833_v36, 5 }
 0x262   : > { %6699 = vst [vmem:[#allocation119_spill] sm:$0xff] %v5123_v17  ;;  %v5125_v42 = vpop.permute.xlu0 %1356  ;;  %v2094_v61 = vrot.slane %v2088_v41, 7 }
 0x263   : > { %6700 = vst [vmem:[#allocation120_spill] sm:$0xff] %v5125_v42  ;;  %1890 = vrot.lane.b32.xlu1 %v1884_v5, %s6456_s17  ;;  %v2095_v42 = vrot.slane %v2089_v46, 7  ;;  %v1972_v5 = vmul.f32 %v1970_v0, %v4902_v44  ;;  %v1841_v23 = vsel %vm475_vm8, %v1839_v1, %v1840_v11  ;;  %v2090_v46 = vmul.f32 %v2087_v2, %v4930_v13 }
 0x264   : > { %1961 = vrot.lane.b32.xlu0 %v1955_v20, %s6456_s17 }
 0x265   : > { %v5132_v49 = vpop.permute.xlu1 %1337  ;;  %v2096_v60 = vsel %vm805_vm6, %v2094_v61, %v2095_v42  ;;  %v1978_v20 = vrot.slane %v1972_v5, 2  ;;  %v2097_v5 = vrot.slane %v2090_v46, 7  ;;  %v1924_v46 = vstv %s2945_s15  ;;  %s3210_s15 = smov 32  }
 0x266   : > { %6701 = vst [vmem:[#allocation121_spill] sm:$0xff] %v5132_v49  ;;  %v5134_v12 = vpop.permute.xlu0 %1360  ;;  %v1971_v49 = vmul.f32 %v1970_v0, %v4909_v48  ;;  %v1927_v30 = vmul.f32 %v1924_v46, %v4930_v13 }
 0x267   : > { %6702 = vst [vmem:[#allocation122_spill] sm:$0xff] %v5134_v12  ;;  %1959 = vrot.lane.b32.xlu1 %v1956_v15, %s6456_s17  ;;  %v1973_v15 = vmul.f32 %v1970_v0, %v4930_v13 }
 0x268   : > { %1846 = vrot.lane.b32.xlu0 %v1843_v63, %s6448_s16  ;;  %v1977_v36 = vrot.slane %v1971_v49, 2  ;;  %v2041_v63 = vstv %s5136_s3  ;;  %v1934_v24 = vrot.slane %v1927_v30, 2  ;;  %v1551_v30 = vstv %s5227_s7  ;;  %s2969_s3 = sld [smem:[#allocation9 + $0x5a]] }
 0x269   : > { %v5144_v28 = vpop.permute.xlu1 %1358  ;;  %v5169_v1 = vmul.f32 %v2041_v63, %v4902_v44  ;;  %v2042_v49 = vmul.f32 %v2041_v63, %v4909_v48  ;;  %v1458_v63 = vstv %s5155_s25  ;;  %s3213_s25 = smov 80  }
 0x26a   : > { %6703 = vst [vmem:[#allocation123_spill] sm:$0xff] %v5144_v28  ;;  %v5146_v12 = vpop.permute.xlu0 %1383  ;;  %v1979_v2 = vsel %vm689_vm5, %v1977_v36, %v1978_v20  ;;  %v2098_v36 = vsel %vm805_vm6, %v2095_v42, %v2097_v5  ;;  %v1925_v28 = vmul.f32 %v1924_v46, %v4909_v48  ;;  %v5200_v5 = vstv %s5159_s11  ;;  %s3215_s11 = smov 112  }
 0x26b   : > { %6704 = vst [vmem:[#allocation124_spill] sm:$0xff] %v5146_v12  ;;  %1844 = vrot.lane.b32.xlu1 %v1841_v23, %s6448_s16  ;;  %s5173_s16 = sld [smem:[#allocation9 + $0x46]]  ;;  %v5191_v12 = vstv %s2924_s5  ;;  %v6711_v3 = vrot.slane %v5169_v1, 7  ;;  %s3214_s5 = smov 96  }
 0x26c   : > { %2101 = vrot.lane.b32.xlu0 %v2096_v60, %s3205_s20  ;;  %v1980_v60 = vrot.slane %v1973_v15, 2  ;;  %v2046_v15 = vrot.slane %v2042_v49, 7  ;;  %v5220_v53 = vmul.f32 %v5191_v12, %v4909_v48 }
 0x26d   : > { %v5161_v41 = vpop.permute.xlu1 %1381 }
 0x26e   : > { %6705 = vst [vmem:[#allocation125_spill] sm:$0xff] %v5161_v41  ;;  %v5163_v11 = vpop.permute.xlu0 %1406  ;;  %v1443_v41 = vstv %s5153_s2  ;;  %v2048_v55 = vsel %vm805_vm6, %v2046_v15, %v6711_v3  ;;  %s3212_s2 = smov 64  }
 0x26f   : > { %6706 = vst [vmem:[#allocation126_spill] sm:$0xff] %v5163_v11  ;;  %2099 = vrot.lane.b32.xlu1 %v2094_v61, %s3205_s20  ;;  %v2183_v61 = vstv %s2956_s23  ;;  %v5255_v43 = vmul.f32 %v1443_v41, %v4902_v44  ;;  %s6925_s23 = sld [smem:[#allocation18_spill]] }
 0x270   : > { %1982 = vrot.lane.b32.xlu0 %v1979_v2, %s6456_s17  ;;  %v5185_v2 = vmul.f32 %v1924_v46, %v4902_v44  ;;  %v5210_v4 = vmul.f32 %v2183_v61, %v4902_v44 }
 0x271   : > { %v5176_v0 = vpop.permute.xlu1 %1385  ;;  %v5225_v3 = vstv %s5173_s16  ;;  %6716 = vst [vmem:[#allocation135_spill] sm:$0xff] %v5255_v43  ;;  %s6927_s16 = sld [smem:[#allocation24_spill]] }
 0x272   : > { %6707 = vst [vmem:[#allocation127_spill] sm:$0xff] %v5176_v0  ;;  %v5178_v23 = vpop.permute.xlu0 %1410  ;;  %v407_v0 = vstv %s5148_s14  ;;  %v1932_v49 = vrot.slane %v5185_v2, 2  ;;  %v5232_v2 = vmul.f32 %v5200_v5, %v4909_v48  ;;  %v2191_v27 = vrot.slane %v5210_v4, 3  ;;  %s3211_s14 = smov 48  }
 0x273   : > { %6708 = vst [vmem:[#allocation128_spill] sm:$0xff] %v5178_v23  ;;  %2103 = vrot.lane.b32.xlu1 %v2098_v36, %s3205_s20  ;;  %v5202_v23 = vstv %s2927_s28  ;;  %v1981_v36 = vsel %vm689_vm5, %v1978_v20, %v1980_v60  ;;  %v1931_v20 = vrot.slane %v1925_v28, 2  ;;  %v408_v28 = vmul.f32 %v4659_v39, %v407_v0  ;;  %s6926_s28 = sld [smem:[#allocation23_spill]] }
 0x274   : > { %1986 = vrot.lane.b32.xlu0 %v1980_v60, %s6456_s17  ;;  %v2184_v60 = vmul.f32 %v2183_v61, %v4909_v48  ;;  %v5236_v17 = vmul.f32 %v5202_v23, %v4909_v48  ;;  %v5262_v39 = vmul.f32 %v5225_v3, %v4909_v48 }
 0x275   : > { %v5195_v11 = vpop.permute.xlu1 %1408  ;;  %v1933_v37 = vsel %vm689_vm5, %v1931_v20, %v1932_v49  ;;  %v2186_v20 = vmul.f32 %v2183_v61, %v4930_v13  ;;  %v6725_v61 = vrot.slane %v5169_v1, 7  ;;  %s2977_s7 = sshll.u32 %s6925_s23, 7 }
 0x276   : > { %6709 = vst [vmem:[#allocation129_spill] sm:$0xff] %v5195_v11  ;;  %v5197_v42 = vpop.permute.xlu0 %1433  ;;  %v5213_v11 = vmul.f32 %v1443_v41, %v4909_v48  ;;  %6717 = vst [vmem:[#allocation136_spill] sm:$0xff] %v5262_v39  ;;  %v2190_v4 = vrot.slane %v2184_v60, 3  ;;  %v6721_v60 = vld [vmem:[#allocation38_spill] sm:$0xff] }
 0x277   : > { %6710 = vst [vmem:[#allocation130_spill] sm:$0xff] %v5197_v42  ;;  %v5216_v42 = vmul.f32 %v1458_v63, %v4909_v48  ;;  %1984 = vrot.lane.b32.xlu1 %v1981_v36, %s6456_s17 }
 0x278   : > { %6712 = vst [vmem:[#allocation131_spill] sm:$0xff] %v5213_v11  ;;  %2051 = vrot.lane.b32.xlu0 %v2048_v55, %s3205_s20  ;;  %v2192_v46 = vsel %vm879_vm9, %v2190_v4, %v2191_v27 }
 0x279   : > { %6713 = vst [vmem:[#allocation132_spill] sm:$0xff] %v5216_v42  ;;  %v5240_v36 = vpop.permute.xlu1 %1431 }
 0x27a   : > { %6714 = vst [vmem:[#allocation133_spill] sm:$0xff] %v5240_v36  ;;  %v5242_v55 = vpop.permute.xlu0 %1577  ;;  %v6718_v36 = vld [vmem:[#allocation37_spill] sm:$0xff] }
 0x27b   : > { %6715 = vst [vmem:[#allocation134_spill] sm:$0xff] %v5242_v55  ;;  %2049 = vrot.lane.b32.xlu1 %v2046_v15, %s3205_s20  ;;  %v3068_v55 = vld [vmem:[#allocation2 + $0x10] sm:$0x3f]  ;;  %v1460_v15 = vmul.f32 %v1458_v63, %v4902_v44 }
 0x27c   : > { %1936 = vrot.lane.b32.xlu0 %v1933_v37, %s6456_s17  ;;  %v5267_v41 = vmul.f32 %v3068_v55, %v407_v0  ;;  %v394_v31 = vmul.f32 %v3068_v55, %v6718_v36  ;;  %v402_v39 = vmul.f32 %v3068_v55, %v6721_v60  ;;  %v6723_v36 = vrot.slane %v6722_v6, 4  ;;  %v6726_v55 = vld [vmem:[#allocation36_spill] sm:$0xff] }
 0x27d   : > { %v5271_v37 = vpop.permute.xlu1 %1575  ;;  %v6727_v4 = vrot.slane %v6726_v55, 4  ;;  %v5297_v6 = vmul.f32 %v3069_v14, %v407_v0  ;;  %v1935_v14 = vsel %vm689_vm5, %v1932_v49, %v1934_v24  ;;  %v5334_v24 = vmul.f32 %v5200_v5, %v4930_v13 }
 0x27e   : > { %6719 = vst [vmem:[#allocation37_spill] sm:$0xff] %v5271_v37  ;;  %v5273_v7 = vpop.permute.xlu0 %1593  ;;  %v5284_v52 = vadd.f32 %v6723_v36, %v394_v31  ;;  %v2063_v31 = vmul.f32 %v5245_v47, %v4909_v48  ;;  %v2133_v36 = vstv %s5238_s22  ;;  %v1466_v37 = vrot.slane %v1460_v15, 7  ;;  %s6929_s22 = sshll.u32 %s6926_s28, 3 }
 0x27f   : > { %6720 = vst [vmem:[#allocation137_spill] sm:$0xff] %v5273_v7  ;;  %v1461_v7 = vmul.f32 %v1458_v63, %v4930_v13  ;;  %2053 = vrot.lane.b32.xlu1 %v6725_v61, %s3205_s20  ;;  %v5295_v60 = vadd.f32 %v6727_v4, %v402_v39  ;;  %v1479_v63 = vmul.f32 %v5191_v12, %v4902_v44  ;;  %v6730_v15 = vrot.slane %v5255_v43, 7 }
 0x280   : > { %6724 = vst [vmem:[#allocation38_spill] sm:$0xff] %v5284_v52  ;;  %2195 = vrot.lane.b32.xlu0 %v2192_v46, %s3205_s20  ;;  %v2193_v46 = vrot.slane %v2186_v20, 3  ;;  %v5309_v52 = vstv %s5247_s26  ;;  %v5312_v39 = vadd.f32 %v4653_v16, %v408_v28  ;;  %v5317_v55 = vmul.f32 %v2133_v36, %v4902_v44  ;;  %6732 = vst [vmem:[#allocation138_spill] sm:$0xff] %v5334_v24  ;;  %s201_s26 = scalar_lea.vmem [#allocation10], %s6929_s22 }
 0x281   : > { %v5304_v1 = vpop.permute.xlu1 %1591  ;;  %v6731_v4 = vrot.slane %v5213_v11, 7  ;;  %v1468_v20 = vrot.slane %v1461_v7, 7  ;;  %v1515_v16 = vmul.f32 %v5200_v5, %v4902_v44  ;;  %v1534_v49 = vmul.f32 %v5202_v23, %v4902_v44 }
 0x282   : > { %6728 = vst [vmem:[#allocation35_spill] sm:$0xff] %v5304_v1  ;;  %v5306_v61 = vpop.permute.xlu0 %1611  ;;  %v2069_v28 = vrot.slane %v2063_v31, 7  ;;  %v2134_v7 = vmul.f32 %v2133_v36, %v4909_v48  ;;  %v2194_v43 = vsel %vm879_vm9, %v2191_v27, %v2193_v46  ;;  %v6738_v31 = vrot.slane %v5280_v35, 7 }
 0x283   : > { %6729 = vst [vmem:[#allocation36_spill] sm:$0xff] %v5306_v61  ;;  %v5324_v1 = vsel %vm805_vm6, %v6731_v4, %v6730_v15  ;;  %v1480_v61 = vmul.f32 %v5191_v12, %v4930_v13  ;;  %1938 = vrot.lane.b32.xlu1 %v1935_v14, %s6456_s17  ;;  %v6733_v15 = vrot.slane %v5216_v42, 7  ;;  %v1485_v4 = vrot.slane %v1479_v63, 7 }
 0x284   : > { %2199 = vrot.lane.b32.xlu0 %v2193_v46, %s3205_s20  ;;  %v5348_v14 = vmul.f32 %v5202_v23, %v4930_v13  ;;  %v2071_v42 = vsel %vm805_vm6, %v2069_v28, %v6738_v31  ;;  %v2141_v63 = vrot.slane %v5317_v55, 3  ;;  %v5365_v23 = vsel %vm805_vm6, %v1466_v37, %v1468_v20 }
 0x285   : > { %v5342_v12 = vsel %vm805_vm6, %v6733_v15, %v1466_v37  ;;  %v5344_v0 = vpop.permute.xlu1 %1595  ;;  %v5359_v15 = vmul.f32 %v1551_v30, %v4930_v13  ;;  %v1553_v27 = vmul.f32 %v1551_v30, %v4902_v44  ;;  %v1540_v31 = vrot.slane %v1534_v49, 3 }
 0x286   : > { %6734 = vst [vmem:[#allocation139_spill] sm:$0xff] %v5342_v12  ;;  %6735 = vst [vmem:[#allocation140_spill] sm:$0xff] %v5344_v0  ;;  %v5350_v5 = vpop.permute.xlu0 %1615  ;;  %v2065_v0 = vmul.f32 %v5245_v47, %v4930_v13  ;;  %v1487_v12 = vrot.slane %v1480_v61, 7  ;;  %v2140_v55 = vrot.slane %v2134_v7, 3  ;;  %v2136_v11 = vmul.f32 %v2133_v36, %v4930_v13 }
 0x287   : > { %6736 = vst [vmem:[#allocation141_spill] sm:$0xff] %v5348_v14  ;;  %6737 = vst [vmem:[#allocation142_spill] sm:$0xff] %v5350_v5  ;;  %v1521_v5 = vrot.slane %v1515_v16, 3  ;;  %2197 = vrot.lane.b32.xlu1 %v2194_v43, %s3205_s20  ;;  %v6739_v47 = vrot.slane %v5220_v53, 7  ;;  %v1552_v20 = vmul.f32 %v1551_v30, %v4909_v48  ;;  %v2023_v16 = vmul.f32 %v5309_v52, %v4930_v13 }
 0x288   : > { %2076 = vrot.lane.b32.xlu0 %v2071_v42, %s3205_s20  ;;  %v2142_v49 = vsel %vm879_vm9, %v2140_v55, %v2141_v63  ;;  %v2072_v7 = vrot.slane %v2065_v0, 7  ;;  %v5398_v43 = vsel %vm805_vm6, %v1485_v4, %v1487_v12  ;;  %v5402_v30 = vmul.f32 %v5225_v3, %v4902_v44 }
 0x289   : > { %v5379_v37 = vsel %vm805_vm6, %v6739_v47, %v1485_v4  ;;  %v5382_v42 = vpop.permute.xlu1 %1613  ;;  %v2022_v47 = vmul.f32 %v5309_v52, %v4902_v44  ;;  %v5406_v46 = vmul.f32 %v5225_v3, %v4930_v13  ;;  %v1559_v36 = vrot.slane %v1553_v27, 3 }
 0x28a   : > { %6740 = vst [vmem:[#allocation143_spill] sm:$0xff] %v5382_v42  ;;  %v5384_v61 = vpop.permute.xlu0 %1633  ;;  %v6742_v0 = vrot.slane %v5334_v24, 3  ;;  %v6744_v12 = vrot.slane %v5232_v2, 3  ;;  %v6746_v42 = vrot.slane %v5236_v17, 3  ;;  %v2143_v27 = vrot.slane %v2136_v11, 3 }
 0x28b   : > { %6741 = vst [vmem:[#allocation144_spill] sm:$0xff] %v5406_v46  ;;  %2074 = vrot.lane.b32.xlu1 %v2069_v28, %s3205_s20  ;;  %v1558_v46 = vrot.slane %v1552_v20, 3  ;;  %v2030_v24 = vrot.slane %v2023_v16, 6  ;;  %v2021_v2 = vmul.f32 %v5309_v52, %v4909_v48  ;;  %v6750_v17 = vrot.slane %v5348_v14, 3 }
 0x28c   : > { %2145 = vrot.lane.b32.xlu0 %v2142_v49, %s3205_s20  ;;  %v5413_v55 = vsel %vm879_vm9, %v1521_v5, %v6742_v0  ;;  %v5418_v4 = vsel %vm879_vm9, %v6744_v12, %v1521_v5  ;;  %v5423_v3 = vsel %vm879_vm9, %v6746_v42, %v1540_v31  ;;  %v2158_v0 = vstv %s5353_s27  ;;  %s2781_s27 = sshll.u32 %s201_s26, 4  ;;  %s6156_s27 = int_to_ptr.vmem [resolvable:$true] %s2781_s27 }
 0x28d   : > { %6743 = vst [vmem:[#allocation145_spill] sm:$0xff] %v5413_v55  ;;  %6745 = vst [vmem:[#allocation146_spill] sm:$0xff] %v5418_v4  ;;  %v5425_v28 = vpop.permute.xlu1 %1631  ;;  %v5437_v5 = vsel %vm879_vm9, %v1540_v31, %v6750_v17  ;;  %v6752_v11 = vrot.slane %v5359_v15, 3  ;;  %v6753_v20 = vrot.slane %v5280_v35, 7  ;;  %v2028_v12 = vrot.slane %v2022_v47, 6 }
 0x28e   : > { %6747 = vst [vmem:[#allocation147_spill] sm:$0xff] %v5423_v3  ;;  %6748 = vst [vmem:[#allocation148_spill] sm:$0xff] %v5425_v28  ;;  %v5427_v49 = vpop.permute.xlu0 %1656  ;;  %v5450_v52 = vsel %vm879_vm9, %v1558_v46, %v1559_v36  ;;  %v2160_v31 = vmul.f32 %v2158_v0, %v4902_v44  ;;  %v5456_v17 = vmul.f32 %v2158_v0, %v4930_v13  ;;  %v2112_v35 = vstv %s5370_s30 }
 0x28f   : > { %6749 = vst [vmem:[#allocation149_spill] sm:$0xff] %v5427_v49  ;;  %6751 = vst [vmem:[#allocation150_spill] sm:$0xff] %v5437_v5  ;;  %v5442_v42 = vsel %vm879_vm9, %v1559_v36, %v6752_v11  ;;  %v2073_v16 = vsel %vm805_vm6, %v6753_v20, %v2072_v7  ;;  %v2144_v7 = vsel %vm879_vm9, %v2141_v63, %v2143_v27  ;;  %v5461_v47 = vstv %s5374_s4 }
 0x290   : > { %2078 = vrot.lane.b32.xlu1 %v2073_v16, %s3205_s20  ;;  %2149 = vrot.lane.b32.xlu0 %v2143_v27, %s3205_s20  ;;  %v2159_v11 = vmul.f32 %v2158_v0, %v4909_v48  ;;  %v2114_v46 = vmul.f32 %v2112_v35, %v4902_v44  ;;  %v2031_v16 = vsel %vm640_vm4, %v2028_v12, %v2030_v24  ;;  %v2027_v49 = vrot.slane %v2021_v2, 6 }
 0x291   : > { %v5467_v36 = vpop.permute.xlu1 %1635  ;;  %v2264_v3 = vmul.f32 %v5461_v47, %v4902_v44  ;;  %v5475_v5 = vstv %s5389_s8  ;;  %v490_v63 = vadd.f32 %v4682_v10, %v5267_v41  ;;  %v2113_v27 = vmul.f32 %v2112_v35, %v4909_v48  ;;  %s6930_s8 = sld [smem:[#allocation159_spill]] }
 0x292   : > { %v5469_v20 = vpop.permute.xlu0 %1677  ;;  %v2353_v0 = vstv %s5395_s9  ;;  %v2115_v4 = vmul.f32 %v2112_v35, %v4930_v13  ;;  %v2263_v24 = vmul.f32 %v5461_v47, %v4909_v48  ;;  %v2166_v2 = vrot.slane %v2160_v31, 3 }
 0x293   : > { %6754 = vst [vmem:[#allocation151_spill] sm:$0xff] %v5469_v20  ;;  %v2168_v20 = vrot.slane %v5456_v17, 3  ;;  %v5488_v55 = vmul.f32 %v2353_v0, %v4902_v44  ;;  %v587_v10 = vadd.f32 %v4696_v33, %v490_v63  ;;  %v2029_v41 = vsel %vm640_vm4, %v2027_v49, %v2028_v12 }
 0x294   : > { %2147 = vrot.lane.b32.xlu1 %v2144_v7, %s3205_s20  ;;  %2034 = vrot.lane.b32.xlu0 %v2031_v16, %s6456_s17  ;;  %v2165_v35 = vrot.slane %v2159_v11, 3  ;;  %v2120_v28 = vrot.slane %v2114_v46, 3  ;;  %v5500_v31 = vmul.f32 %v5475_v5, %v4902_v44  ;;  %v5504_v17 = vmul.f32 %v5475_v5, %v4909_v48 }
 0x295   : > { %v5494_v7 = vpop.permute.xlu1 %1658  ;;  %v5507_v33 = vmul.f32 %v2353_v0, %v4909_v48  ;;  %v5510_v49 = vstv %s5432_s13  ;;  %v680_v12 = vadd.f32 %v4783_v59, %v587_v10  ;;  %v2119_v11 = vrot.slane %v2113_v27, 3  ;;  %s2767_s13 = scalar_lea.sflag [#allocation7], %s6926_s28 }
 0x296   : > { %6755 = vst [vmem:[#allocation152_spill] sm:$0xff] %v5494_v7  ;;  %v5496_v16 = vpop.permute.xlu0 %1681  ;;  %v2122_v46 = vrot.slane %v2115_v4, 3  ;;  %v2303_v63 = vstv %s5447_s19  ;;  %v2167_v7 = vsel %vm879_vm9, %v2165_v35, %v2166_v2  ;;  %v5521_v0 = vmul.f32 %v5510_v49, %v4902_v44  ;;  %s3119_s19 = scalar_lea.vmem %s6156_s27, 128 }
 0x297   : > { %6756 = vst [vmem:[#allocation153_spill] sm:$0xff] %v5496_v16  ;;  %v2169_v16 = vsel %vm879_vm9, %v2166_v2, %v2168_v20  ;;  %v489_v59 = vadd.f32 %v4728_v58, %v5297_v6  ;;  %v5526_v4 = vsel %vm879_vm9, %v2119_v11, %v2120_v28  ;;  %v5530_v27 = vmul.f32 %v5510_v49, %v4909_v48  ;;  %s6154_s9 = scalar_lea.hbm %s6930_s8, %s2977_s7  ;;  %p3120_p9 = scmp.ne.s32.totalorder %s6156_s27, %s3119_s19 }
 0x298   : > { %2032 = vrot.lane.b32.xlu1 %v2029_v41, %s6456_s17  ;;  %2271 = vrot.lane.b32.xlu0 %v2264_v3, %s3206_s6  ;;  %v2208_v3 = vstv %s5465_s24  ;;  %s5533_s17 = sld [smem:[#allocation9 + $0x60]]  ;;  %v2304_v35 = vmul.f32 %v2303_v63, %v4909_v48  ;;  %v2305_v58 = vmul.f32 %v2303_v63, %v4902_v44  ;;  %v5543_v6 = vmul.f32 %v2303_v63, %v4930_v13  ;;  %s3216_s24 = smov [#allocation10]  }
 0x299   : > { %6757 = vst [vmem:[#allocation154_spill] sm:$0xff] %v5530_v27  ;;  %v5535_v2 = vpop.permute.xlu1 %1679  ;;  %v586_v11 = vadd.f32 %v4748_v25, %v489_v59  ;;  %v585_v14 = vadd.f32 %v4764_v57, %v5312_v39  ;;  %v777_v27 = vadd.f32 %v4720_v40, %v680_v12  ;;  %v6760_v41 = vrot.slane %v5488_v55, 5  ;;  %p3121_p13 = pnand %p3120_p9, %p6931_p11 }
 0x29a   : > { %6758 = vst [vmem:[#allocation155_spill] sm:$0xff] %v5535_v2  ;;  %v5537_v10 = vpop.permute.xlu0 %1704  ;;  %v5550_v2 = vsel %vm879_vm9, %v2120_v28, %v2122_v46  ;;  %v5562_v25 = vmul.f32 %v2208_v3, %v4902_v44  ;;  %v5565_v57 = vmul.f32 %v2208_v3, %v4909_v48  ;;  %v562_v40 = vadd.f32 %v4690_v9, %v5295_v60  ;;  %v5579_v48 = vld [vmem:[#allocation2 + $0x20] sm:$0xff] }
 0x29b   : > { %6759 = vst [vmem:[#allocation156_spill] sm:$0xff] %v5537_v10  ;;  %v6761_v10 = vrot.slane %v5507_v33, 5  ;;  %v679_v39 = vadd.f32 %v4789_v56, %v586_v11  ;;  %v870_v28 = vadd.f32 %v4853_v29, %v777_v27  ;;  %v2265_v46 = vmul.f32 %v5461_v47, %v4930_v13  ;;  %v6762_v3 = vld [vmem:[#allocation58_spill] sm:$0xff]  ;;  %p3122_p7 = pneg %p3121_p13 }
 0x29c   : > { %2269 = vrot.lane.b32.xlu1 %v2263_v24, %s3206_s6  ;;  %2170 = vrot.lane.b32.xlu0 %v2167_v7, %s3205_s20  ;;  %v2445_v24 = vstv %s5492_s12  ;;  %v2311_v44 = vrot.slane %v2305_v58, 4  ;;  %v6326_v59 = vrot.slane %v5543_v6, 4  ;;  %v655_v56 = vadd.f32 %v4704_v51, %v562_v40  ;;  %v5595_v58 = vld [vmem:[#allocation2 + $0x18] sm:$0xff]  ;;  %s3123_s12 = sshll.u32 %s3216_s24, 4  ;;  %s3124_s12 = int_to_ptr.vmem [resolvable:$false] %s3123_s12 }
 0x29d   : > { %v5559_v63 = vsel %vm475_vm8, %v6761_v10, %v6760_v41  ;;  %v5572_v7 = vpop.permute.xlu1 %1702  ;;  %v5582_v9 = vmul.f32 %v5579_v48, %v2445_v24  ;;  %v776_v29 = vadd.f32 %v4817_v38, %v679_v39  ;;  %v678_v60 = vadd.f32 %v4662_v34, %v585_v14  ;;  %v6763_v14 = vld [vmem:[#allocation57_spill] sm:$0xff]  ;;  %v6764_v39 = vld [vmem:[#allocation75_spill] sm:$0xff]  ;;  %p3126_p0 = scmp.lt.s32.totalorder %s6156_s27, %s3124_s12 }
 0x29e   : > { %v5574_v12 = vpop.permute.xlu0 %1723  ;;  %v967_v27 = vadd.f32 %v4914_v45, %v870_v28  ;;  %v536_v47 = vadd.f32 %v4730_v32, %v6762_v3  ;;  %v2310_v10 = vrot.slane %v2304_v35, 4  ;;  %v5593_v41 = vmul.f32 %v2445_v24, %v4930_v13  ;;  %v6770_v3 = vld [vmem:[#allocation38_spill] sm:$0xff] }
 0x29f   : > { %v5598_v51 = vmul.f32 %v5595_v58, %v2445_v24  ;;  %v775_v34 = vadd.f32 %v4824_v22, %v678_v60  ;;  %v869_v38 = vadd.f32 %v4859_v8, %v776_v29  ;;  %v5604_v32 = vstv %s5533_s17  ;;  %v6765_v24 = vld [vmem:[#allocation29_spill] sm:$0xff]  ;;  %s3125_s17 = scalar_lea.vmem %s3124_s12, 256 }
 0x2a0   : > { %2273 = vrot.lane.b32.xlu1 %v2265_v46, %s3206_s6  ;;  %2174 = vrot.lane.b32.xlu0 %v2168_v20, %s3205_s20  ;;  %v1041_v45 = vadd.f32 %v4954_v21, %v967_v27  ;;  %v535_v20 = vadd.f32 %v4746_v19, %v6763_v14  ;;  %v632_v35 = vadd.f32 %v4781_v62, %v536_v47  ;;  %v6771_v47 = vld [vmem:[#allocation72_spill] sm:$0xff]  ;;  %p3127_p3 = scmp.lt.s32.totalorder %s3125_s17, %s3119_s19 }
 0x2a1   : > { %v5609_v13 = vpop.permute.xlu1 %1706  ;;  %v5614_v40 = vsel %vm206_vm0, %v2310_v10, %v2311_v44  ;;  %v5619_v22 = vsel %vm206_vm0, %v2311_v44, %v6326_v59  ;;  %v752_v8 = vadd.f32 %v4706_v50, %v655_v56  ;;  %v868_v21 = vadd.f32 %v4844_v18, %v775_v34  ;;  %v6766_v50 = vld [vmem:[#allocation60_spill] sm:$0xff]  ;;  %v6767_v18 = vld [vmem:[#allocation71_spill] sm:$0xff]  ;;  %v6772_v34 = vld [vmem:[#allocation34_spill] sm:$0xff] }
 0x2a2   : > { %v5611_v11 = vpop.permute.xlu0 %1727  ;;  %v966_v19 = vadd.f32 %v4896_v26, %v869_v38  ;;  %v1133_v62 = vadd.f32 %v5022_v54, %v1041_v45  ;;  %v631_v28 = vadd.f32 %v6764_v39, %v535_v20  ;;  %v726_v46 = vadd.f32 %v6765_v24, %v632_v35  ;;  %v6768_v26 = vld [vmem:[#allocation86_spill] sm:$0xff]  ;;  %v6773_v38 = vld [vmem:[#allocation43_spill] sm:$0xff]  ;;  %v6775_v35 = vld [vmem:[#allocation45_spill] sm:$0xff]  ;;  %p3128_p12 = por %p3127_p3, %p3126_p0 }
 0x2a3   : > { %v5632_v44 = vmul.f32 %v5595_v58, %v5604_v32  ;;  %v845_v56 = vadd.f32 %v6766_v50, %v752_v8  ;;  %v965_v29 = vadd.f32 %v6767_v18, %v868_v21  ;;  %v6769_v54 = vld [vmem:[#allocation106_spill] sm:$0xff]  ;;  %v537_v10 = vadd.f32 %v6771_v47, %v6770_v3  ;;  %v6776_v21 = vld [vmem:[#allocation84_spill] sm:$0xff]  ;;  %v6778_v24 = vld [vmem:[#allocation119_spill] sm:$0xff] }
 0x2a4   : > { %2172 = vrot.lane.b32.xlu1 %v2169_v16, %s3205_s20  ;;  %2231 = vrot.lane.b32.xlu0 %v5500_v31, %s3206_s6  ;;  %v1040_v60 = vadd.f32 %v6768_v26, %v966_v19  ;;  %v1229_v27 = vadd.f32 %v6769_v54, %v1133_v62  ;;  %v725_v16 = vadd.f32 %v6772_v34, %v631_v28  ;;  %v6777_v62 = vld [vmem:[#allocation95_spill] sm:$0xff]  ;;  %v6780_v26 = vld [vmem:[#allocation46_spill] sm:$0xff]  ;;  %p3129_p5 = pnand %p3128_p12, %p3122_p7 }
 0x2a5   : > { %v819_v45 = vadd.f32 %v6773_v38, %v726_v46  ;;  %v5642_v31 = vpop.permute.xlu1 %1725  ;;  %v5648_v20 = vmul.f32 %v5579_v48, %v5604_v32  ;;  %v942_v8 = vadd.f32 %v6775_v35, %v845_v56  ;;  %v1039_v19 = vadd.f32 %v6776_v21, %v965_v29  ;;  %v6779_v18 = vld [vmem:[#allocation51_spill] sm:$0xff]  ;;  %v6781_v29 = vld [vmem:[#allocation85_spill] sm:$0xff] }
 0x2a6   : > { %v5644_v14 = vpop.permute.xlu0 %1750  ;;  %v1132_v39 = vadd.f32 %v6777_v62, %v1040_v60  ;;  %v1321_v50 = vadd.f32 %v6778_v24, %v1229_v27  ;;  %v633_v28 = vadd.f32 %v6779_v18, %v537_v10  ;;  %v5660_v54 = vld [vmem:[#allocation2 + $0x28] sm:$0x3f]  ;;  %v6782_v60 = vld [vmem:[#allocation96_spill] sm:$0xff]  ;;  %v6786_v21 = vld [vmem:[#allocation69_spill] sm:$0xff] }
 0x2a7   : > { %6774 = vst [vmem:[#allocation58_spill] sm:$0xff] %v5644_v14  ;;  %v916_v46 = vadd.f32 %v6780_v26, %v819_v45  ;;  %v2225_v56 = vmul.f32 %v5660_v54, %v5475_v5  ;;  %v1021_v3 = vadd.f32 %v6781_v29, %v942_v8  ;;  %v1131_v47 = vadd.f32 %v6782_v60, %v1039_v19  ;;  %v6783_v27 = vld [vmem:[#allocation107_spill] sm:$0xff]  ;;  %v6784_v10 = vld [vmem:[#allocation128_spill] sm:$0xff]  ;;  %v6787_v62 = vld [vmem:[#allocation81_spill] sm:$0xff] }
 0x2a8   : > { %2229 = vrot.lane.b32.xlu1 %v5504_v17, %s3206_s6  ;;  %2124 = vrot.lane.b32.xlu0 %v5526_v4, %s3205_s20  ;;  %v1228_v34 = vadd.f32 %v6783_v27, %v1132_v39  ;;  %v1417_v38 = vadd.f32 %v6784_v10, %v1321_v50  ;;  %v6785_v45 = vld [vmem:[#allocation52_spill] sm:$0xff]  ;;  %v818_v17 = vadd.f32 %v6786_v21, %v725_v16  ;;  %v6790_v19 = vld [vmem:[#allocation54_spill] sm:$0xff]  ;;  %v6791_v39 = vld [vmem:[#allocation93_spill] sm:$0xff] }
 0x2a9   : > { %v727_v35 = vadd.f32 %v6785_v45, %v633_v28  ;;  %v1000_v24 = vadd.f32 %v6787_v62, %v916_v46  ;;  %v5671_v4 = vpop.permute.xlu1 %1748  ;;  %v5677_v5 = vmul.f32 %v5660_v54, %v5510_v49  ;;  %v6789_v8 = vld [vmem:[#allocation56_spill] sm:$0xff]  ;;  %v1112_v29 = vadd.f32 %v6791_v39, %v1021_v3  ;;  %v6794_v16 = vld [vmem:[#allocation42_spill] sm:$0xff]  ;;  %v6796_v45 = vld [vmem:[#allocation65_spill] sm:$0xff] }
 0x2aa   : > { %6788 = vst [vmem:[#allocation57_spill] sm:$0xff] %v5671_v4  ;;  %v5673_v18 = vpop.permute.xlu0 %1771  ;;  %v560_v26 = vadd.f32 %v6790_v19, %v6789_v8  ;;  %v6792_v50 = vld [vmem:[#allocation104_spill] sm:$0xff]  ;;  %v915_v21 = vadd.f32 %v6796_v45, %v818_v17  ;;  %v6797_v62 = vld [vmem:[#allocation89_spill] sm:$0xff]  ;;  %v6798_v49 = vrot.slane %v5507_v33, 5 }
 0x2ab   : > { %v1227_v60 = vadd.f32 %v6792_v50, %v1131_v47  ;;  %v6793_v28 = vld [vmem:[#allocation116_spill] sm:$0xff]  ;;  %v1086_v59 = vadd.f32 %v6797_v62, %v1000_v24  ;;  %v6799_v3 = vld [vmem:[#allocation105_spill] sm:$0xff] }
 0x2ac   : > { %v1320_v27 = vadd.f32 %v6793_v28, %v1228_v34  ;;  %v6795_v10 = vld [vmem:[#allocation28_spill] sm:$0xff]  ;;  %2233 = vrot.lane.b32.xlu1 %v2225_v56, %s3206_s6  ;;  %2361 = vrot.lane.b32.xlu0 %v6798_v49, %s3207_s10  ;;  %v1204_v8 = vadd.f32 %v6799_v3, %v1112_v29  ;;  %v6800_v47 = vld [vmem:[#allocation117_spill] sm:$0xff]  ;;  %v1494_v34 = vadd.f32 %v5398_v43, %v1417_v38  ;;  %v6805_v56 = vld [vmem:[#allocation78_spill] sm:$0xff] }
 0x2ad   : > { %v561_v46 = vadd.f32 %v6795_v10, %v6794_v16  ;;  %v1319_v19 = vadd.f32 %v6800_v47, %v1227_v60  ;;  %v6801_v39 = vld [vmem:[#allocation129_spill] sm:$0xff]  ;;  %v6806_v62 = vld [vmem:[#allocation48_spill] sm:$0xff]  ;;  %v5703_v49 = vpop.permute.xlu1 %1769  ;;  %v6809_v43 = vld [vmem:[#allocation114_spill] sm:$0xff] }
 0x2ae   : > { %v1416_v50 = vadd.f32 %v6801_v39, %v1320_v27  ;;  %v6802_v28 = vld [vmem:[#allocation73_spill] sm:$0xff]  ;;  %v999_v33 = vadd.f32 %v6806_v62, %v915_v21  ;;  %v5705_v4 = vpop.permute.xlu0 %1794  ;;  %v1296_v38 = vadd.f32 %v6809_v43, %v1204_v8  ;;  %v6810_v27 = vld [vmem:[#allocation126_spill] sm:$0xff]  ;;  %v6812_v14 = vld [vmem:[#allocation64_spill] sm:$0xff]  ;;  %v1504_v21 = vrot.slane %v5402_v30, 3 }
 0x2af   : > { %v820_v17 = vadd.f32 %v6802_v28, %v727_v35  ;;  %v6803_v16 = vld [vmem:[#allocation41_spill] sm:$0xff]  ;;  %v654_v45 = vadd.f32 %v6805_v56, %v561_v46  ;;  %v1415_v39 = vadd.f32 %v6810_v27, %v1319_v19  ;;  %v6811_v35 = vld [vmem:[#allocation39_spill] sm:$0xff]  ;;  %v6821_v27 = vld [vmem:[#allocation98_spill] sm:$0xff] }
 0x2b0   : > { %v6804_v24 = vld [vmem:[#allocation53_spill] sm:$0xff]  ;;  %2126 = vrot.lane.b32.xlu1 %v5550_v2, %s3205_s20  ;;  %v6816_v8 = vld [vmem:[#allocation127_spill] sm:$0xff]  ;;  %v1493_v19 = vadd.f32 %v5379_v37, %v1416_v50  ;;  %s5819_s20 = sld [smem:[#allocation9 + $0x52]]  ;;  %v6896_v30 = vld [vmem:[#allocation152_spill] sm:$0xff] }
 0x2b1   : > { %v512_v10 = vadd.f32 %v6804_v24, %v6803_v16  ;;  %v6807_v29 = vld [vmem:[#allocation49_spill] sm:$0xff]  ;;  %v751_v28 = vadd.f32 %v6811_v35, %v654_v45  ;;  %v917_v16 = vadd.f32 %v6812_v14, %v820_v17  ;;  %v6813_v24 = vld [vmem:[#allocation90_spill] sm:$0xff]  ;;  %v1392_v62 = vadd.f32 %v6816_v8, %v1296_v38  ;;  %v6818_v17 = vld [vmem:[#allocation40_spill] sm:$0xff] }
 0x2b2   : > { %v653_v3 = vadd.f32 %v6807_v29, %v560_v26  ;;  %v6808_v60 = vld [vmem:[#allocation101_spill] sm:$0xff]  ;;  %v1085_v46 = vadd.f32 %v6813_v24, %v999_v33  ;;  %v6814_v26 = vrot.slane %v5488_v55, 5  ;;  %v6817_v45 = vrot.slane %v5359_v15, 3  ;;  %v6820_v43 = vld [vmem:[#allocation47_spill] sm:$0xff]  ;;  %v5729_v55 = vpop.permute.xlu1 %1773  ;;  %v1820_v24 = vpop.permute.xlu0 %1819 }
 0x2b3   : > { %v1178_v47 = vadd.f32 %v6808_v60, %v1086_v59  ;;  %v6815_v59 = vld [vmem:[#allocation110_spill] sm:$0xff]  ;;  %v6819_v29 = vld [vmem:[#allocation61_spill] sm:$0xff]  ;;  %v1001_v2 = vadd.f32 %v6820_v43, %v917_v16  ;;  %v6825_v15 = vrot.slane %v5220_v53, 7  ;;  %v6828_v16 = vld [vmem:[#allocation111_spill] sm:$0xff]  ;;  %v1475_v53 = vadd.f32 %v5365_v23, %v1392_v62 }
 0x2b4   : > { %2365 = vrot.lane.b32.xlu0 %v6814_v26, %s3207_s10  ;;  %v1568_v14 = vadd.f32 %v6817_v45, %v1494_v34  ;;  %v750_v33 = vadd.f32 %v6818_v17, %v653_v3  ;;  %v844_v60 = vadd.f32 %v6819_v29, %v751_v28  ;;  %v1177_v35 = vadd.f32 %v6821_v27, %v1085_v46  ;;  %v6823_v26 = vld [vmem:[#allocation74_spill] sm:$0xff]  ;;  %v6827_v28 = vld [vmem:[#allocation92_spill] sm:$0xff] }
 0x2b5   : > { %v1274_v56 = vadd.f32 %v6815_v59, %v1178_v47  ;;  %v6822_v47 = vld [vmem:[#allocation55_spill] sm:$0xff]  ;;  %v1492_v34 = vadd.f32 %v6825_v15, %v1415_v39  ;;  %v6826_v3 = vld [vmem:[#allocation66_spill] sm:$0xff]  ;;  %v1087_v45 = vadd.f32 %v6827_v28, %v1001_v2  ;;  %2363 = vrot.lane.b32.xlu1 %v5559_v63, %s3207_s10  ;;  %v5745_v46 = vstv %s5692_s18  ;;  %v6832_v27 = vld [vmem:[#allocation100_spill] sm:$0xff] }
 0x2b6   : > { %v511_v38 = vadd.f32 %v6823_v26, %v6822_v47  ;;  %v6824_v59 = vld [vmem:[#allocation123_spill] sm:$0xff]  ;;  %v1642_v50 = vadd.f32 %v5467_v36, %v1568_v14  ;;  %v941_v8 = vadd.f32 %v6826_v3, %v844_v60  ;;  %v1273_v17 = vadd.f32 %v6828_v16, %v1177_v35  ;;  %v6830_v14 = vld [vmem:[#allocation50_spill] sm:$0xff]  ;;  %v6833_v63 = vld [vmem:[#allocation120_spill] sm:$0xff]  ;;  %v5755_v26 = vpop.permute.xlu1 %1796 }
 0x2b7   : > { %v1366_v37 = vadd.f32 %v6824_v59, %v1274_v56  ;;  %v6829_v56 = vld [vmem:[#allocation77_spill] sm:$0xff]  ;;  %v1567_v36 = vadd.f32 %v5442_v42, %v1493_v19  ;;  %v843_v60 = vadd.f32 %v6830_v14, %v750_v33  ;;  %v6831_v43 = vld [vmem:[#allocation82_spill] sm:$0xff]  ;;  %v1179_v35 = vadd.f32 %v6832_v27, %v1087_v45  ;;  %v6844_v14 = vld [vmem:[#allocation131_spill] sm:$0xff] }
 0x2b8   : > { %2251 = vrot.lane.b32.xlu0 %v5521_v0, %s3206_s6  ;;  %v607_v29 = vadd.f32 %v6829_v56, %v511_v38  ;;  %v1734_v39 = vadd.f32 %v5611_v11, %v1642_v50  ;;  %v1020_v2 = vadd.f32 %v6831_v43, %v941_v8  ;;  %v1365_v47 = vadd.f32 %v6833_v63, %v1273_v17  ;;  %v1824_v0 = vpop.permute.xlu0 %1823  ;;  %v6834_v62 = vld [vmem:[#allocation70_spill] sm:$0xff]  ;;  %v6836_v15 = vld [vmem:[#allocation113_spill] sm:$0xff]  ;;  %v6842_v17 = vld [vmem:[#allocation83_spill] sm:$0xff] }
 0x2b9   : > { %v1455_v59 = vadd.f32 %v5324_v1, %v1366_v37  ;;  %v1641_v38 = vadd.f32 %v5384_v61, %v1567_v36  ;;  %v1566_v23 = vadd.f32 %v5450_v52, %v1492_v34  ;;  %v940_v11 = vadd.f32 %v6834_v62, %v843_v60  ;;  %v6835_v19 = vld [vmem:[#allocation94_spill] sm:$0xff]  ;;  %v6838_v1 = vld [vmem:[#allocation76_spill] sm:$0xff]  ;;  %v6839_v61 = vld [vmem:[#allocation141_spill] sm:$0xff] }
 0x2ba   : > { %v1830_v42 = vadd.f32 %v1824_v0, %v1734_v39  ;;  %v1111_v33 = vadd.f32 %v6835_v19, %v1020_v2  ;;  %v1275_v50 = vadd.f32 %v6836_v15, %v1179_v35  ;;  %v6837_v3 = vld [vmem:[#allocation154_spill] sm:$0xff]  ;;  %v2453_v8 = vrot.slane %v5582_v9, 1  ;;  %v6841_v34 = vld [vmem:[#allocation148_spill] sm:$0xff]  ;;  %v1822_v27 = vpop.permute.xlu1 %1821  ;;  %v6847_v63 = vld [vmem:[#allocation145_spill] sm:$0xff] }
 0x2bb   : > { %2249 = vrot.lane.b32.xlu1 %v6837_v3, %s3206_s6  ;;  %v608_v37 = vadd.f32 %v6838_v1, %v512_v10  ;;  %v6840_v28 = vrot.slane %v6839_v61, 3  ;;  %v1640_v45 = vadd.f32 %v6841_v34, %v1566_v23  ;;  %v1733_v16 = vadd.f32 %v5642_v31, %v1641_v38  ;;  %v6843_v36 = vld [vmem:[#allocation102_spill] sm:$0xff]  ;;  %v6849_v19 = vld [vmem:[#allocation79_spill] sm:$0xff]  ;;  %v6878_v9 = vld [vmem:[#allocation132_spill] sm:$0xff] }
 0x2bc   : > { %2315 = vrot.lane.b32.xlu0 %v5614_v40, %s3206_s6  ;;  %v1019_v56 = vadd.f32 %v6842_v17, %v940_v11  ;;  %v1203_v39 = vadd.f32 %v6843_v36, %v1111_v33  ;;  %v6845_v60 = vrot.slane %v6844_v14, 7  ;;  %v6846_v2 = vld [vmem:[#allocation122_spill] sm:$0xff]  ;;  %v1914_v35 = vpop.permute.xlu0 %1913  ;;  %v1529_v10 = vadd.f32 %v6847_v63, %v1455_v59  ;;  %v6850_v38 = vld [vmem:[#allocation91_spill] sm:$0xff]  ;;  %v6858_v17 = vld [vmem:[#allocation124_spill] sm:$0xff] }
 0x2bd   : > { %v1549_v52 = vadd.f32 %v6840_v28, %v1475_v53  ;;  %v1367_v40 = vadd.f32 %v6846_v2, %v1275_v50  ;;  %v6848_v0 = vld [vmem:[#allocation142_spill] sm:$0xff]  ;;  %v1732_v53 = vadd.f32 %v5574_v12, %v1640_v45  ;;  %v1829_v23 = vadd.f32 %v1822_v27, %v1733_v16  ;;  %v6851_v15 = vld [vmem:[#allocation115_spill] sm:$0xff]  ;;  %v6853_v50 = vld [vmem:[#allocation137_spill] sm:$0xff] }
 0x2be   : > { %v1454_v43 = vadd.f32 %v6845_v60, %v1365_v47  ;;  %v702_v31 = vadd.f32 %v6849_v19, %v608_v37  ;;  %v1110_v11 = vadd.f32 %v6850_v38, %v1019_v56  ;;  %v1295_v33 = vadd.f32 %v6851_v15, %v1203_v39  ;;  %v6854_v37 = vld [vmem:[#allocation63_spill] sm:$0xff]  ;;  %v6859_v39 = vld [vmem:[#allocation146_spill] sm:$0xff] }
 0x2bf   : > { %v1622_v62 = vadd.f32 %v6848_v0, %v1549_v52  ;;  %2253 = vrot.lane.b32.xlu1 %v5677_v5, %s3206_s6  ;;  %v6852_v47 = vrot.slane %v5543_v6, 4  ;;  %v2455_v59 = vrot.slane %v5593_v41, 1  ;;  %v1601_v3 = vadd.f32 %v6853_v50, %v1529_v10  ;;  %v6855_v52 = vld [vmem:[#allocation103_spill] sm:$0xff]  ;;  %v1912_v6 = vpop.permute.xlu1 %1911  ;;  %v6862_v63 = vld [vmem:[#allocation62_spill] sm:$0xff]  ;;  %v6863_v0 = vld [vmem:[#allocation112_spill] sm:$0xff] }
 0x2c0   : > { %v1828_v1 = vadd.f32 %v1820_v24, %v1732_v53  ;;  %v5792_v61 = vadd.f32 %v1914_v35, %v1829_v23  ;;  %v798_v28 = vadd.f32 %v6854_v37, %v702_v31  ;;  %v1202_v34 = vadd.f32 %v6855_v52, %v1110_v11  ;;  %v6856_v45 = vld [vmem:[#allocation135_spill] sm:$0xff]  ;;  %v1799_v36 = vpop.permute.xlu0 %1798  ;;  %v6861_v24 = vld [vmem:[#allocation80_spill] sm:$0xff] }
 0x2c1   : > { %2319 = vrot.lane.b32.xlu0 %v6852_v47, %s3206_s6  ;;  %v1713_v12 = vadd.f32 %v5609_v13, %v1622_v62  ;;  %v6857_v16 = vrot.slane %v6856_v45, 7  ;;  %v1391_v56 = vadd.f32 %v6858_v17, %v1295_v33  ;;  %v1528_v14 = vadd.f32 %v6859_v39, %v1454_v43  ;;  %v6860_v60 = vld [vmem:[#allocation155_spill] sm:$0xff]  ;;  %v6866_v31 = vld [vmem:[#allocation68_spill] sm:$0xff]  ;;  %v6868_v33 = vld [vmem:[#allocation138_spill] sm:$0xff] }
 0x2c2   : > { %v1687_v2 = vadd.f32 %v6860_v60, %v1601_v3  ;;  %v1920_v27 = vadd.f32 %v1912_v6, %v1828_v1  ;;  %v701_v35 = vadd.f32 %v6861_v24, %v607_v29  ;;  %v892_v10 = vadd.f32 %v6862_v63, %v798_v28  ;;  %v6864_v53 = vld [vmem:[#allocation35_spill] sm:$0xff]  ;;  %v6874_v6 = vld [vmem:[#allocation140_spill] sm:$0xff]  ;;  %v6877_v24 = vld [vmem:[#allocation150_spill] sm:$0xff] }
 0x2c3   : > { %v1456_v5 = vadd.f32 %v6857_v16, %v1367_v40  ;;  %v5801_v13 = vadd.f32 %v1799_v36, %v1713_v12  ;;  %2317 = vrot.lane.b32.xlu1 %v5619_v22, %s3206_s6  ;;  %v2456_v43 = vsel %vm499_vm7, %v2453_v8, %v2455_v59  ;;  %v2452_v40 = vrot.slane %v5598_v51, 1  ;;  %v6865_v22 = vld [vmem:[#allocation59_spill] sm:$0xff]  ;;  %v1916_v51 = vpop.permute.xlu1 %1915  ;;  %v6870_v12 = vld [vmem:[#allocation125_spill] sm:$0xff] }
 0x2c4   : > { %v1294_v62 = vadd.f32 %v6863_v0, %v1202_v34  ;;  %v1600_v29 = vadd.f32 %v6864_v53, %v1528_v14  ;;  %v1779_v23 = vadd.f32 %v5673_v18, %v1687_v2  ;;  %v2336_v19 = vrot.slane %v5648_v20, 4  ;;  %v6867_v11 = vld [vmem:[#allocation139_spill] sm:$0xff]  ;;  %v1868_v3 = vpop.permute.xlu0 %1867  ;;  %v6872_v34 = vld [vmem:[#allocation44_spill] sm:$0xff] }
 0x2c5   : > { %2215 = vrot.lane.b32.xlu0 %v5562_v25, %s3206_s6  ;;  %v797_v25 = vadd.f32 %v6865_v22, %v701_v35  ;;  %v981_v38 = vadd.f32 %v6866_v31, %v892_v10  ;;  %v1474_v15 = vadd.f32 %v6867_v11, %v1391_v56  ;;  %v6869_v47 = vrot.slane %v6868_v33, 3  ;;  %v6871_v37 = vld [vmem:[#allocation151_spill] sm:$0xff]  ;;  %v6881_v53 = vld [vmem:[#allocation88_spill] sm:$0xff] }
 0x2c6   : > { %v1390_v1 = vadd.f32 %v6870_v12, %v1294_v62  ;;  %v1686_v28 = vadd.f32 %v6871_v37, %v1600_v29  ;;  %v1922_v18 = vadd.f32 %v1916_v51, %v1830_v42  ;;  %v5828_v52 = vadd.f32 %v1868_v3, %v1779_v23  ;;  %v6873_v16 = vld [vmem:[#allocation87_spill] sm:$0xff]  ;;  %v6882_v23 = vld [vmem:[#allocation108_spill] sm:$0xff]  ;;  %v6886_v3 = vld [vmem:[#allocation121_spill] sm:$0xff] }
 0x2c7   : > { %v1530_v50 = vadd.f32 %v6869_v47, %v1456_v5  ;;  %v891_v45 = vadd.f32 %v6872_v34, %v797_v25  ;;  %v1062_v17 = vadd.f32 %v6873_v16, %v981_v38  ;;  %2213 = vrot.lane.b32.xlu1 %v5565_v57, %s3206_s6  ;;  %v2335_v5 = vrot.slane %v5632_v44, 4  ;;  %v6875_v14 = vld [vmem:[#allocation67_spill] sm:$0xff]  ;;  %v1866_v35 = vpop.permute.xlu1 %1865  ;;  %v6883_v25 = vld [vmem:[#allocation144_spill] sm:$0xff] }
 0x2c8   : > { %v2331_v56 = vmul.f32 %v5660_v54, %v5604_v32  ;;  %v1778_v36 = vadd.f32 %v5703_v49, %v1686_v28  ;;  %v2454_v39 = vsel %vm499_vm7, %v2452_v40, %v2453_v8  ;;  %v5847_v57 = vmul.f32 %v5660_v54, %v5745_v46  ;;  %v6876_v44 = vld [vmem:[#allocation99_spill] sm:$0xff]  ;;  %v2008_v63 = vpop.permute.xlu0 %2007 }
 0x2c9   : > { %2459 = vrot.lane.b32.xlu0 %v2456_v43, %s3207_s10  ;;  %v1602_v42 = vadd.f32 %v6874_v6, %v1530_v50  ;;  %v980_v60 = vadd.f32 %v6875_v14, %v891_v45  ;;  %v1154_v2 = vadd.f32 %v6876_v44, %v1062_v17  ;;  %v1548_v32 = vadd.f32 %v6877_v24, %v1474_v15  ;;  %v6880_v43 = vld [vmem:[#allocation153_spill] sm:$0xff]  ;;  %v6884_v11 = vld [vmem:[#allocation143_spill] sm:$0xff]  ;;  %v6888_v17 = vld [vmem:[#allocation156_spill] sm:$0xff] }
 0x2ca   : > { %v2337_v49 = vsel %vm206_vm0, %v2335_v5, %v2336_v19  ;;  %v6879_v10 = vrot.slane %v6878_v9, 7  ;;  %v1874_v0 = vadd.f32 %v1866_v35, %v1778_v36  ;;  %v5858_v62 = vadd.f32 %v2008_v63, %v1920_v27  ;;  %v6885_v50 = vld [vmem:[#allocation97_spill] sm:$0xff]  ;;  %v6887_v45 = vld [vmem:[#allocation147_spill] sm:$0xff]  ;;  %v6890_v44 = vld [vmem:[#allocation130_spill] sm:$0xff] }
 0x2cb   : > { %v1688_v40 = vadd.f32 %v6880_v43, %v1602_v42  ;;  %v1061_v29 = vadd.f32 %v6881_v53, %v980_v60  ;;  %v1250_v22 = vadd.f32 %v6882_v23, %v1154_v2  ;;  %v1506_v31 = vrot.slane %v6883_v25, 3  ;;  %2457 = vrot.lane.b32.xlu1 %v2454_v39, %s3207_s10  ;;  %v6889_v14 = vld [vmem:[#allocation109_spill] sm:$0xff]  ;;  %v6891_v24 = vld [vmem:[#allocation36_spill] sm:$0xff]  ;;  %v6892_v9 = vld [vmem:[#allocation118_spill] sm:$0xff] }
 0x2cc   : > { %v1473_v8 = vadd.f32 %v6879_v10, %v1390_v1  ;;  %v2397_v38 = vmul.f32 %v5579_v48, %v5745_v46  ;;  %v1621_v15 = vadd.f32 %v6884_v11, %v1548_v32  ;;  %v2338_v47 = vrot.slane %v2331_v56, 4  ;;  %v1870_v1 = vpop.permute.xlu1 %1869  ;;  %v2012_v37 = vpop.permute.xlu0 %2011  ;;  %v6893_v53 = vld [vmem:[#allocation133_spill] sm:$0xff] }
 0x2cd   : > { %2340 = vrot.lane.b32.xlu0 %v2337_v49, %s3206_s6  ;;  %v1780_v33 = vadd.f32 %v5729_v55, %v1688_v40  ;;  %v2282_v27 = vstv %s5819_s20  ;;  %v1153_v51 = vadd.f32 %v6885_v50, %v1061_v29  ;;  %v1342_v12 = vadd.f32 %v6886_v3, %v1250_v22  ;;  %v6894_v22 = vld [vmem:[#allocation136_spill] sm:$0xff]  ;;  %v6895_v3 = vld [vmem:[#allocation134_spill] sm:$0xff] }
 0x2ce   : > { %v2405_v28 = vrot.slane %v5847_v57, 1  ;;  %v5874_v34 = vmul.f32 %v5579_v48, %v2282_v27  ;;  %v1547_v16 = vadd.f32 %v6887_v45, %v1473_v8  ;;  %v1712_v5 = vadd.f32 %v6888_v17, %v1621_v15 }
 0x2cf   : > { %v1876_v6 = vadd.f32 %v1870_v1, %v1780_v33  ;;  %v5878_v55 = vadd.f32 %v2012_v37, %v1922_v18  ;;  %2461 = vrot.lane.b32.xlu1 %v2455_v59, %s3207_s10  ;;  %v2403_v56 = vrot.slane %v2397_v38, 1  ;;  %v2396_v42 = vmul.f32 %v5595_v58, %v5745_v46 }
 0x2d0   : > { %v2283_v36 = vmul.f32 %v5595_v58, %v2282_v27  ;;  %v2420_v39 = vstv %s5838_s21  ;;  %v1249_v60 = vadd.f32 %v6889_v14, %v1153_v51  ;;  %v1438_v2 = vadd.f32 %v6890_v44, %v1342_v12  ;;  %v2010_v41 = vpop.permute.xlu1 %2009  ;;  %v1889_v59 = vpop.permute.xlu0 %1888 }
 0x2d1   : > { %2344 = vrot.lane.b32.xlu0 %v2338_v47, %s3206_s6  ;;  %v1620_v18 = vadd.f32 %v6891_v24, %v1547_v16  ;;  %v1804_v32 = vadd.f32 %v5755_v26, %v1712_v5  ;;  %v2339_v35 = vsel %vm206_vm0, %v2336_v19, %v2338_v47  ;;  %v2406_v46 = vsel %vm499_vm7, %v2403_v56, %v2405_v28 }
 0x2d2   : > { %v2290_v63 = vrot.slane %v5874_v34, 4  ;;  %v5902_v49 = vmul.f32 %v5579_v48, %v2420_v39  ;;  %v1341_v10 = vadd.f32 %v6892_v9, %v1249_v60  ;;  %v5907_v8 = vadd.f32 %v2010_v41, %v5792_v61  ;;  %v6898_v60 = vld [vmem:[#allocation58_spill] sm:$0xff]  ;;  %v6899_v41 = vld [vmem:[#allocation149_spill] sm:$0xff] }
 0x2d3   : > { %v1711_v26 = vadd.f32 %v5572_v7, %v1620_v18  ;;  %v5909_v43 = vadd.f32 %v1889_v59, %v1804_v32  ;;  %v1507_v20 = vsel %vm879_vm9, %v1504_v21, %v1506_v31  ;;  %2342 = vrot.lane.b32.xlu1 %v2339_v35, %s3206_s6  ;;  %v2402_v19 = vrot.slane %v2396_v42, 1  ;;  %v6900_v9 = vld [vmem:[#allocation57_spill] sm:$0xff] }
 0x2d4   : > { %v2421_v40 = vmul.f32 %v5595_v58, %v2420_v39  ;;  %v1437_v29 = vadd.f32 %v6893_v53, %v1341_v10  ;;  %v1511_v23 = vadd.f32 %v1507_v20, %v1438_v2  ;;  %v2289_v61 = vrot.slane %v2283_v36, 4  ;;  %v1887_v38 = vpop.permute.xlu1 %1886  ;;  %v1958_v11 = vpop.permute.xlu0 %1957 }
 0x2d5   : > { %2409 = vrot.lane.b32.xlu0 %v2406_v46, %s3207_s10  ;;  %v1803_v7 = vadd.f32 %v5705_v4, %v1711_v26  ;;  %v1503_v25 = vrot.slane %v6894_v22, 3  ;;  %v2428_v31 = vrot.slane %v5902_v49, 1  ;;  %v2285_v15 = vmul.f32 %v5660_v54, %v2282_v27 }
 0x2d6   : > { %v5924_v47 = vadd.f32 %v1958_v11, %v1874_v0  ;;  %v2404_v50 = vsel %vm499_vm7, %v2402_v19, %v2403_v56  ;;  %v2291_v51 = vsel %vm206_vm0, %v2289_v61, %v2290_v63  ;;  %v1582_v12 = vadd.f32 %v6895_v3, %v1511_v23 }
 0x2d7   : > { %v1895_v33 = vadd.f32 %v1887_v38, %v1803_v7  ;;  %v1505_v4 = vsel %vm879_vm9, %v1503_v25, %v1504_v21  ;;  %2407 = vrot.lane.b32.xlu1 %v2404_v50, %s3207_s10  ;;  %v2427_v1 = vrot.slane %v2421_v40, 1  ;;  %v2491_v37 = vstv %s5892_s0 }
 0x2d8   : > { %v1510_v27 = vadd.f32 %v1505_v4, %v1437_v29  ;;  %v1891_v34 = vpop.permute.xlu1 %1890  ;;  %v1962_v0 = vpop.permute.xlu0 %1961  ;;  %v2292_v45 = vrot.slane %v2285_v15, 4  ;;  %v2423_v16 = vmul.f32 %v5660_v54, %v2420_v39  ;;  %v2494_v17 = vmul.f32 %v5660_v54, %v2491_v37  ;;  %v6897_v39 = vld [vmem:[#allocation37_spill] sm:$0xff] }
 0x2d9   : > { %2294 = vrot.lane.b32.xlu0 %v2291_v51, %s3206_s6  ;;  %v1663_v21 = vadd.f32 %v6896_v30, %v1582_v12  ;;  %v1897_v5 = vadd.f32 %v1891_v34, %v5801_v13  ;;  %v5939_v56 = vadd.f32 %v1962_v0, %v1876_v6  ;;  %v2429_v42 = vsel %vm499_vm7, %v2427_v1, %v2428_v31 }
 0x2da   : > { %v2493_v36 = vmul.f32 %v5579_v48, %v2491_v37  ;;  %v1581_v14 = vadd.f32 %v6897_v39, %v1510_v27  ;;  %v2293_v13 = vsel %vm206_vm0, %v2290_v63, %v2292_v45  ;;  %v2430_v6 = vrot.slane %v2423_v16, 1 }
 0x2db   : > { %2411 = vrot.lane.b32.xlu1 %v2405_v28, %s3207_s10  ;;  %v1755_v44 = vadd.f32 %v6898_v60, %v1663_v21  ;;  %v2501_v18 = vrot.slane %v2494_v17, 5  ;;  %v2374_v32 = vstv %s5922_s1  ;;  %v2492_v49 = vmul.f32 %v5595_v58, %v2491_v37 }
 0x2dc   : > { %v1960_v2 = vpop.permute.xlu1 %1959  ;;  %v1847_v24 = vpop.permute.xlu0 %1846  ;;  %v1662_v59 = vadd.f32 %v6899_v41, %v1581_v14  ;;  %v2376_v35 = vmul.f32 %v5579_v48, %v2374_v32  ;;  %v2499_v46 = vrot.slane %v2493_v36, 5  ;;  %v2375_v63 = vmul.f32 %v5595_v58, %v2374_v32 }
 0x2dd   : > { %2432 = vrot.lane.b32.xlu0 %v2429_v42, %s3207_s10  ;;  %v1967_v57 = vadd.f32 %v1960_v2, %v5828_v52  ;;  %v1851_v28 = vadd.f32 %v1847_v24, %v1755_v44  ;;  %v2431_v19 = vsel %vm499_vm7, %v2428_v31, %v2430_v6  ;;  %v2470_v40 = vstv %s2969_s3 }
 0x2de   : > { %v1754_v10 = vadd.f32 %v6900_v9, %v1662_v59  ;;  %v2502_v52 = vsel %vm475_vm8, %v2499_v46, %v2501_v18  ;;  %v2382_v23 = vrot.slane %v2376_v35, 1  ;;  %v2472_v7 = vmul.f32 %v5579_v48, %v2470_v40 }
 0x2df   : > { %2296 = vrot.lane.b32.xlu1 %v2293_v13, %s3206_s6  ;;  %v2498_v61 = vrot.slane %v2492_v49, 5  ;;  %v2381_v22 = vrot.slane %v2375_v63, 1  ;;  %v2471_v25 = vmul.f32 %v5595_v58, %v2470_v40  ;;  %v2377_v15 = vmul.f32 %v5660_v54, %v2374_v32  ;;  %s6004_s6 = sld [smem:[#allocation4]] }
 0x2e0   : > { %v1845_v26 = vpop.permute.xlu1 %1844  ;;  %v2102_v20 = vpop.permute.xlu0 %2101  ;;  %v2478_v48 = vrot.slane %v2472_v7, 5  ;;  %v2473_v58 = vmul.f32 %v5660_v54, %v2470_v40 }
 0x2e1   : > { %2436 = vrot.lane.b32.xlu0 %v2430_v6, %s3207_s10  ;;  %v1850_v53 = vadd.f32 %v1845_v26, %v1754_v10  ;;  %v2109_v29 = vadd.f32 %v2102_v20, %v5907_v8  ;;  %v2500_v31 = vsel %vm475_vm8, %v2498_v61, %v2499_v46  ;;  %v2383_v51 = vsel %vm499_vm7, %v2381_v22, %v2382_v23 }
 0x2e2   : > { %v2477_v4 = vrot.slane %v2471_v25, 5  ;;  %v2384_v34 = vrot.slane %v2377_v15, 1  ;;  %v2480_v17 = vrot.slane %v2473_v58, 5 }
 0x2e3   : > { %2434 = vrot.lane.b32.xlu1 %v2431_v19, %s3207_s10 }
 0x2e4   : > { %v2100_v38 = vpop.permute.xlu1 %2099  ;;  %v1983_v11 = vpop.permute.xlu0 %1982  ;;  %v2479_v37 = vsel %vm475_vm8, %v2477_v4, %v2478_v48  ;;  %v2385_v16 = vsel %vm499_vm7, %v2382_v23, %v2384_v34 }
 0x2e5   : > { %2505 = vrot.lane.b32.xlu0 %v2502_v52, %s3207_s10  ;;  %v2108_v50 = vadd.f32 %v2100_v38, %v5858_v62  ;;  %v1991_v8 = vadd.f32 %v1983_v11, %v1895_v33 }
 0x2e7   : > { %2503 = vrot.lane.b32.xlu1 %v2500_v31, %s3207_s10 }
 0x2e8   : > { %v2104_v3 = vpop.permute.xlu1 %2103  ;;  %v1987_v12 = vpop.permute.xlu0 %1986 }
 0x2e9   : > { %2386 = vrot.lane.b32.xlu0 %v2383_v51, %s3207_s10  ;;  %v2110_v27 = vadd.f32 %v2104_v3, %v5878_v55  ;;  %v1993_v1 = vadd.f32 %v1987_v12, %v1897_v5  ;;  %v2481_v5 = vsel %vm475_vm8, %v2478_v48, %v2480_v17 }
 0x2eb   : > { %2507 = vrot.lane.b32.xlu1 %v2501_v18, %s3207_s10 }
 0x2ec   : > { %v1985_v62 = vpop.permute.xlu1 %1984  ;;  %v2052_v33 = vpop.permute.xlu0 %2051 }
 0x2ed   : > { %2482 = vrot.lane.b32.xlu0 %v2479_v37, %s3207_s10  ;;  %v1992_v0 = vadd.f32 %v1985_v62, %v5909_v43  ;;  %v2059_v45 = vadd.f32 %v2052_v33, %v1967_v57 }
 0x2ef   : > { %2388 = vrot.lane.b32.xlu1 %v2385_v16, %s3207_s10 }
 0x2f0   : > { %v2050_v54 = vpop.permute.xlu1 %2049  ;;  %v1937_v55 = vpop.permute.xlu0 %1936 }
 0x2f1   : > { %v2058_v30 = vadd.f32 %v2050_v54, %v5924_v47  ;;  %v1942_v21 = vadd.f32 %v1937_v55, %v1850_v53 }
 0x2f3   : > { %2484 = vrot.lane.b32.xlu1 %v2481_v5, %s3207_s10  ;;  %s3209_s10 = smov 16  }
 0x2f4   : > { %v2054_v42 = vpop.permute.xlu1 %2053  ;;  %v2196_v36 = vpop.permute.xlu0 %2195 }
 0x2f5   : > { %v2060_v39 = vadd.f32 %v2054_v42, %v5939_v56  ;;  %v2204_v43 = vadd.f32 %v2196_v36, %v2108_v50 }
 0x2f8   : > { %v1939_v14 = vpop.permute.xlu1 %1938  ;;  %v2200_v60 = vpop.permute.xlu0 %2199 }
 0x2f9   : > { %v1943_v44 = vadd.f32 %v1939_v14, %v1851_v28  ;;  %v2206_v2 = vadd.f32 %v2200_v60, %v2110_v27 }
 0x2fc   : > { %v2198_v24 = vpop.permute.xlu1 %2197  ;;  %v2077_v13 = vpop.permute.xlu0 %2076 }
 0x2fd   : > { %v2205_v6 = vadd.f32 %v2198_v24, %v2109_v29  ;;  %v5984_v18 = vadd.f32 %v2077_v13, %v1992_v0 }
 0x300   : > { %v2075_v47 = vpop.permute.xlu1 %2074  ;;  %v2146_v32 = vpop.permute.xlu0 %2145 }
 0x301   : > { %v2083_v41 = vadd.f32 %v2075_v47, %v1991_v8  ;;  %v5986_v59 = vadd.f32 %v2146_v32, %v2058_v30 }
 0x304   : > { %v2079_v57 = vpop.permute.xlu1 %2078  ;;  %v2150_v35 = vpop.permute.xlu0 %2149 }
 0x305   : > { %v2085_v46 = vadd.f32 %v2079_v57, %v1993_v1  ;;  %v5988_v49 = vadd.f32 %v2150_v35, %v2060_v39 }
 0x308   : > { %v2148_v56 = vpop.permute.xlu1 %2147  ;;  %v2035_v9 = vpop.permute.xlu0 %2034 }
 0x309   : > { %v2155_v10 = vadd.f32 %v2148_v56, %v2059_v45  ;;  %v5990_v28 = vadd.f32 %v2035_v9, %v1943_v44 }
 0x30c   : > { %v2033_v63 = vpop.permute.xlu1 %2032  ;;  %v2272_v26 = vpop.permute.xlu0 %2271 }
 0x30d   : > { %v5992_v20 = vadd.f32 %v2033_v63, %v1942_v21  ;;  %v2279_v19 = vadd.f32 %v2272_v26, %v2205_v6 }
 0x310   : > { %v2270_v52 = vpop.permute.xlu1 %2269  ;;  %v2171_v40 = vpop.permute.xlu0 %2170 }
 0x311   : > { %v2278_v53 = vadd.f32 %v2270_v52, %v2204_v43  ;;  %v2179_v29 = vadd.f32 %v2171_v40, %v2083_v41 }
 0x314   : > { %v2274_v23 = vpop.permute.xlu1 %2273  ;;  %v2175_v7 = vpop.permute.xlu0 %2174 }
 0x315   : > { %v2181_v61 = vadd.f32 %v2175_v7, %v2085_v46  ;;  %v2280_v17 = vadd.f32 %v2274_v23, %v2206_v2 }
 0x318   : > { %v2173_v22 = vpop.permute.xlu1 %2172  ;;  %v2232_v25 = vpop.permute.xlu0 %2231 }
 0x319   : > { %v2180_v35 = vadd.f32 %v2173_v22, %v5984_v18  ;;  %v2239_v9 = vadd.f32 %v2232_v25, %v2155_v10 }
 0x31c   : > { %v2230_v38 = vpop.permute.xlu1 %2229  ;;  %v2125_v11 = vpop.permute.xlu0 %2124 }
 0x320   : > { %v2234_v31 = vpop.permute.xlu1 %2233  ;;  %v2362_v15 = vpop.permute.xlu0 %2361 }
 0x321   : > { %v2370_v33 = vadd.f32 %v2362_v15, %v2278_v53  ;;  %v2238_v53 = vadd.f32 %v2230_v38, %v5986_v59  ;;  %v2240_v18 = vadd.f32 %v2234_v31, %v5988_v49 }
 0x324   : > { %v5994_v50 = vpop.permute.xlu1 %2126 }
 0x326   : > { %v2366_v8 = vpop.permute.xlu0 %2365 }
 0x327   : > { %v2372_v55 = vadd.f32 %v2366_v8, %v2280_v17 }
 0x328   : > { %v2364_v51 = vpop.permute.xlu1 %2363 }
 0x329   : > { %v2371_v62 = vadd.f32 %v2364_v51, %v2279_v19 }
 0x32a   : > { %v2252_v48 = vpop.permute.xlu0 %2251 }
 0x32b   : > { %v2259_v19 = vadd.f32 %v2252_v48, %v2180_v35 }
 0x32d   : > { %v2250_v4 = vpop.permute.xlu1 %2249 }
 0x32e   : > { %v2316_v3 = vpop.permute.xlu0 %2315  ;;  %v2258_v6 = vadd.f32 %v2250_v4, %v2179_v29  ;;  %v2130_v29 = vadd.f32 %v2125_v11, %v5992_v20 }
 0x32f   : > { %v2324_v51 = vadd.f32 %v2316_v3, %v2238_v53 }
 0x331   : > { %v2254_v12 = vpop.permute.xlu1 %2253 }
 0x332   : > { %v2260_v41 = vadd.f32 %v2254_v12, %v2181_v61 }
 0x333   : > { %v2320_v58 = vpop.permute.xlu0 %2319 }
 0x334   : > { %v2326_v48 = vadd.f32 %v2320_v58, %v2240_v18 }
 0x335   : > { %v2318_v27 = vpop.permute.xlu1 %2317 }
 0x336   : > { %v2325_v40 = vadd.f32 %v2318_v27, %v2239_v9  ;;  %v3208_v9 = vmov 1966171168  }
 0x337   : > { %v5996_v1 = vpop.permute.xlu0 %2215 }
 0x339   : > { %v2214_v37 = vpop.permute.xlu1 %2213 }
 0x33a   : > { %v2219_v22 = vadd.f32 %v2214_v37, %v2130_v29 }
 0x33b   : > { %v2460_v34 = vpop.permute.xlu0 %2459 }
 0x33c   : > { %v2467_v0 = vadd.f32 %v2460_v34, %v2371_v62 }
 0x33d   : > { %v2458_v45 = vpop.permute.xlu1 %2457 }
 0x33e   : > { %v2466_v54 = vadd.f32 %v2458_v45, %v2370_v33  ;;  %v2531_v30 = vrot.slane %v2467_v0, 1 }
 0x33f   : > { %v2341_v16 = vpop.permute.xlu0 %2340 }
 0x340   : > { %v2530_v21 = vrot.slane %v2466_v54, 1  ;;  %v2349_v47 = vadd.f32 %v2341_v16, %v2258_v6  ;;  %v2131_v16 = vadd.f32 %v5994_v50, %v5990_v28 }
 0x341   : > { %v2462_v5 = vpop.permute.xlu1 %2461 }
 0x342   : > { %v2468_v36 = vadd.f32 %v2462_v5, %v2372_v55  ;;  %v2532_v39 = vsel %vm499_vm7, %v2530_v21, %v2531_v30 }
 0x343   : > { %v2345_v42 = vpop.permute.xlu0 %2344 }
 0x344   : > { %v2533_v43 = vrot.slane %v2468_v36, 1  ;;  %v2351_v46 = vadd.f32 %v2345_v42, %v2260_v41  ;;  %v2554_v42 = vstv %s6004_s6 }
 0x345   : > { %v2343_v14 = vpop.permute.xlu1 %2342 }
 0x346   : > { %v2534_v44 = vsel %vm499_vm7, %v2531_v30, %v2533_v43  ;;  %v2350_v23 = vadd.f32 %v2343_v14, %v2259_v19  ;;  %v2220_v30 = vadd.f32 %v5996_v1, %v2131_v16 }
 0x347   : > { %v2410_v60 = vpop.permute.xlu0 %2409 }
 0x348   : > { %v2417_v15 = vadd.f32 %v2410_v60, %v2325_v40 }
 0x349   : > { %v2408_v24 = vpop.permute.xlu1 %2407 }
 0x34a   : > { %v2416_v25 = vadd.f32 %v2408_v24, %v2324_v51 }
 0x34b   : > { %v2295_v13 = vpop.permute.xlu0 %2294 }
 0x34c   : > { %v2300_v34 = vadd.f32 %v2295_v13, %v2219_v22 }
 0x34d   : > { %v2412_v32 = vpop.permute.xlu1 %2411 }
 0x34e   : > { %v2418_v33 = vadd.f32 %v2412_v32, %v2326_v48 }
 0x34f   : > { %v2433_v2 = vpop.permute.xlu0 %2432 }
 0x350   : > { %v2441_v57 = vadd.f32 %v2433_v2, %v2349_v47 }
 0x351   : > { %v2297_v63 = vpop.permute.xlu1 %2296 }
 0x352   : > { %v2538_v56 = vadd.f32 %v2532_v39, %v2441_v57  ;;  %v2301_v39 = vadd.f32 %v2297_v63, %v2220_v30  ;;  %v2576_v63 = vunpack.c.l.s4 %v3208_v9 }
 0x353   : > { %v2437_v26 = vpop.permute.xlu0 %2436 }
 0x354   : > { %v2443_v52 = vadd.f32 %v2437_v26, %v2351_v46  ;;  %v2544_v59 = vrot.slane %v2538_v56, 2  ;;  %v2569_v56 = vlaneseq  ;;  %v2577_v26 = vunpack.c.0.s8 %v2576_v63 }
 0x355   : > { %v2435_v8 = vpop.permute.xlu1 %2434 }
 0x356   : > { %v2540_v7 = vadd.f32 %v2533_v43, %v2443_v52  ;;  %v2442_v4 = vadd.f32 %v2435_v8, %v2350_v23  ;;  %v6015_v19 = vshrl.u32 %v2569_v56, 7  ;;  %vm2571_vm10 = vcmp.lt.s32.totalorder %v2569_v56, 16 }
 0x357   : > { %v2506_v61 = vpop.permute.xlu0 %2505  ;;  %vm6020_vm11 = vcmp.ge.s32.totalorder %v2569_v56, 16  ;;  %vm6025_vm12 = vcmp.lt.s32.totalorder %v2569_v56, 32  ;;  %vm6034_vm14 = vcmp.ge.s32.totalorder %v2569_v56, 32  ;;  %vm6039_vm15 = vcmp.lt.s32.totalorder %v2569_v56, 48 }
 0x358   : > { %v2513_v10 = vadd.f32 %v2506_v61, %v2417_v15  ;;  %v2539_v12 = vadd.f32 %v2534_v44, %v2442_v4  ;;  %v2547_v38 = vrot.slane %v2540_v7, 2  ;;  %v2580_v53 = vsub.s32 %v2577_v26, %v6015_v19  ;;  %vm2602_vm13 = vmand %vm6020_vm11, %vm6025_vm12 }
 0x359   : > { %v2504_v27 = vpop.permute.xlu1 %2503  ;;  %vm2610_vm0 = vmand %vm6034_vm14, %vm6039_vm15  ;;  %vm6048_vm1 = vcmp.ge.s32.totalorder %v2569_v56, 48  ;;  %vm6053_vm2 = vcmp.lt.s32.totalorder %v2569_v56, 64  ;;  %vm6067_vm4 = vcmp.ge.s32.totalorder %v2569_v56, 64  ;;  %vm6091_vm8 = vcmp.lt.s32.totalorder %v2569_v56, 96 }
 0x35a   : > { %v2545_v20 = vrot.slane %v2539_v12, 2  ;;  %v2512_v11 = vadd.f32 %v2504_v27, %v2416_v25  ;;  %v2519_v3 = vrot.slane %v2513_v10, 1  ;;  %vm2618_vm3 = vmand %vm6048_vm1, %vm6053_vm2  ;;  %vm6115_vm11 = vcmp.lt.s32.totalorder %v2569_v56, 112 }
 0x35b   : > { %v2387_v62 = vpop.permute.xlu0 %2386  ;;  %vm2670_vm14 = vcmp.lt.s32.totalorder %v2569_v56, 128 }
 0x35c   : > { %v2518_v0 = vrot.slane %v2512_v11, 1  ;;  %v2392_v45 = vadd.f32 %v2387_v62, %v2300_v34  ;;  %v2546_v49 = vsel %vm689_vm5, %v2544_v59, %v2545_v20  ;;  %v2548_v31 = vsel %vm689_vm5, %v2545_v20, %v2547_v38 }
 0x35d   : > { %v2508_v37 = vpop.permute.xlu1 %2507  ;;  %vm6072_vm5 = vcmp.lt.s32.totalorder %v2569_v56, 80 }
 0x35e   : > { %v2514_v17 = vadd.f32 %v2508_v37, %v2418_v33  ;;  %v2520_v54 = vsel %vm499_vm7, %v2518_v0, %v2519_v3  ;;  %vm2640_vm6 = vmand %vm6067_vm4, %vm6072_vm5 }
 0x35f   : > { %v2483_v58 = vpop.permute.xlu0 %2482 }
 0x360   : > { %v2488_v55 = vadd.f32 %v2483_v58, %v2392_v45  ;;  %v2521_v21 = vrot.slane %v2514_v17, 1 }
 0x361   : > { %v2389_v36 = vpop.permute.xlu1 %2388 }
 0x362   : > { %v2525_v5 = vadd.f32 %v2520_v54, %v2488_v55  ;;  %v2522_v14 = vsel %vm499_vm7, %v2519_v3, %v2521_v21  ;;  %v2393_v44 = vadd.f32 %v2389_v36, %v2301_v39  ;;  %vm6086_vm7 = vcmp.ge.s32.totalorder %v2569_v56, 80 }
 0x363   : > { %vm2655_vm9 = vmand %vm6086_vm7, %vm6091_vm8 }
 0x364   : > { %v2551_v43 = vadd.f32 %v2546_v49, %v2525_v5 }
 0x365   : > { %v2485_v24 = vpop.permute.xlu1 %2484 }
 0x366   : > { %v2555_v60 = vadd.f32 %v2554_v42, %v2551_v43  ;;  %v2489_v6 = vadd.f32 %v2485_v24, %v2393_v44 }
 0x368   : > { %v2557_v13 = vmax.f32 %v2555_v60, 0.0  ;;  %v2526_v50 = vadd.f32 %v2522_v14, %v2489_v6 }
 0x36a   : > { %v2559_v28 = vsub.f32 0.0, %v2557_v13  ;;  %v2552_v32 = vadd.f32 %v2548_v31, %v2526_v50 }
 0x36c   : > { %v2561_v47 = vmul.f32 1.442695, %v2559_v28  ;;  %v2556_v2 = vadd.f32 %v2554_v42, %v2552_v32 }
 0x36e   : > { %3059 = vpow2.f32 %v2561_v47  ;;  %v2558_v1 = vmax.f32 %v2556_v2, 0.0 }
 0x370   : > { %v2560_v41 = vsub.f32 0.0, %v2558_v1 }
 0x372   : > { %v2563_v57 = vmul.f32 1.442695, %v2560_v41 }
 0x374   : > { %3061 = vpow2.f32 %v2563_v57 }
 0x378   : > { %v3060_v35 = vpop.eup %3059 }
 0x379   : > { %v2565_v46 = vadd.f32 1.0, %v3060_v35  ;;  %v2756_v35 = vsub.s32 0, %v6015_v19 }
 0x37b   : > { %3063 = vrcp.f32 %v2565_v46  ;;  %v2760_v46 = vsub.s32 1, %v6015_v19 }
 0x37e   : > { %v3062_v52 = vpop.eup %3061 }
 0x37f   : > { %v2566_v40 = vadd.f32 1.0, %v3062_v52  ;;  %v3073_v52 = vld [vmem:[%s6927_s16] sm:$0xff] }
 0x381   : > { %3065 = vrcp.f32 %v2566_v40 }
 0x385   : > { %v3064_v23 = vpop.eup %3063 }
 0x386   : > { %v2581_v7 = vrot.slane %v3064_v23, %v2580_v53  ;;  %2573 = vst.msk [vmem:[#allocation3] sm:$0x1] %vm2571_vm10, %v3064_v23  ;;  %v2620_v18 = vcombine.high %v3064_v23, %v3064_v23 }
 0x388   : > { %v2582_v29 = vcombine.high %v2581_v7, %v2581_v7  ;;  %v2589_v8 = vrot.slane %v2581_v7, %v2580_v53  ;;  %v2627_v48 = vrot.slane %v2620_v18, %v2580_v53 }
 0x38a   : > { %v2596_v15 = vrot.slane %v2582_v29, %v2580_v53  ;;  %v2604_v51 = vcombine.high %v2589_v8, %v2589_v8  ;;  %v2634_v27 = vrot.slane %v2627_v48, %v2580_v53  ;;  %v2642_v62 = vcombine.high %v2627_v48, %v2627_v48 }
 0x38b   : > { %v3066_v61 = vpop.eup %3065 }
 0x38c   : > { %2597 = vrot.lane.b32.xlu0 %v2596_v15, %s3209_s10  ;;  %v2681_v4 = vrot.slane %v3066_v61, %v2580_v53  ;;  %2673 = vst.msk [vmem:[#allocation3 + $0x1] sm:$0x1] %vm2571_vm10, %v3066_v61  ;;  %v2612_v25 = vcombine.high %v2596_v15, %v2596_v15  ;;  %v2711_v59 = vcombine.high %v3066_v61, %v3066_v61  ;;  %vm6110_vm10 = vcmp.ge.s32.totalorder %v2569_v56, 96 }
 0x38d   : > { %v2649_v20 = vrot.slane %v2642_v62, %v2580_v53  ;;  %v2657_v3 = vcombine.high %v2634_v27, %v2634_v27  ;;  %vm2663_vm12 = vmand %vm6110_vm10, %vm6115_vm11 }
 0x38e   : > { %v2682_v22 = vcombine.high %v2681_v4, %v2681_v4  ;;  %v2689_v12 = vrot.slane %v2681_v4, %v2580_v53  ;;  %v2718_v11 = vrot.slane %v2711_v59, %v2580_v53 }
 0x38f   : > { %v2665_v49 = vcombine.high %v2649_v20, %v2649_v20 }
 0x390   : > { %2605 = vrot.lane.b32.xlu0 %v2604_v51, %s3210_s15  ;;  %v2696_v10 = vrot.slane %v2682_v22, %v2580_v53  ;;  %v2701_v34 = vcombine.high %v2689_v12, %v2689_v12  ;;  %v2725_v33 = vrot.slane %v2718_v11, %v2580_v53  ;;  %v2730_v0 = vcombine.high %v2718_v11, %v2718_v11 }
 0x392   : > { %2697 = vrot.lane.b32.xlu1 %v2696_v10, %s3209_s10  ;;  %v2706_v38 = vcombine.high %v2696_v10, %v2696_v10  ;;  %v2737_v45 = vrot.slane %v2730_v0, %v2580_v53  ;;  %v2742_v31 = vcombine.high %v2725_v33, %v2725_v33 }
 0x394   : > { %2613 = vrot.lane.b32.xlu0 %v2612_v25, %s3211_s14  ;;  %v2747_v37 = vcombine.high %v2737_v45, %v2737_v45 }
 0x396   : > { %2702 = vrot.lane.b32.xlu1 %v2701_v34, %s3210_s15 }
 0x398   : > { %2635 = vrot.lane.b32.xlu0 %v2634_v27, %s3212_s2 }
 0x39a   : > { %2707 = vrot.lane.b32.xlu1 %v2706_v38, %s3211_s14 }
 0x39c   : > { %2650 = vrot.lane.b32.xlu0 %v2649_v20, %s3213_s25 }
 0x39e   : > { %2726 = vrot.lane.b32.xlu1 %v2725_v33, %s3212_s2 }
 0x3a0   : > { %2658 = vrot.lane.b32.xlu0 %v2657_v3, %s3214_s5 }
 0x3a2   : > { %2738 = vrot.lane.b32.xlu1 %v2737_v45, %s3213_s25 }
 0x3a4   : > { %2666 = vrot.lane.b32.xlu0 %v2665_v49, %s3215_s11 }
 0x3a6   : > { %2743 = vrot.lane.b32.xlu1 %v2742_v31, %s3214_s5 }
 0x3aa   : > { %2748 = vrot.lane.b32.xlu1 %v2747_v37, %s3215_s11 }
 0x3fe   : > { %v2598_v55 = vpop.permute.xlu0 %2597 }
 0x3ff   : > { %2603 = vst.msk [vmem:[#allocation3] sm:$0x1] %vm2602_vm13, %v2598_v55 }
 0x402   : > { %v2606_v5 = vpop.permute.xlu0 %2605 }
 0x403   : > { %2611 = vst.msk [vmem:[#allocation3] sm:$0x1] %vm2610_vm0, %v2606_v5 }
 0x404   : > { %v2698_v39 = vpop.permute.xlu1 %2697 }
 0x405   : > { %2700 = vst.msk [vmem:[#allocation3 + $0x1] sm:$0x1] %vm2602_vm13, %v2698_v39  ;;  %vm2669_vm13 = vcmp.ge.s32.totalorder %v2569_v56, 112 }
 0x406   : > { %v2614_v43 = vpop.permute.xlu0 %2613  ;;  %vm2671_vm15 = vmand %vm2669_vm13, %vm2670_vm14 }
 0x407   : > { %2619 = vst.msk [vmem:[#allocation3] sm:$0x1] %vm2618_vm3, %v2614_v43 }
 0x408   : > { %v2703_v44 = vpop.permute.xlu1 %2702 }
 0x409   : > { %2705 = vst.msk [vmem:[#allocation3 + $0x1] sm:$0x1] %vm2610_vm0, %v2703_v44 }
 0x40a   : > { %v2636_v24 = vpop.permute.xlu0 %2635 }
 0x40b   : > { %2641 = vst.msk [vmem:[#allocation3] sm:$0x1] %vm2640_vm6, %v2636_v24 }
 0x40c   : > { %v2708_v28 = vpop.permute.xlu1 %2707 }
 0x40d   : > { %2710 = vst.msk [vmem:[#allocation3 + $0x1] sm:$0x1] %vm2618_vm3, %v2708_v28 }
 0x40e   : > { %v2651_v50 = vpop.permute.xlu0 %2650 }
 0x40f   : > { %2656 = vst.msk [vmem:[#allocation3] sm:$0x1] %vm2655_vm9, %v2651_v50 }
 0x410   : > { %v2727_v47 = vpop.permute.xlu1 %2726 }
 0x411   : > { %2729 = vst.msk [vmem:[#allocation3 + $0x1] sm:$0x1] %vm2640_vm6, %v2727_v47 }
 0x412   : > { %v2659_v32 = vpop.permute.xlu0 %2658 }
 0x413   : > { %2664 = vst.msk [vmem:[#allocation3] sm:$0x1] %vm2663_vm12, %v2659_v32 }
 0x414   : > { %v2739_v2 = vpop.permute.xlu1 %2738 }
 0x415   : > { %2741 = vst.msk [vmem:[#allocation3 + $0x1] sm:$0x1] %vm2655_vm9, %v2739_v2 }
 0x416   : > { %v2667_v1 = vpop.permute.xlu0 %2666 }
 0x417   : > { %2672 = vst.msk [vmem:[#allocation3] sm:$0x1] %vm2671_vm15, %v2667_v1 }
 0x418   : > { %v2744_v41 = vpop.permute.xlu1 %2743 }
 0x419   : > { %2746 = vst.msk [vmem:[#allocation3 + $0x1] sm:$0x1] %vm2663_vm12, %v2744_v41 }
 0x41c   : > { %v2749_v57 = vpop.permute.xlu1 %2748 }
 0x41d   : > { %2751 = vst.msk [vmem:[#allocation3 + $0x1] sm:$0x1] %vm2671_vm15, %v2749_v57 }
 0x424   : > { %v2752_v56 = vld [vmem:[#allocation3] sm:$0x3] }
 0x425   : > { %v2757_v9 = vrot.slane %v2752_v56, %v2756_v35  ;;  %v2761_v63 = vrot.slane %v2752_v56, %v2760_v46 }
 0x427   : > { %v2762_v26 = vcombine.low %v2757_v9, %v2761_v63 }
 0x429   : > { %v2764_v40 = vmul.f32 %v3073_v52, %v2762_v26 }
 0x42b   : > { %2765 = vst [vmem:[%s201_s26] sm:$0xff] %v2764_v40 }
 0x42c   : > { %3132 = shalt.err (!%p3129_p5)
}
 0x42d   : > { %s3133_s18 = scalar_lea.hbm %s6154_s9, 128  ;;  %s3137_s0 = scalar_lea.hbm %s6930_s8, 256 }
 0x42e   : > { %p3134_p10 = scmp.ne.s32.totalorder %s6154_s9, %s3133_s18  ;;  %p3138_p4 = scmp.lt.u32.totalorder %s6154_s9, %s6930_s8 }
 0x42f   : > { %p3139_p6 = scmp.lt.u32.totalorder %s3137_s0, %s3133_s18  ;;  %p3141_p9 = scmp.lt.u32.totalorder %s3133_s18, %s6154_s9 }
 0x430   : > { %p3135_p2 = pnand %p3134_p10, %p6931_p11 }
 0x431   : > { %p3140_p8 = por %p3139_p6, %p3138_p4 }
 0x432   : > { %p3136_p1 = pneg %p3135_p2 }
 0x433   : > { %p3142_p13 = por %p3141_p9, %p3140_p8 }
 0x435   : > { %p3143_p7 = pnand %p3142_p13, %p3136_p1 }
 0x437   : > { %3146 = shalt.err (!%p3143_p7)
}
 0x438   : > { %2984 = dma.vmem_to_hbm [thread:$0]  (%p6931_p11), %s6156_s27, 128, %s6154_s9, %s2767_s13  }
 0x439 PF: > { %s6932_s6 = sld [smem:[#allocation14_spill]]  ;;  %s6933_s10 = sld [smem:[#allocation19_spill]] }
 0x43a   : > { %s6934_s15 = sld [smem:[#allocation17_spill]] }
 0x43f   : > { %s2793_s14 = sand.u32 1, %s6932_s6   ;;  %p6935_p0 = scmp.ne.s32.totalorder %s6933_s10, 0 }
 0x440   : > { %p6936_p3 = scmp.ge.s32.totalorder %s6934_s15, 2  ;;  %s2794_s2 = scalar_lea.sflag [#allocation7], %s2793_s14 }
 0x442   : > { %p2995_p12 = pnand %p6936_p3, %p6935_p0 }
 0x444   : > { %3172 = dma.done.wait (!%p2995_p12), %s2794_s2, 128  }
 0x445   : > { %3174 = vsyncadd (!%p2995_p12), %s2794_s2, 4294967168  ;;  %s6937_s17 = sld [smem:[#allocation20_spill]]  ;;  %s6938_s14 = sld [smem:[#allocation15_spill]] }
 0x446   : > { %s6939_s15 = sld [smem:[#allocation16_spill]]  ;;  %s6940_s16 = sld [smem:[#allocation21_spill]] }
 0x44b   : > { %p18_p5 = scmp.ge.s32.totalorder %s6937_s17, 4  }
 0x44d   :  { %20 = sbr.rel (!%p18_p5) target bundleno = 11 (0xb), region = 83 }
 0x454   :  { %2799 = vsyncpa [#allocation6], 1 }
 0x455   :  { %2801 = vsyncpa [#allocation6 + $0x1], 1 }
 0x456   :  { %2802 = vsyncpa [#allocation7], 1 }
 0x457   :  { %2804 = vsyncpa [#allocation7 + $0x1], 1 }
 0x458   :  { %2805 = vsyncpa [#allocation8], 1 }
 0x459   :  { %2807 = vsyncpa [#allocation8 + $0x1], 1 }

</bundles_post_ra>
